<compile_context>
chip_gen: v6e
topology: v6e:2x2x1
jax: 0.10.0
libtpu: 0.0.40
codegen_flags: <defaults>
</compile_context>

<pallas_src>
import math

import jax
import jax.numpy as jnp
from jax import lax
from jax.experimental import pallas as pl
from jax.experimental.pallas import tpu as pltpu

# ---------------- configuration (small, consistent with the module) ----------
B = 2
IMG = 16
PATCH = 4
NUM_LAYERS = 2
NUM_HEADS = 2
HIDDEN = 32
MLP_DIM = 64
NUM_CLASSES = 10
NUM_PATCHES = (IMG // PATCH) ** 2      # 16
SEQ = NUM_PATCHES + 1                  # 17
T = B * SEQ                            # 34 rows: [b0 patches | b1 patches | cls_b0 | cls_b1]
NPB = B * NUM_PATCHES                  # 32 (class-token rows start here; 8-aligned)
HEAD_DIM = HIDDEN // NUM_HEADS         # 16
LN_EPS = 1e-6                          # torchvision ViT uses LayerNorm(eps=1e-6)
LANES = 128                            # lane width of the packed slabs / padded logits

# ---- weight-slab row offsets (all rows are 128 lanes wide, fp32) -------------
W_PATCH = 0                            # rows [0,16):    folded conv1+patch proj (lanes :H)
W_HEAD = W_PATCH + PATCH * PATCH       # rows [16,48):   classifier weight (lane padded)
W_LAYER0 = W_HEAD + HIDDEN             # per layer: qkv_fold(32) | fc1(32) | fc2(64)
W_LSTRIDE = HIDDEN + HIDDEN + MLP_DIM  # 128 rows / layer

# ---- vector/bias-slab row offsets --------------------------------------------
V_XBIAS = 0                            # rows [0,T):     per-token additive term (lanes :H)
V_LNF_G = T
V_LNF_B = T + 1
V_HEAD_B = T + 2
V_LAYER0 = T + 3                       # per layer: ln1_g,ln1_b,qkv_b,out_b,ln2_g,ln2_b,fc1_b,fc2_b
V_LSTRIDE = 8


# ---------------- in-kernel helpers ------------------------------------------
def _erf(x):
    # Abramowitz & Stegun 7.1.26 polynomial (|err| < 1.5e-7 ~ fp32 precision).
    a1, a2, a3, a4, a5 = 0.254829592, -0.284496736, 1.421413741, -1.453152027, 1.061405429
    p = 0.3275911
    s = jnp.where(x >= 0.0, 1.0, -1.0)
    z = jnp.abs(x)
    t = 1.0 / (1.0 + p * z)                      # exact divide (accuracy per review)
    poly = ((((a5 * t + a4) * t + a3) * t + a2) * t + a1) * t
    return s * (1.0 - poly * jnp.exp(-z * z))


def _gelu_exact(x):
    # torch.nn.GELU() default (approximate='none'): x * 0.5 * (1 + erf(x/sqrt(2)))
    return 0.5 * x * (1.0 + _erf(x * (1.0 / math.sqrt(2.0))))


def _layernorm(x, g, b, eps=LN_EPS):
    mean = jnp.mean(x, axis=-1, keepdims=True)
    c = x - mean
    var = jnp.mean(c * c, axis=-1, keepdims=True)
    return c * lax.rsqrt(var + eps) * g + b


# ---------------- fused whole-model kernel ------------------------------------
def _vit_fused_kernel(patches_ref, w_ref, v_ref, logits_ref):
    H = HIDDEN
    scale = 1.0 / math.sqrt(HEAD_DIM)

    # Token assembly: a single matmul + add.  The last B rows of `patches` are zero,
    # so the class-token rows come entirely from the precomputed additive term.
    x = (jnp.dot(patches_ref[...], w_ref[W_PATCH:W_PATCH + PATCH * PATCH, 0:H],
                 preferred_element_type=jnp.float32)
         + v_ref[V_XBIAS:V_XBIAS + T, 0:H])                                  # (T, H)

    # Additive block mask: a row may only attend to rows of its own batch element.
    ri = lax.broadcasted_iota(jnp.int32, (T, T), 0)
    ci = lax.broadcasted_iota(jnp.int32, (T, T), 1)

    def _bid(i):    # batch id under layout [b0 patches | b1 patches | cls_b0 | cls_b1]
        pid = sum((i >= b * NUM_PATCHES).astype(jnp.int32) for b in range(1, B))
        return jnp.where(i < NPB, pid, i - NPB)

    mask = jnp.where(_bid(ri) == _bid(ci), 0.0, -1e30)                       # (T, T)

    # TODO(synk): dropout layers (p=0.1) are omitted — eval-mode identity semantics.
    for l in range(NUM_LAYERS):                                              # fully unrolled
        wb = W_LAYER0 + l * W_LSTRIDE
        vb = V_LAYER0 + l * V_LSTRIDE

        # ---- multi-head self-attention (output projection folded into V columns) ----
        y = _layernorm(x, v_ref[vb:vb + 1, 0:H], v_ref[vb + 1:vb + 2, 0:H])
        qkv = (jnp.dot(y, w_ref[wb:wb + H, :], preferred_element_type=jnp.float32)
               + v_ref[vb + 2:vb + 3, :])                                    # (T, 128)
        attn = None
        for h in range(NUM_HEADS):
            lo = h * HEAD_DIM
            qh = qkv[:, lo:lo + HEAD_DIM] * scale                            # (T, Dh)
            kh = qkv[:, H + lo:H + lo + HEAD_DIM]                            # (T, Dh)
            s = lax.dot_general(qh, kh, (((1,), (1,)), ((), ())),
                                preferred_element_type=jnp.float32) + mask   # (T, T)
            m = jnp.max(s, axis=-1, keepdims=True)
            e = jnp.exp(s - m)
            d = jnp.sum(e, axis=-1, keepdims=True)
            r = pl.reciprocal(d, approx=True)
            r = r * (2.0 - d * r)                  # one Newton step -> ~fp32 accuracy
            p = e * r
            vf = qkv[:, 2 * H + h * H:2 * H + (h + 1) * H]   # (T, H): Wv_h @ Wo_h folded
            ch = jnp.dot(p, vf, preferred_element_type=jnp.float32)          # (T, H)
            attn = ch if attn is None else attn + ch
        x = x + attn + v_ref[vb + 3:vb + 4, 0:H]             # residual (+ out_proj bias)

        # ---- MLP block (exact erf GELU) ----
        y = _layernorm(x, v_ref[vb + 4:vb + 5, 0:H], v_ref[vb + 5:vb + 6, 0:H])
        hmid = _gelu_exact(jnp.dot(y, w_ref[wb + H:wb + 2 * H, 0:MLP_DIM],
                                   preferred_element_type=jnp.float32)
                           + v_ref[vb + 6:vb + 7, 0:MLP_DIM])                # (T, MLP)
        x = x + (jnp.dot(hmid, w_ref[wb + 2 * H:wb + 2 * H + MLP_DIM, 0:H],
                         preferred_element_type=jnp.float32)
                 + v_ref[vb + 7:vb + 8, 0:H])

    # ---- final LayerNorm + classifier on the class-token rows (rows NPB..T) ----
    cls = x[NPB:T, :]                                        # (B, H), 8-aligned slice
    yc = _layernorm(cls, v_ref[V_LNF_G:V_LNF_G + 1, 0:H], v_ref[V_LNF_B:V_LNF_B + 1, 0:H])
    logits_ref[...] = (jnp.dot(yc, w_ref[W_HEAD:W_HEAD + H, :],
                               preferred_element_type=jnp.float32)
                       + v_ref[V_HEAD_B:V_HEAD_B + 1, :])    # single dense (B, 128) store


# ---------------- parameters --------------------------------------------------
def init_params(key):
    keys = jax.random.split(key, 128)
    counter = [0]

    def nrm(*shape):
        k = keys[counter[0]]
        counter[0] += 1
        return 0.02 * jax.random.normal(k, shape, dtype=jnp.float32)

    params = {
        "conv1_w": nrm(1, 3),                       # Conv2d(1, 3, 1) weight (in,out)
        "conv1_b": nrm(3),
        "patch_w": nrm(3 * PATCH * PATCH, HIDDEN),  # conv_proj as linear over patch
        "patch_b": nrm(HIDDEN),
        "cls_token": nrm(1, 1, HIDDEN),
        "pos_emb": nrm(1, SEQ, HIDDEN),
        "ln_f_g": jnp.ones((HIDDEN,), jnp.float32),
        "ln_f_b": jnp.zeros((HIDDEN,), jnp.float32),
        "head_w": nrm(HIDDEN, NUM_CLASSES),
        "head_b": nrm(NUM_CLASSES),
        "layers": [],
    }
    for _ in range(NUM_LAYERS):
        params["layers"].append({
            "ln1_g": jnp.ones((HIDDEN,), jnp.float32),
            "ln1_b": jnp.zeros((HIDDEN,), jnp.float32),
            "qkv_w": nrm(HIDDEN, 3 * HIDDEN),
            "qkv_b": nrm(3 * HIDDEN),
            "out_w": nrm(HIDDEN, HIDDEN),
            "out_b": nrm(HIDDEN),
            "ln2_g": jnp.ones((HIDDEN,), jnp.float32),
            "ln2_b": jnp.zeros((HIDDEN,), jnp.float32),
            "fc1_w": nrm(HIDDEN, MLP_DIM),
            "fc1_b": nrm(MLP_DIM),
            "fc2_w": nrm(MLP_DIM, HIDDEN),
            "fc2_b": nrm(HIDDEN),
        })
    return params


# ---------------- weight preprocessing & slab packing (tiny, jit-fused XLA) ----
def _pad_lanes(a, width=LANES):
    return jnp.pad(a, ((0, 0), (0, width - a.shape[1])))


def _row(vec, width=LANES):
    vec = jnp.asarray(vec).reshape(1, -1)
    return jnp.pad(vec, ((0, 0), (0, width - vec.shape[1])))


def _preprocess(params):
    p = PATCH
    H = HIDDEN
    Dh = HEAD_DIM

    # Fold conv1 (1x1 conv = per-channel scale + bias) into the patch projection:
    #   w_eff[pix, h] = sum_c conv_w[c] * patch_w[c*p*p + pix, h]
    #   b_eff[h]      = patch_b[h] + sum_{c,pix} conv_b[c] * patch_w[c*p*p + pix, h]
    pw = params["patch_w"].reshape(3, p * p, H)
    conv_w = params["conv1_w"].reshape(3)
    conv_b = params["conv1_b"].reshape(3)
    w_eff = jnp.einsum("c,cph->ph", conv_w, pw)                          # (p*p, H)
    b_eff = params["patch_b"] + jnp.einsum("c,cph->h", conv_b, pw)       # (H,)

    # Per-row additive token term (patch bias + pos emb; cls token + its pos emb).
    pos = params["pos_emb"].reshape(SEQ, H)                              # row 0 = cls position
    cls_tok = params["cls_token"].reshape(H)
    patch_rows = jnp.tile(b_eff[None, :] + pos[1:, :], (B, 1))           # (B*P, H)
    cls_rows = jnp.broadcast_to(cls_tok + pos[0], (B, H))                # (B, H)
    x_bias = jnp.concatenate([patch_rows, cls_rows], axis=0)             # (T, H)

    w_rows = [_pad_lanes(w_eff), _pad_lanes(params["head_w"])]
    v_rows = [_pad_lanes(x_bias), _row(params["ln_f_g"]), _row(params["ln_f_b"]),
              _row(params["head_b"])]

    for layer in params["layers"]:
        Wqkv, bqkv, Wo = layer["qkv_w"], layer["qkv_b"], layer["out_w"]
        Wq, Wk, Wv = Wqkv[:, :H], Wqkv[:, H:2 * H], Wqkv[:, 2 * H:]
        bq, bk, bv = bqkv[:H], bqkv[H:2 * H], bqkv[2 * H:]
        # Fold the attention output projection into the V columns (per head).
        v_folds = [Wv[:, h * Dh:(h + 1) * Dh] @ Wo[h * Dh:(h + 1) * Dh, :]
                   for h in range(NUM_HEADS)]
        bv_folds = [bv[h * Dh:(h + 1) * Dh] @ Wo[h * Dh:(h + 1) * Dh, :]
                    for h in range(NUM_HEADS)]
        qkv_w_fold = jnp.concatenate([Wq, Wk] + v_folds, axis=1)         # (H, 4H) = (32, 128)
        qkv_b_fold = jnp.concatenate([bq, bk] + bv_folds, axis=0)        # (4H,)

        w_rows += [qkv_w_fold, _pad_lanes(layer["fc1_w"]), _pad_lanes(layer["fc2_w"])]
        v_rows += [_row(layer["ln1_g"]), _row(layer["ln1_b"]), _row(qkv_b_fold),
                   _row(layer["out_b"]), _row(layer["ln2_g"]), _row(layer["ln2_b"]),
                   _row(layer["fc1_b"]), _row(layer["fc2_b"])]

    w_slab = jnp.concatenate(w_rows, axis=0).astype(jnp.float32)         # (304, 128)
    v_slab = jnp.concatenate(v_rows, axis=0).astype(jnp.float32)         # (53, 128)
    return w_slab, v_slab


# ---------------- forward pass -------------------------------------------------
def vit_forward(params, x):
    # x: (B, 1, H, W) NCHW grayscale, matching the PyTorch module
    Bn, C, Himg, Wimg = x.shape
    p = PATCH
    nh, nw = Himg // p, Wimg // p
    P = nh * nw

    # Patchify the grayscale image (1x1 conv folded into w_eff inside the slab).
    patches = (x.reshape(Bn, nh, p, nw, p)
                 .transpose(0, 1, 3, 2, 4)
                 .reshape(Bn * P, p * p)).astype(jnp.float32)            # (B*P, 16)
    # Append B zero rows; they become the class tokens via the additive bias term.
    patches = jnp.concatenate(
        [patches, jnp.zeros((Bn, p * p), jnp.float32)], axis=0)          # (T, 16)

    w_slab, v_slab = _preprocess(params)

    logits_pad = pl.pallas_call(
        _vit_fused_kernel,
        out_shape=jax.ShapeDtypeStruct((Bn, LANES), jnp.float32),
        cost_estimate=pl.CostEstimate(flops=1_600_000, transcendentals=10_000,
                                      bytes_accessed=190_000),
    )(patches, w_slab, v_slab)

    return logits_pad[:, :NUM_CLASSES]


if __name__ == "__main__":
    key = jax.random.PRNGKey(0)
    pkey, xkey = jax.random.split(key)
    params = init_params(pkey)
    x = jax.random.normal(xkey, (B, 1, IMG, IMG), dtype=jnp.float32)     # NCHW grayscale

    logits = jax.jit(vit_forward)(params, x)
    jax.block_until_ready(logits)
    assert logits.shape == (B, NUM_CLASSES)
    assert bool(jnp.all(jnp.isfinite(logits)))
    print("KERNEL_OK")
</pallas_src>

<mosaic_0001>
module attributes {stable_mosaic.version = 11 : i64} {
  func.func @_vit_fused_kernel(%arg0: memref<34x16xf32, #tpu.memory_space<vmem>>, %arg1: memref<304x128xf32, #tpu.memory_space<vmem>>, %arg2: memref<53x128xf32, #tpu.memory_space<vmem>>, %arg3: memref<2x128xf32, #tpu.memory_space<vmem>>) attributes {dimension_semantics = [], scalar_prefetch = 0 : i64, scratch_operands = 0 : i64, tpu.core_type = #tpu.core_type<tc>} {
    %c0 = arith.constant 0 : index
    %c0_0 = arith.constant 0 : index
    %0 = vector.load %arg0[%c0, %c0_0] : memref<34x16xf32, #tpu.memory_space<vmem>>, vector<34x16xf32>
    %c0_1 = arith.constant 0 : index
    %c0_2 = arith.constant 0 : index
    %1 = vector.load %arg1[%c0_1, %c0_2] : memref<304x128xf32, #tpu.memory_space<vmem>>, vector<16x32xf32>
    %cst = arith.constant dense<0.000000e+00> : vector<34x32xf32>
    %2 = tpu.matmul %0, %1, %cst {dimension_numbers = #tpu.dot_dimension_numbers<[1], [0], [0], [1], [0, 0, 1, 1], [], []>} : vector<34x16xf32>, vector<16x32xf32>, vector<34x32xf32> -> vector<34x32xf32>
    %c0_3 = arith.constant 0 : index
    %c0_4 = arith.constant 0 : index
    %3 = vector.load %arg2[%c0_3, %c0_4] : memref<53x128xf32, #tpu.memory_space<vmem>>, vector<34x32xf32>
    %4 = arith.addf %2, %3 : vector<34x32xf32>
    %5 = tpu.iota {dimensions = array<i32: 0>} : vector<34x34xi32>
    %6 = tpu.iota {dimensions = array<i32: 1>} : vector<34x34xi32>
    %c16_i32 = arith.constant 16 : i32
    %7 = vector.broadcast %c16_i32 : i32 to vector<34x34xi32>
    %8 = arith.cmpi sge, %5, %7 : vector<34x34xi32>
    %9 = arith.extui %8 : vector<34x34xi1> to vector<34x34xi32>
    %c0_i32 = arith.constant 0 : i32
    %10 = vector.broadcast %c0_i32 : i32 to vector<34x34xi32>
    %11 = arith.addi %10, %9 : vector<34x34xi32>
    %c32_i32 = arith.constant 32 : i32
    %12 = vector.broadcast %c32_i32 : i32 to vector<34x34xi32>
    %13 = arith.cmpi slt, %5, %12 : vector<34x34xi32>
    %c32_i32_5 = arith.constant 32 : i32
    %14 = vector.broadcast %c32_i32_5 : i32 to vector<34x34xi32>
    %15 = arith.subi %5, %14 : vector<34x34xi32>
    %16 = arith.select %13, %11, %15 : vector<34x34xi1>, vector<34x34xi32>
    %c16_i32_6 = arith.constant 16 : i32
    %17 = vector.broadcast %c16_i32_6 : i32 to vector<34x34xi32>
    %18 = arith.cmpi sge, %6, %17 : vector<34x34xi32>
    %19 = arith.extui %18 : vector<34x34xi1> to vector<34x34xi32>
    %c0_i32_7 = arith.constant 0 : i32
    %20 = vector.broadcast %c0_i32_7 : i32 to vector<34x34xi32>
    %21 = arith.addi %20, %19 : vector<34x34xi32>
    %c32_i32_8 = arith.constant 32 : i32
    %22 = vector.broadcast %c32_i32_8 : i32 to vector<34x34xi32>
    %23 = arith.cmpi slt, %6, %22 : vector<34x34xi32>
    %c32_i32_9 = arith.constant 32 : i32
    %24 = vector.broadcast %c32_i32_9 : i32 to vector<34x34xi32>
    %25 = arith.subi %6, %24 : vector<34x34xi32>
    %26 = arith.select %23, %21, %25 : vector<34x34xi1>, vector<34x34xi32>
    %27 = arith.cmpi eq, %16, %26 : vector<34x34xi32>
    %cst_10 = arith.constant 0.000000e+00 : f32
    %cst_11 = arith.constant -1.000000e+30 : f32
    %28 = vector.broadcast %cst_10 : f32 to vector<34x34xf32>
    %29 = vector.broadcast %cst_11 : f32 to vector<34x34xf32>
    %30 = arith.select %27, %28, %29 : vector<34x34xi1>, vector<34x34xf32>
    %c37 = arith.constant 37 : index
    %c0_12 = arith.constant 0 : index
    %31 = vector.load %arg2[%c37, %c0_12] : memref<53x128xf32, #tpu.memory_space<vmem>>, vector<1x32xf32>
    %c38 = arith.constant 38 : index
    %c0_13 = arith.constant 0 : index
    %32 = vector.load %arg2[%c38, %c0_13] : memref<53x128xf32, #tpu.memory_space<vmem>>, vector<1x32xf32>
    %cst_14 = arith.constant dense<0.000000e+00> : vector<34xf32>
    %33 = vector.multi_reduction <add>, %4, %cst_14 [1] : vector<34x32xf32> to vector<34xf32>
    %34 = vector.shape_cast %33 : vector<34xf32> to vector<34x1xf32>
    %cst_15 = arith.constant 3.200000e+01 : f32
    %35 = vector.broadcast %cst_15 : f32 to vector<34x1xf32>
    %36 = arith.divf %34, %35 : vector<34x1xf32>
    %37 = vector.broadcast %36 : vector<34x1xf32> to vector<34x32xf32>
    %38 = arith.subf %4, %37 : vector<34x32xf32>
    %39 = arith.mulf %38, %38 : vector<34x32xf32>
    %cst_16 = arith.constant dense<0.000000e+00> : vector<34xf32>
    %40 = vector.multi_reduction <add>, %39, %cst_16 [1] : vector<34x32xf32> to vector<34xf32>
    %41 = vector.shape_cast %40 : vector<34xf32> to vector<34x1xf32>
    %cst_17 = arith.constant 3.200000e+01 : f32
    %42 = vector.broadcast %cst_17 : f32 to vector<34x1xf32>
    %43 = arith.divf %41, %42 : vector<34x1xf32>
    %cst_18 = arith.constant 9.99999997E-7 : f32
    %44 = vector.broadcast %cst_18 : f32 to vector<34x1xf32>
    %45 = arith.addf %43, %44 : vector<34x1xf32>
    %46 = math.rsqrt %45 : vector<34x1xf32>
    %47 = vector.broadcast %46 : vector<34x1xf32> to vector<34x32xf32>
    %48 = arith.mulf %38, %47 : vector<34x32xf32>
    %49 = vector.broadcast %31 : vector<1x32xf32> to vector<34x32xf32>
    %50 = arith.mulf %48, %49 : vector<34x32xf32>
    %51 = vector.broadcast %32 : vector<1x32xf32> to vector<34x32xf32>
    %52 = arith.addf %50, %51 : vector<34x32xf32>
    %c48 = arith.constant 48 : index
    %c0_19 = arith.constant 0 : index
    %53 = vector.load %arg1[%c48, %c0_19] : memref<304x128xf32, #tpu.memory_space<vmem>>, vector<32x128xf32>
    %cst_20 = arith.constant dense<0.000000e+00> : vector<34x128xf32>
    %54 = tpu.matmul %52, %53, %cst_20 {dimension_numbers = #tpu.dot_dimension_numbers<[1], [0], [0], [1], [0, 0, 1, 1], [], []>} : vector<34x32xf32>, vector<32x128xf32>, vector<34x128xf32> -> vector<34x128xf32>
    %c39 = arith.constant 39 : index
    %c0_21 = arith.constant 0 : index
    %55 = vector.load %arg2[%c39, %c0_21] : memref<53x128xf32, #tpu.memory_space<vmem>>, vector<1x128xf32>
    %56 = vector.broadcast %55 : vector<1x128xf32> to vector<34x128xf32>
    %57 = arith.addf %54, %56 : vector<34x128xf32>
    %58 = vector.extract_strided_slice %57 {offsets = [0, 0], sizes = [34, 16], strides = [1, 1]} : vector<34x128xf32> to vector<34x16xf32>
    %cst_22 = arith.constant 2.500000e-01 : f32
    %59 = vector.broadcast %cst_22 : f32 to vector<34x16xf32>
    %60 = arith.mulf %58, %59 : vector<34x16xf32>
    %61 = vector.extract_strided_slice %57 {offsets = [0, 32], sizes = [34, 16], strides = [1, 1]} : vector<34x128xf32> to vector<34x16xf32>
    %cst_23 = arith.constant dense<0.000000e+00> : vector<34x34xf32>
    %62 = tpu.matmul %60, %61, %cst_23 {dimension_numbers = #tpu.dot_dimension_numbers<[1], [1], [0], [0], [0, 0, 1, 0], [], []>} : vector<34x16xf32>, vector<34x16xf32>, vector<34x34xf32> -> vector<34x34xf32>
    %63 = arith.addf %62, %30 : vector<34x34xf32>
    %cst_24 = arith.constant dense<0xFF800000> : vector<34xf32>
    %64 = vector.multi_reduction <maximumf>, %63, %cst_24 [1] : vector<34x34xf32> to vector<34xf32>
    %65 = vector.shape_cast %64 : vector<34xf32> to vector<34x1xf32>
    %66 = vector.broadcast %65 : vector<34x1xf32> to vector<34x34xf32>
    %67 = arith.subf %63, %66 : vector<34x34xf32>
    %68 = math.exp %67 : vector<34x34xf32>
    %cst_25 = arith.constant dense<0.000000e+00> : vector<34xf32>
    %69 = vector.multi_reduction <add>, %68, %cst_25 [1] : vector<34x34xf32> to vector<34xf32>
    %70 = vector.shape_cast %69 : vector<34xf32> to vector<34x1xf32>
    %71 = tpu.reciprocal %70 {approx = true} : vector<34x1xf32> -> vector<34x1xf32>
    %72 = arith.mulf %70, %71 : vector<34x1xf32>
    %cst_26 = arith.constant 2.000000e+00 : f32
    %73 = vector.broadcast %cst_26 : f32 to vector<34x1xf32>
    %74 = arith.subf %73, %72 : vector<34x1xf32>
    %75 = arith.mulf %71, %74 : vector<34x1xf32>
    %76 = vector.broadcast %75 : vector<34x1xf32> to vector<34x34xf32>
    %77 = arith.mulf %68, %76 : vector<34x34xf32>
    %78 = vector.extract_strided_slice %57 {offsets = [0, 64], sizes = [34, 32], strides = [1, 1]} : vector<34x128xf32> to vector<34x32xf32>
    %cst_27 = arith.constant dense<0.000000e+00> : vector<34x32xf32>
    %79 = tpu.matmul %77, %78, %cst_27 {dimension_numbers = #tpu.dot_dimension_numbers<[1], [0], [0], [1], [0, 0, 1, 1], [], []>} : vector<34x34xf32>, vector<34x32xf32>, vector<34x32xf32> -> vector<34x32xf32>
    %80 = vector.extract_strided_slice %57 {offsets = [0, 16], sizes = [34, 16], strides = [1, 1]} : vector<34x128xf32> to vector<34x16xf32>
    %cst_28 = arith.constant 2.500000e-01 : f32
    %81 = vector.broadcast %cst_28 : f32 to vector<34x16xf32>
    %82 = arith.mulf %80, %81 : vector<34x16xf32>
    %83 = vector.extract_strided_slice %57 {offsets = [0, 48], sizes = [34, 16], strides = [1, 1]} : vector<34x128xf32> to vector<34x16xf32>
    %cst_29 = arith.constant dense<0.000000e+00> : vector<34x34xf32>
    %84 = tpu.matmul %82, %83, %cst_29 {dimension_numbers = #tpu.dot_dimension_numbers<[1], [1], [0], [0], [0, 0, 1, 0], [], []>} : vector<34x16xf32>, vector<34x16xf32>, vector<34x34xf32> -> vector<34x34xf32>
    %85 = arith.addf %84, %30 : vector<34x34xf32>
    %cst_30 = arith.constant dense<0xFF800000> : vector<34xf32>
    %86 = vector.multi_reduction <maximumf>, %85, %cst_30 [1] : vector<34x34xf32> to vector<34xf32>
    %87 = vector.shape_cast %86 : vector<34xf32> to vector<34x1xf32>
    %88 = vector.broadcast %87 : vector<34x1xf32> to vector<34x34xf32>
    %89 = arith.subf %85, %88 : vector<34x34xf32>
    %90 = math.exp %89 : vector<34x34xf32>
    %cst_31 = arith.constant dense<0.000000e+00> : vector<34xf32>
    %91 = vector.multi_reduction <add>, %90, %cst_31 [1] : vector<34x34xf32> to vector<34xf32>
    %92 = vector.shape_cast %91 : vector<34xf32> to vector<34x1xf32>
    %93 = tpu.reciprocal %92 {approx = true} : vector<34x1xf32> -> vector<34x1xf32>
    %94 = arith.mulf %92, %93 : vector<34x1xf32>
    %cst_32 = arith.constant 2.000000e+00 : f32
    %95 = vector.broadcast %cst_32 : f32 to vector<34x1xf32>
    %96 = arith.subf %95, %94 : vector<34x1xf32>
    %97 = arith.mulf %93, %96 : vector<34x1xf32>
    %98 = vector.broadcast %97 : vector<34x1xf32> to vector<34x34xf32>
    %99 = arith.mulf %90, %98 : vector<34x34xf32>
    %100 = vector.extract_strided_slice %57 {offsets = [0, 96], sizes = [34, 32], strides = [1, 1]} : vector<34x128xf32> to vector<34x32xf32>
    %cst_33 = arith.constant dense<0.000000e+00> : vector<34x32xf32>
    %101 = tpu.matmul %99, %100, %cst_33 {dimension_numbers = #tpu.dot_dimension_numbers<[1], [0], [0], [1], [0, 0, 1, 1], [], []>} : vector<34x34xf32>, vector<34x32xf32>, vector<34x32xf32> -> vector<34x32xf32>
    %102 = arith.addf %79, %101 : vector<34x32xf32>
    %103 = arith.addf %4, %102 : vector<34x32xf32>
    %c40 = arith.constant 40 : index
    %c0_34 = arith.constant 0 : index
    %104 = vector.load %arg2[%c40, %c0_34] : memref<53x128xf32, #tpu.memory_space<vmem>>, vector<1x32xf32>
    %105 = vector.broadcast %104 : vector<1x32xf32> to vector<34x32xf32>
    %106 = arith.addf %103, %105 : vector<34x32xf32>
    %c41 = arith.constant 41 : index
    %c0_35 = arith.constant 0 : index
    %107 = vector.load %arg2[%c41, %c0_35] : memref<53x128xf32, #tpu.memory_space<vmem>>, vector<1x32xf32>
    %c42 = arith.constant 42 : index
    %c0_36 = arith.constant 0 : index
    %108 = vector.load %arg2[%c42, %c0_36] : memref<53x128xf32, #tpu.memory_space<vmem>>, vector<1x32xf32>
    %cst_37 = arith.constant dense<0.000000e+00> : vector<34xf32>
    %109 = vector.multi_reduction <add>, %106, %cst_37 [1] : vector<34x32xf32> to vector<34xf32>
    %110 = vector.shape_cast %109 : vector<34xf32> to vector<34x1xf32>
    %cst_38 = arith.constant 3.200000e+01 : f32
    %111 = vector.broadcast %cst_38 : f32 to vector<34x1xf32>
    %112 = arith.divf %110, %111 : vector<34x1xf32>
    %113 = vector.broadcast %112 : vector<34x1xf32> to vector<34x32xf32>
    %114 = arith.subf %106, %113 : vector<34x32xf32>
    %115 = arith.mulf %114, %114 : vector<34x32xf32>
    %cst_39 = arith.constant dense<0.000000e+00> : vector<34xf32>
    %116 = vector.multi_reduction <add>, %115, %cst_39 [1] : vector<34x32xf32> to vector<34xf32>
    %117 = vector.shape_cast %116 : vector<34xf32> to vector<34x1xf32>
    %cst_40 = arith.constant 3.200000e+01 : f32
    %118 = vector.broadcast %cst_40 : f32 to vector<34x1xf32>
    %119 = arith.divf %117, %118 : vector<34x1xf32>
    %cst_41 = arith.constant 9.99999997E-7 : f32
    %120 = vector.broadcast %cst_41 : f32 to vector<34x1xf32>
    %121 = arith.addf %119, %120 : vector<34x1xf32>
    %122 = math.rsqrt %121 : vector<34x1xf32>
    %123 = vector.broadcast %122 : vector<34x1xf32> to vector<34x32xf32>
    %124 = arith.mulf %114, %123 : vector<34x32xf32>
    %125 = vector.broadcast %107 : vector<1x32xf32> to vector<34x32xf32>
    %126 = arith.mulf %124, %125 : vector<34x32xf32>
    %127 = vector.broadcast %108 : vector<1x32xf32> to vector<34x32xf32>
    %128 = arith.addf %126, %127 : vector<34x32xf32>
    %c80 = arith.constant 80 : index
    %c0_42 = arith.constant 0 : index
    %129 = vector.load %arg1[%c80, %c0_42] : memref<304x128xf32, #tpu.memory_space<vmem>>, vector<32x64xf32>
    %cst_43 = arith.constant dense<0.000000e+00> : vector<34x64xf32>
    %130 = tpu.matmul %128, %129, %cst_43 {dimension_numbers = #tpu.dot_dimension_numbers<[1], [0], [0], [1], [0, 0, 1, 1], [], []>} : vector<34x32xf32>, vector<32x64xf32>, vector<34x64xf32> -> vector<34x64xf32>
    %c43 = arith.constant 43 : index
    %c0_44 = arith.constant 0 : index
    %131 = vector.load %arg2[%c43, %c0_44] : memref<53x128xf32, #tpu.memory_space<vmem>>, vector<1x64xf32>
    %132 = vector.broadcast %131 : vector<1x64xf32> to vector<34x64xf32>
    %133 = arith.addf %130, %132 : vector<34x64xf32>
    %cst_45 = arith.constant 5.000000e-01 : f32
    %134 = vector.broadcast %cst_45 : f32 to vector<34x64xf32>
    %135 = arith.mulf %134, %133 : vector<34x64xf32>
    %cst_46 = arith.constant 0.707106769 : f32
    %136 = vector.broadcast %cst_46 : f32 to vector<34x64xf32>
    %137 = arith.mulf %133, %136 : vector<34x64xf32>
    %cst_47 = arith.constant 0.000000e+00 : f32
    %138 = vector.broadcast %cst_47 : f32 to vector<34x64xf32>
    %139 = arith.cmpf oge, %137, %138 : vector<34x64xf32>
    %cst_48 = arith.constant 1.000000e+00 : f32
    %cst_49 = arith.constant -1.000000e+00 : f32
    %140 = vector.broadcast %cst_48 : f32 to vector<34x64xf32>
    %141 = vector.broadcast %cst_49 : f32 to vector<34x64xf32>
    %142 = arith.select %139, %140, %141 : vector<34x64xi1>, vector<34x64xf32>
    %143 = math.absf %137 : vector<34x64xf32>
    %cst_50 = arith.constant 0.327591091 : f32
    %144 = vector.broadcast %cst_50 : f32 to vector<34x64xf32>
    %145 = arith.mulf %144, %143 : vector<34x64xf32>
    %cst_51 = arith.constant 1.000000e+00 : f32
    %146 = vector.broadcast %cst_51 : f32 to vector<34x64xf32>
    %147 = arith.addf %146, %145 : vector<34x64xf32>
    %cst_52 = arith.constant 1.000000e+00 : f32
    %148 = vector.broadcast %cst_52 : f32 to vector<34x64xf32>
    %149 = arith.divf %148, %147 : vector<34x64xf32>
    %cst_53 = arith.constant 1.06140542 : f32
    %150 = vector.broadcast %cst_53 : f32 to vector<34x64xf32>
    %151 = arith.mulf %150, %149 : vector<34x64xf32>
    %cst_54 = arith.constant -1.45315206 : f32
    %152 = vector.broadcast %cst_54 : f32 to vector<34x64xf32>
    %153 = arith.addf %151, %152 : vector<34x64xf32>
    %154 = arith.mulf %153, %149 : vector<34x64xf32>
    %cst_55 = arith.constant 1.42141378 : f32
    %155 = vector.broadcast %cst_55 : f32 to vector<34x64xf32>
    %156 = arith.addf %154, %155 : vector<34x64xf32>
    %157 = arith.mulf %156, %149 : vector<34x64xf32>
    %cst_56 = arith.constant -0.284496725 : f32
    %158 = vector.broadcast %cst_56 : f32 to vector<34x64xf32>
    %159 = arith.addf %157, %158 : vector<34x64xf32>
    %160 = arith.mulf %159, %149 : vector<34x64xf32>
    %cst_57 = arith.constant 0.254829586 : f32
    %161 = vector.broadcast %cst_57 : f32 to vector<34x64xf32>
    %162 = arith.addf %160, %161 : vector<34x64xf32>
    %163 = arith.mulf %162, %149 : vector<34x64xf32>
    %cst_58 = arith.constant 0.000000e+00 : f32
    %164 = vector.broadcast %cst_58 : f32 to vector<34x64xf32>
    %165 = arith.subf %164, %143 : vector<34x64xf32>
    %166 = arith.mulf %165, %143 : vector<34x64xf32>
    %167 = math.exp %166 : vector<34x64xf32>
    %168 = arith.mulf %163, %167 : vector<34x64xf32>
    %cst_59 = arith.constant 1.000000e+00 : f32
    %169 = vector.broadcast %cst_59 : f32 to vector<34x64xf32>
    %170 = arith.subf %169, %168 : vector<34x64xf32>
    %171 = arith.mulf %142, %170 : vector<34x64xf32>
    %cst_60 = arith.constant 1.000000e+00 : f32
    %172 = vector.broadcast %cst_60 : f32 to vector<34x64xf32>
    %173 = arith.addf %172, %171 : vector<34x64xf32>
    %174 = arith.mulf %135, %173 : vector<34x64xf32>
    %c112 = arith.constant 112 : index
    %c0_61 = arith.constant 0 : index
    %175 = vector.load %arg1[%c112, %c0_61] : memref<304x128xf32, #tpu.memory_space<vmem>>, vector<64x32xf32>
    %cst_62 = arith.constant dense<0.000000e+00> : vector<34x32xf32>
    %176 = tpu.matmul %174, %175, %cst_62 {dimension_numbers = #tpu.dot_dimension_numbers<[1], [0], [0], [1], [0, 0, 1, 1], [], []>} : vector<34x64xf32>, vector<64x32xf32>, vector<34x32xf32> -> vector<34x32xf32>
    %c44 = arith.constant 44 : index
    %c0_63 = arith.constant 0 : index
    %177 = vector.load %arg2[%c44, %c0_63] : memref<53x128xf32, #tpu.memory_space<vmem>>, vector<1x32xf32>
    %178 = vector.broadcast %177 : vector<1x32xf32> to vector<34x32xf32>
    %179 = arith.addf %176, %178 : vector<34x32xf32>
    %180 = arith.addf %106, %179 : vector<34x32xf32>
    %c45 = arith.constant 45 : index
    %c0_64 = arith.constant 0 : index
    %181 = vector.load %arg2[%c45, %c0_64] : memref<53x128xf32, #tpu.memory_space<vmem>>, vector<1x32xf32>
    %c46 = arith.constant 46 : index
    %c0_65 = arith.constant 0 : index
    %182 = vector.load %arg2[%c46, %c0_65] : memref<53x128xf32, #tpu.memory_space<vmem>>, vector<1x32xf32>
    %cst_66 = arith.constant dense<0.000000e+00> : vector<34xf32>
    %183 = vector.multi_reduction <add>, %180, %cst_66 [1] : vector<34x32xf32> to vector<34xf32>
    %184 = vector.shape_cast %183 : vector<34xf32> to vector<34x1xf32>
    %cst_67 = arith.constant 3.200000e+01 : f32
    %185 = vector.broadcast %cst_67 : f32 to vector<34x1xf32>
    %186 = arith.divf %184, %185 : vector<34x1xf32>
    %187 = vector.broadcast %186 : vector<34x1xf32> to vector<34x32xf32>
    %188 = arith.subf %180, %187 : vector<34x32xf32>
    %189 = arith.mulf %188, %188 : vector<34x32xf32>
    %cst_68 = arith.constant dense<0.000000e+00> : vector<34xf32>
    %190 = vector.multi_reduction <add>, %189, %cst_68 [1] : vector<34x32xf32> to vector<34xf32>
    %191 = vector.shape_cast %190 : vector<34xf32> to vector<34x1xf32>
    %cst_69 = arith.constant 3.200000e+01 : f32
    %192 = vector.broadcast %cst_69 : f32 to vector<34x1xf32>
    %193 = arith.divf %191, %192 : vector<34x1xf32>
    %cst_70 = arith.constant 9.99999997E-7 : f32
    %194 = vector.broadcast %cst_70 : f32 to vector<34x1xf32>
    %195 = arith.addf %193, %194 : vector<34x1xf32>
    %196 = math.rsqrt %195 : vector<34x1xf32>
    %197 = vector.broadcast %196 : vector<34x1xf32> to vector<34x32xf32>
    %198 = arith.mulf %188, %197 : vector<34x32xf32>
    %199 = vector.broadcast %181 : vector<1x32xf32> to vector<34x32xf32>
    %200 = arith.mulf %198, %199 : vector<34x32xf32>
    %201 = vector.broadcast %182 : vector<1x32xf32> to vector<34x32xf32>
    %202 = arith.addf %200, %201 : vector<34x32xf32>
    %c176 = arith.constant 176 : index
    %c0_71 = arith.constant 0 : index
    %203 = vector.load %arg1[%c176, %c0_71] : memref<304x128xf32, #tpu.memory_space<vmem>>, vector<32x128xf32>
    %cst_72 = arith.constant dense<0.000000e+00> : vector<34x128xf32>
    %204 = tpu.matmul %202, %203, %cst_72 {dimension_numbers = #tpu.dot_dimension_numbers<[1], [0], [0], [1], [0, 0, 1, 1], [], []>} : vector<34x32xf32>, vector<32x128xf32>, vector<34x128xf32> -> vector<34x128xf32>
    %c47 = arith.constant 47 : index
    %c0_73 = arith.constant 0 : index
    %205 = vector.load %arg2[%c47, %c0_73] : memref<53x128xf32, #tpu.memory_space<vmem>>, vector<1x128xf32>
    %206 = vector.broadcast %205 : vector<1x128xf32> to vector<34x128xf32>
    %207 = arith.addf %204, %206 : vector<34x128xf32>
    %208 = vector.extract_strided_slice %207 {offsets = [0, 0], sizes = [34, 16], strides = [1, 1]} : vector<34x128xf32> to vector<34x16xf32>
    %cst_74 = arith.constant 2.500000e-01 : f32
    %209 = vector.broadcast %cst_74 : f32 to vector<34x16xf32>
    %210 = arith.mulf %208, %209 : vector<34x16xf32>
    %211 = vector.extract_strided_slice %207 {offsets = [0, 32], sizes = [34, 16], strides = [1, 1]} : vector<34x128xf32> to vector<34x16xf32>
    %cst_75 = arith.constant dense<0.000000e+00> : vector<34x34xf32>
    %212 = tpu.matmul %210, %211, %cst_75 {dimension_numbers = #tpu.dot_dimension_numbers<[1], [1], [0], [0], [0, 0, 1, 0], [], []>} : vector<34x16xf32>, vector<34x16xf32>, vector<34x34xf32> -> vector<34x34xf32>
    %213 = arith.addf %212, %30 : vector<34x34xf32>
    %cst_76 = arith.constant dense<0xFF800000> : vector<34xf32>
    %214 = vector.multi_reduction <maximumf>, %213, %cst_76 [1] : vector<34x34xf32> to vector<34xf32>
    %215 = vector.shape_cast %214 : vector<34xf32> to vector<34x1xf32>
    %216 = vector.broadcast %215 : vector<34x1xf32> to vector<34x34xf32>
    %217 = arith.subf %213, %216 : vector<34x34xf32>
    %218 = math.exp %217 : vector<34x34xf32>
    %cst_77 = arith.constant dense<0.000000e+00> : vector<34xf32>
    %219 = vector.multi_reduction <add>, %218, %cst_77 [1] : vector<34x34xf32> to vector<34xf32>
    %220 = vector.shape_cast %219 : vector<34xf32> to vector<34x1xf32>
    %221 = tpu.reciprocal %220 {approx = true} : vector<34x1xf32> -> vector<34x1xf32>
    %222 = arith.mulf %220, %221 : vector<34x1xf32>
    %cst_78 = arith.constant 2.000000e+00 : f32
    %223 = vector.broadcast %cst_78 : f32 to vector<34x1xf32>
    %224 = arith.subf %223, %222 : vector<34x1xf32>
    %225 = arith.mulf %221, %224 : vector<34x1xf32>
    %226 = vector.broadcast %225 : vector<34x1xf32> to vector<34x34xf32>
    %227 = arith.mulf %218, %226 : vector<34x34xf32>
    %228 = vector.extract_strided_slice %207 {offsets = [0, 64], sizes = [34, 32], strides = [1, 1]} : vector<34x128xf32> to vector<34x32xf32>
    %cst_79 = arith.constant dense<0.000000e+00> : vector<34x32xf32>
    %229 = tpu.matmul %227, %228, %cst_79 {dimension_numbers = #tpu.dot_dimension_numbers<[1], [0], [0], [1], [0, 0, 1, 1], [], []>} : vector<34x34xf32>, vector<34x32xf32>, vector<34x32xf32> -> vector<34x32xf32>
    %230 = vector.extract_strided_slice %207 {offsets = [0, 16], sizes = [34, 16], strides = [1, 1]} : vector<34x128xf32> to vector<34x16xf32>
    %cst_80 = arith.constant 2.500000e-01 : f32
    %231 = vector.broadcast %cst_80 : f32 to vector<34x16xf32>
    %232 = arith.mulf %230, %231 : vector<34x16xf32>
    %233 = vector.extract_strided_slice %207 {offsets = [0, 48], sizes = [34, 16], strides = [1, 1]} : vector<34x128xf32> to vector<34x16xf32>
    %cst_81 = arith.constant dense<0.000000e+00> : vector<34x34xf32>
    %234 = tpu.matmul %232, %233, %cst_81 {dimension_numbers = #tpu.dot_dimension_numbers<[1], [1], [0], [0], [0, 0, 1, 0], [], []>} : vector<34x16xf32>, vector<34x16xf32>, vector<34x34xf32> -> vector<34x34xf32>
    %235 = arith.addf %234, %30 : vector<34x34xf32>
    %cst_82 = arith.constant dense<0xFF800000> : vector<34xf32>
    %236 = vector.multi_reduction <maximumf>, %235, %cst_82 [1] : vector<34x34xf32> to vector<34xf32>
    %237 = vector.shape_cast %236 : vector<34xf32> to vector<34x1xf32>
    %238 = vector.broadcast %237 : vector<34x1xf32> to vector<34x34xf32>
    %239 = arith.subf %235, %238 : vector<34x34xf32>
    %240 = math.exp %239 : vector<34x34xf32>
    %cst_83 = arith.constant dense<0.000000e+00> : vector<34xf32>
    %241 = vector.multi_reduction <add>, %240, %cst_83 [1] : vector<34x34xf32> to vector<34xf32>
    %242 = vector.shape_cast %241 : vector<34xf32> to vector<34x1xf32>
    %243 = tpu.reciprocal %242 {approx = true} : vector<34x1xf32> -> vector<34x1xf32>
    %244 = arith.mulf %242, %243 : vector<34x1xf32>
    %cst_84 = arith.constant 2.000000e+00 : f32
    %245 = vector.broadcast %cst_84 : f32 to vector<34x1xf32>
    %246 = arith.subf %245, %244 : vector<34x1xf32>
    %247 = arith.mulf %243, %246 : vector<34x1xf32>
    %248 = vector.broadcast %247 : vector<34x1xf32> to vector<34x34xf32>
    %249 = arith.mulf %240, %248 : vector<34x34xf32>
    %250 = vector.extract_strided_slice %207 {offsets = [0, 96], sizes = [34, 32], strides = [1, 1]} : vector<34x128xf32> to vector<34x32xf32>
    %cst_85 = arith.constant dense<0.000000e+00> : vector<34x32xf32>
    %251 = tpu.matmul %249, %250, %cst_85 {dimension_numbers = #tpu.dot_dimension_numbers<[1], [0], [0], [1], [0, 0, 1, 1], [], []>} : vector<34x34xf32>, vector<34x32xf32>, vector<34x32xf32> -> vector<34x32xf32>
    %252 = arith.addf %229, %251 : vector<34x32xf32>
    %253 = arith.addf %180, %252 : vector<34x32xf32>
    %c48_86 = arith.constant 48 : index
    %c0_87 = arith.constant 0 : index
    %254 = vector.load %arg2[%c48_86, %c0_87] : memref<53x128xf32, #tpu.memory_space<vmem>>, vector<1x32xf32>
    %255 = vector.broadcast %254 : vector<1x32xf32> to vector<34x32xf32>
    %256 = arith.addf %253, %255 : vector<34x32xf32>
    %c49 = arith.constant 49 : index
    %c0_88 = arith.constant 0 : index
    %257 = vector.load %arg2[%c49, %c0_88] : memref<53x128xf32, #tpu.memory_space<vmem>>, vector<1x32xf32>
    %c50 = arith.constant 50 : index
    %c0_89 = arith.constant 0 : index
    %258 = vector.load %arg2[%c50, %c0_89] : memref<53x128xf32, #tpu.memory_space<vmem>>, vector<1x32xf32>
    %cst_90 = arith.constant dense<0.000000e+00> : vector<34xf32>
    %259 = vector.multi_reduction <add>, %256, %cst_90 [1] : vector<34x32xf32> to vector<34xf32>
    %260 = vector.shape_cast %259 : vector<34xf32> to vector<34x1xf32>
    %cst_91 = arith.constant 3.200000e+01 : f32
    %261 = vector.broadcast %cst_91 : f32 to vector<34x1xf32>
    %262 = arith.divf %260, %261 : vector<34x1xf32>
    %263 = vector.broadcast %262 : vector<34x1xf32> to vector<34x32xf32>
    %264 = arith.subf %256, %263 : vector<34x32xf32>
    %265 = arith.mulf %264, %264 : vector<34x32xf32>
    %cst_92 = arith.constant dense<0.000000e+00> : vector<34xf32>
    %266 = vector.multi_reduction <add>, %265, %cst_92 [1] : vector<34x32xf32> to vector<34xf32>
    %267 = vector.shape_cast %266 : vector<34xf32> to vector<34x1xf32>
    %cst_93 = arith.constant 3.200000e+01 : f32
    %268 = vector.broadcast %cst_93 : f32 to vector<34x1xf32>
    %269 = arith.divf %267, %268 : vector<34x1xf32>
    %cst_94 = arith.constant 9.99999997E-7 : f32
    %270 = vector.broadcast %cst_94 : f32 to vector<34x1xf32>
    %271 = arith.addf %269, %270 : vector<34x1xf32>
    %272 = math.rsqrt %271 : vector<34x1xf32>
    %273 = vector.broadcast %272 : vector<34x1xf32> to vector<34x32xf32>
    %274 = arith.mulf %264, %273 : vector<34x32xf32>
    %275 = vector.broadcast %257 : vector<1x32xf32> to vector<34x32xf32>
    %276 = arith.mulf %274, %275 : vector<34x32xf32>
    %277 = vector.broadcast %258 : vector<1x32xf32> to vector<34x32xf32>
    %278 = arith.addf %276, %277 : vector<34x32xf32>
    %c208 = arith.constant 208 : index
    %c0_95 = arith.constant 0 : index
    %279 = vector.load %arg1[%c208, %c0_95] : memref<304x128xf32, #tpu.memory_space<vmem>>, vector<32x64xf32>
    %cst_96 = arith.constant dense<0.000000e+00> : vector<34x64xf32>
    %280 = tpu.matmul %278, %279, %cst_96 {dimension_numbers = #tpu.dot_dimension_numbers<[1], [0], [0], [1], [0, 0, 1, 1], [], []>} : vector<34x32xf32>, vector<32x64xf32>, vector<34x64xf32> -> vector<34x64xf32>
    %c51 = arith.constant 51 : index
    %c0_97 = arith.constant 0 : index
    %281 = vector.load %arg2[%c51, %c0_97] : memref<53x128xf32, #tpu.memory_space<vmem>>, vector<1x64xf32>
    %282 = vector.broadcast %281 : vector<1x64xf32> to vector<34x64xf32>
    %283 = arith.addf %280, %282 : vector<34x64xf32>
    %cst_98 = arith.constant 5.000000e-01 : f32
    %284 = vector.broadcast %cst_98 : f32 to vector<34x64xf32>
    %285 = arith.mulf %284, %283 : vector<34x64xf32>
    %cst_99 = arith.constant 0.707106769 : f32
    %286 = vector.broadcast %cst_99 : f32 to vector<34x64xf32>
    %287 = arith.mulf %283, %286 : vector<34x64xf32>
    %cst_100 = arith.constant 0.000000e+00 : f32
    %288 = vector.broadcast %cst_100 : f32 to vector<34x64xf32>
    %289 = arith.cmpf oge, %287, %288 : vector<34x64xf32>
    %cst_101 = arith.constant 1.000000e+00 : f32
    %cst_102 = arith.constant -1.000000e+00 : f32
    %290 = vector.broadcast %cst_101 : f32 to vector<34x64xf32>
    %291 = vector.broadcast %cst_102 : f32 to vector<34x64xf32>
    %292 = arith.select %289, %290, %291 : vector<34x64xi1>, vector<34x64xf32>
    %293 = math.absf %287 : vector<34x64xf32>
    %cst_103 = arith.constant 0.327591091 : f32
    %294 = vector.broadcast %cst_103 : f32 to vector<34x64xf32>
    %295 = arith.mulf %294, %293 : vector<34x64xf32>
    %cst_104 = arith.constant 1.000000e+00 : f32
    %296 = vector.broadcast %cst_104 : f32 to vector<34x64xf32>
    %297 = arith.addf %296, %295 : vector<34x64xf32>
    %cst_105 = arith.constant 1.000000e+00 : f32
    %298 = vector.broadcast %cst_105 : f32 to vector<34x64xf32>
    %299 = arith.divf %298, %297 : vector<34x64xf32>
    %cst_106 = arith.constant 1.06140542 : f32
    %300 = vector.broadcast %cst_106 : f32 to vector<34x64xf32>
    %301 = arith.mulf %300, %299 : vector<34x64xf32>
    %cst_107 = arith.constant -1.45315206 : f32
    %302 = vector.broadcast %cst_107 : f32 to vector<34x64xf32>
    %303 = arith.addf %301, %302 : vector<34x64xf32>
    %304 = arith.mulf %303, %299 : vector<34x64xf32>
    %cst_108 = arith.constant 1.42141378 : f32
    %305 = vector.broadcast %cst_108 : f32 to vector<34x64xf32>
    %306 = arith.addf %304, %305 : vector<34x64xf32>
    %307 = arith.mulf %306, %299 : vector<34x64xf32>
    %cst_109 = arith.constant -0.284496725 : f32
    %308 = vector.broadcast %cst_109 : f32 to vector<34x64xf32>
    %309 = arith.addf %307, %308 : vector<34x64xf32>
    %310 = arith.mulf %309, %299 : vector<34x64xf32>
    %cst_110 = arith.constant 0.254829586 : f32
    %311 = vector.broadcast %cst_110 : f32 to vector<34x64xf32>
    %312 = arith.addf %310, %311 : vector<34x64xf32>
    %313 = arith.mulf %312, %299 : vector<34x64xf32>
    %cst_111 = arith.constant 0.000000e+00 : f32
    %314 = vector.broadcast %cst_111 : f32 to vector<34x64xf32>
    %315 = arith.subf %314, %293 : vector<34x64xf32>
    %316 = arith.mulf %315, %293 : vector<34x64xf32>
    %317 = math.exp %316 : vector<34x64xf32>
    %318 = arith.mulf %313, %317 : vector<34x64xf32>
    %cst_112 = arith.constant 1.000000e+00 : f32
    %319 = vector.broadcast %cst_112 : f32 to vector<34x64xf32>
    %320 = arith.subf %319, %318 : vector<34x64xf32>
    %321 = arith.mulf %292, %320 : vector<34x64xf32>
    %cst_113 = arith.constant 1.000000e+00 : f32
    %322 = vector.broadcast %cst_113 : f32 to vector<34x64xf32>
    %323 = arith.addf %322, %321 : vector<34x64xf32>
    %324 = arith.mulf %285, %323 : vector<34x64xf32>
    %c240 = arith.constant 240 : index
    %c0_114 = arith.constant 0 : index
    %325 = vector.load %arg1[%c240, %c0_114] : memref<304x128xf32, #tpu.memory_space<vmem>>, vector<64x32xf32>
    %cst_115 = arith.constant dense<0.000000e+00> : vector<34x32xf32>
    %326 = tpu.matmul %324, %325, %cst_115 {dimension_numbers = #tpu.dot_dimension_numbers<[1], [0], [0], [1], [0, 0, 1, 1], [], []>} : vector<34x64xf32>, vector<64x32xf32>, vector<34x32xf32> -> vector<34x32xf32>
    %c52 = arith.constant 52 : index
    %c0_116 = arith.constant 0 : index
    %327 = vector.load %arg2[%c52, %c0_116] : memref<53x128xf32, #tpu.memory_space<vmem>>, vector<1x32xf32>
    %328 = vector.broadcast %327 : vector<1x32xf32> to vector<34x32xf32>
    %329 = arith.addf %326, %328 : vector<34x32xf32>
    %330 = arith.addf %256, %329 : vector<34x32xf32>
    %331 = vector.extract_strided_slice %330 {offsets = [32, 0], sizes = [2, 32], strides = [1, 1]} : vector<34x32xf32> to vector<2x32xf32>
    %c34 = arith.constant 34 : index
    %c0_117 = arith.constant 0 : index
    %332 = vector.load %arg2[%c34, %c0_117] : memref<53x128xf32, #tpu.memory_space<vmem>>, vector<1x32xf32>
    %c35 = arith.constant 35 : index
    %c0_118 = arith.constant 0 : index
    %333 = vector.load %arg2[%c35, %c0_118] : memref<53x128xf32, #tpu.memory_space<vmem>>, vector<1x32xf32>
    %cst_119 = arith.constant dense<0.000000e+00> : vector<2xf32>
    %334 = vector.multi_reduction <add>, %331, %cst_119 [1] : vector<2x32xf32> to vector<2xf32>
    %335 = vector.shape_cast %334 : vector<2xf32> to vector<2x1xf32>
    %cst_120 = arith.constant 3.200000e+01 : f32
    %336 = vector.broadcast %cst_120 : f32 to vector<2x1xf32>
    %337 = arith.divf %335, %336 : vector<2x1xf32>
    %338 = vector.broadcast %337 : vector<2x1xf32> to vector<2x32xf32>
    %339 = arith.subf %331, %338 : vector<2x32xf32>
    %340 = arith.mulf %339, %339 : vector<2x32xf32>
    %cst_121 = arith.constant dense<0.000000e+00> : vector<2xf32>
    %341 = vector.multi_reduction <add>, %340, %cst_121 [1] : vector<2x32xf32> to vector<2xf32>
    %342 = vector.shape_cast %341 : vector<2xf32> to vector<2x1xf32>
    %cst_122 = arith.constant 3.200000e+01 : f32
    %343 = vector.broadcast %cst_122 : f32 to vector<2x1xf32>
    %344 = arith.divf %342, %343 : vector<2x1xf32>
    %cst_123 = arith.constant 9.99999997E-7 : f32
    %345 = vector.broadcast %cst_123 : f32 to vector<2x1xf32>
    %346 = arith.addf %344, %345 : vector<2x1xf32>
    %347 = math.rsqrt %346 : vector<2x1xf32>
    %348 = vector.broadcast %347 : vector<2x1xf32> to vector<2x32xf32>
    %349 = arith.mulf %339, %348 : vector<2x32xf32>
    %350 = vector.broadcast %332 : vector<1x32xf32> to vector<2x32xf32>
    %351 = arith.mulf %349, %350 : vector<2x32xf32>
    %352 = vector.broadcast %333 : vector<1x32xf32> to vector<2x32xf32>
    %353 = arith.addf %351, %352 : vector<2x32xf32>
    %c16 = arith.constant 16 : index
    %c0_124 = arith.constant 0 : index
    %354 = vector.load %arg1[%c16, %c0_124] : memref<304x128xf32, #tpu.memory_space<vmem>>, vector<32x128xf32>
    %cst_125 = arith.constant dense<0.000000e+00> : vector<2x128xf32>
    %355 = tpu.matmul %353, %354, %cst_125 {dimension_numbers = #tpu.dot_dimension_numbers<[1], [0], [0], [1], [0, 0, 1, 1], [], []>} : vector<2x32xf32>, vector<32x128xf32>, vector<2x128xf32> -> vector<2x128xf32>
    %c36 = arith.constant 36 : index
    %c0_126 = arith.constant 0 : index
    %356 = vector.load %arg2[%c36, %c0_126] : memref<53x128xf32, #tpu.memory_space<vmem>>, vector<1x128xf32>
    %357 = vector.broadcast %356 : vector<1x128xf32> to vector<2x128xf32>
    %358 = arith.addf %355, %357 : vector<2x128xf32>
    %c0_127 = arith.constant 0 : index
    %c0_128 = arith.constant 0 : index
    %359 = vector.load %arg3[%c0_127, %c0_128] : memref<2x128xf32, #tpu.memory_space<vmem>>, vector<2x128xf32>
    tpu.vector_store %arg3[%c0_127, %c0_128], %358 {strides = array<i32>} : memref<2x128xf32, #tpu.memory_space<vmem>>, vector<2x128xf32>,
    return
  }
}

</mosaic_0001>

<bundles_post_ra>
// kernel: vit_forward.1
= control target key start
LH: loop header
LB: loop body
LE: loop exit
PB: predicated region body
PF: predicated region fallthrough
CT: control target
= control target key end

     0   :  { %v3808_v1 = vmov 0.0   ;;  %vm3809_vm0 = vmmov 0   ;;  %vm27_vm1 = vcmask 130048   ;;  %s4948_s0 = inlined_call_operand.vmem [shape: f32[34,16], index: 0, kind: input, shape index: {}]   ;;  %s4949_s1 = inlined_call_operand.vmem [shape: f32[304,128], index: 1, kind: input, shape index: {}]   ;;  %s4950_s2 = inlined_call_operand.vmem [shape: f32[53,128], index: 2, kind: input, shape index: {}]   ;;  %s4951_s3 = inlined_call_operand.hbm [shape: f32[2,128], index: 3, kind: output, shape index: {}]  }
   0x1   :  { %v21_v0 = vld [vmem:[%s4949_s1 + $0x8] sm:$0xff]  ;;  %3219 = vmatprep.subr.mxu0 %v3808_v1  ;;  %v20_v2 = vld [vmem:[%s4949_s1] sm:$0xff]  ;;  %3223 = vmatprep.mubr.msk.f32.mxu0 %vm3809_vm0, %v3808_v1 }
   0x2   :  { %3220 = vmatpush3.msra.mxu0 %v21_v0  ;;  %v15_v3 = vld [vmem:[%s4948_s0] sm:$0xff]  ;;  %3238 = vmatprep.subr.mxu1 %v3808_v1 }
   0x3   :  { %8 = vsyncpa [#allocation3], 0  ;;  %3221 = vmatprep.subr.mxu0 %v3808_v1  ;;  %3246 = vmatprep.mubr.msk.f32.mxu1 %vm3809_vm0, %v3808_v1  ;;  %v16_v4 = vld [vmem:[%s4948_s0 + $0x8] sm:$0xff]  ;;  %v17_v5 = vld [vmem:[%s4948_s0 + $0x10] sm:$0xff]  ;;  %vm182_vm2 = vcmask 261120   ;;  %vm195_vm3 = vcmask 254976  }
   0x4   :  { %3222 = vmatpush3.msra.mxu0 %v20_v2  ;;  %v18_v6 = vld [vmem:[%s4948_s0 + $0x18] sm:$0xff]  ;;  %v19_v7 = vld [vmem:[%s4948_s0 + $0x20] sm:$0x3]  ;;  %v23_v12 = vld [vmem:[%s4950_s2 + $0x8] sm:$0xff]  ;;  %s3810_s22 = smov 96   ;;  %s3811_s23 = smov 80  }
   0x5   :  { %3224 = vmatmul.mubr.msk.f32.vlgmr.msra.gmra.mxu0 %vm27_vm1, %v15_v3  ;;  %3261 = vmatprep.subr.mxu0 %v3808_v1  ;;  %v22_v8 = vld [vmem:[%s4950_s2] sm:$0xff]  ;;  %v24_v17 = vld [vmem:[%s4950_s2 + $0x10] sm:$0xff]  ;;  %v25_v22 = vld [vmem:[%s4950_s2 + $0x18] sm:$0xff]  ;;  %s3812_s24 = smov 112   ;;  %s3813_s25 = smov 32   ;;  %vm818_vm4 = vcmask 1041408  }
   0x6   :  { %3226 = vmatprep.mubr.msk.f32.mxu0 %vm3809_vm0, %v3808_v1  ;;  %v26_v27 = vld [vmem:[%s4950_s2 + $0x20] sm:$0x3]  ;;  %v271_v58 = vld [vmem:[%s4949_s1 + $0x48] sm:$0xff]  ;;  %v269_v60 = vld [vmem:[%s4949_s1 + $0x38] sm:$0xff]  ;;  %vm517_vm8 = vcmask 277504   ;;  %vm530_vm11 = vcmask 271360  }
   0x7   :  { %3239 = vmatpush3.msra.mxu1 %v271_v58  ;;  %v270_v59 = vld [vmem:[%s4949_s1 + $0x40] sm:$0xff]  ;;  %v268_v61 = vld [vmem:[%s4949_s1 + $0x30] sm:$0xff]  ;;  %s3816_s26 = smov 64   ;;  %vm1394_vm14 = vcmask 523264   ;;  %s3818_s15 = smov [#allocation2]  }
   0x8   :  { %3240 = vmatprep.subr.mxu1 %v3808_v1  ;;  %s2929_s16 = sshll.u32 %s3818_s15, 4  ;;  %s2930_s16 = int_to_ptr.vmem [resolvable:$true] %s2929_s16 }
   0x9   :  { %3227 = vmatmul.mubr.msk.f32.gmra.mxu0 %vm27_vm1, %v16_v4  ;;  %3241 = vmatpush3.msra.mxu1 %v270_v59  ;;  %s3786_s17 = scalar_lea.vmem %s2930_s16, 32  ;;  %p3791_p1 = scmp.lt.s32.totalorder %s2930_s16, %s2930_s16 }
   0xa   :  { %3229 = vmatprep.mubr.msk.f32.mxu0 %vm3809_vm0, %v3808_v1  ;;  %3242 = vmatprep.subr.mxu1 %v3808_v1  ;;  %p3787_p0 = scmp.ne.s32.totalorder %s2930_s16, %s3786_s17  ;;  %p3792_p2 = scmp.lt.s32.totalorder %s3786_s17, %s3786_s17 }
   0xb   :  { %3243 = vmatpush3.msra.mxu1 %v269_v60 }
   0xc   :  { %3244 = vmatprep.subr.mxu1 %v3808_v1  ;;  %p3793_p3 = por %p3792_p2, %p3791_p1 }
   0xd   :  { %3230 = vmatmul.mubr.msk.f32.gmra.mxu0 %vm27_vm1, %v17_v5  ;;  %3245 = vmatpush3.msra.mxu1 %v268_v61 }
   0xe   :  { %3232 = vmatprep.mubr.msk.f32.mxu0 %vm3809_vm0, %v3808_v1  ;;  %3286 = vmatprep.subr.mxu1 %v3808_v1  ;;  %p3794_p4 = pnand %p3793_p3, %p3787_p0 }
  0x11   :  { %3233 = vmatmul.mubr.msk.f32.gmra.mxu0 %vm27_vm1, %v18_v6 }
  0x12   :  { %3235 = vmatprep.mubr.msk.f32.mxu0 %vm3809_vm0, %v3808_v1 }
  0x15   :  { %3236 = vmatmul.mubr.msk.f32.gmra.mxu0 %vm27_vm1, %v19_v7 }
  0x16   :  { %3271 = vmatprep.mubr.msk.f32.mxu0 %vm3809_vm0, %v3808_v1 }
  0xc5   :  { %v109_v9 = vpop.f32.mrf.mxu0 }
  0xc6   :  { %v3886_v10 = vadd.f32 %v109_v9, %v22_v8 }
  0xc7   :  { %v3225_v11 = vpop.f32.mrf.mxu0 }
  0xc8   :  { %v183_v13 = vsel %vm182_vm2, %v3886_v10, 0.0 }
  0xc9   :  { %184 = vadd.xlane.f32.xlu0 %v183_v13  ;;  %v114_v14 = vpop.f32.mrf.mxu0 }
  0xca   :  { %v3893_v15 = vadd.f32 %v114_v14, %v23_v12 }
  0xcb   :  { %v3228_v16 = vpop.f32.mrf.mxu0 }
  0xcc   :  { %v186_v18 = vsel %vm182_vm2, %v3893_v15, 0.0  ;;  %v2951_v16 = vld [vmem:[%s4950_s2 + $0x25] ss:$0 sm:$0xff] }
  0xcd   :  { %187 = vadd.xlane.f32.xlu0 %v186_v18  ;;  %v119_v19 = vpop.f32.mrf.mxu0 }
  0xce   :  { %v3900_v20 = vadd.f32 %v119_v19, %v24_v17  ;;  %v2952_v19 = vld [vmem:[%s4950_s2 + $0x26] ss:$0 sm:$0xff] }
  0xcf   :  { %v3231_v21 = vpop.f32.mrf.mxu0 }
  0xd0   :  { %v189_v23 = vsel %vm182_vm2, %v3900_v20, 0.0 }
  0xd1   :  { %190 = vadd.xlane.f32.xlu1 %v189_v23  ;;  %v124_v24 = vpop.f32.mrf.mxu0 }
  0xd2   :  { %v3907_v25 = vadd.f32 %v124_v24, %v25_v22 }
  0xd3   :  { %v3234_v26 = vpop.f32.mrf.mxu0 }
  0xd4   :  { %v192_v28 = vsel %vm182_vm2, %v3907_v25, 0.0 }
  0xd5   :  { %193 = vadd.xlane.f32.xlu1 %v192_v28  ;;  %v129_v29 = vpop.f32.mrf.mxu0 }
  0xd6   :  { %v3914_v30 = vadd.f32 %v129_v29, %v26_v27 }
  0xd7   :  { %v3237_v31 = vpop.f32.mrf.mxu0 }
  0xd8   :  { %v196_v32 = vsel %vm195_vm3, %v3914_v30, 0.0 }
  0xd9   :  { %197 = vadd.xlane.f32.xlu0 %v196_v32 }
 0x152   :  { %v185_v33 = vpop.xlane.xlu0 %184 }
 0x153   :  { %v200_v34 = vmul.f32 0.03125, %v185_v33 }
 0x155   :  { %v205_v35 = vsub.f32 %v3886_v10, %v200_v34 }
 0x156   :  { %v188_v36 = vpop.xlane.xlu0 %187 }
 0x157   :  { %v201_v37 = vmul.f32 0.03125, %v188_v36  ;;  %v210_v38 = vmul.f32 %v205_v35, %v205_v35 }
 0x159   :  { %v3920_v39 = vsub.f32 %v3893_v15, %v201_v37  ;;  %v215_v40 = vsel %vm182_vm2, %v210_v38, 0.0 }
 0x15a   :  { %v191_v41 = vpop.xlane.xlu1 %190  ;;  %216 = vadd.xlane.f32.xlu1 %v215_v40 }
 0x15b   :  { %v202_v42 = vmul.f32 0.03125, %v191_v41  ;;  %v211_v43 = vmul.f32 %v3920_v39, %v3920_v39 }
 0x15d   :  { %v3926_v44 = vsub.f32 %v3900_v20, %v202_v42  ;;  %v218_v45 = vsel %vm182_vm2, %v211_v43, 0.0 }
 0x15e   :  { %v194_v46 = vpop.xlane.xlu1 %193  ;;  %219 = vadd.xlane.f32.xlu0 %v218_v45 }
 0x15f   :  { %v203_v47 = vmul.f32 0.03125, %v194_v46  ;;  %v212_v48 = vmul.f32 %v3926_v44, %v3926_v44 }
 0x161   :  { %v3932_v49 = vsub.f32 %v3907_v25, %v203_v47  ;;  %v221_v50 = vsel %vm182_vm2, %v212_v48, 0.0  ;;  %v2953_v47 = vld [vmem:[%s4950_s2 + $0x27] ss:$0 sm:$0xff] }
 0x162   :  { %222 = vadd.xlane.f32.xlu1 %v221_v50  ;;  %v198_v51 = vpop.xlane.xlu0 %197 }
 0x163   :  { %v204_v52 = vmul.f32 0.03125, %v198_v51  ;;  %v213_v53 = vmul.f32 %v3932_v49, %v3932_v49 }
 0x165   :  { %v3938_v54 = vsub.f32 %v3914_v30, %v204_v52  ;;  %v224_v55 = vsel %vm182_vm2, %v213_v53, 0.0 }
 0x166   :  { %225 = vadd.xlane.f32.xlu0 %v224_v55 }
 0x167   :  { %v214_v56 = vmul.f32 %v3938_v54, %v3938_v54 }
 0x169   :  { %v227_v57 = vsel %vm195_vm3, %v214_v56, 0.0 }
 0x16a   :  { %228 = vadd.xlane.f32.xlu1 %v227_v57 }
 0x1e3   :  { %v217_v62 = vpop.xlane.xlu1 %216 }
 0x1e4   :  { %v230_v63 = vmul.f32 0.03125, %v217_v62 }
 0x1e6   :  { %v235_v0 = vadd.f32 1e-06, %v230_v63 }
 0x1e7   :  { %v220_v2 = vpop.xlane.xlu0 %219 }
 0x1e8   :  { %3624 = vrsqrt.f32 %v235_v0  ;;  %v231_v3 = vmul.f32 0.03125, %v220_v2 }
 0x1ea   :  { %v236_v4 = vadd.f32 1e-06, %v231_v3 }
 0x1eb   :  { %v223_v5 = vpop.xlane.xlu1 %222 }
 0x1ec   :  { %3626 = vrsqrt.f32 %v236_v4  ;;  %v232_v6 = vmul.f32 0.03125, %v223_v5 }
 0x1ee   :  { %v237_v7 = vadd.f32 1e-06, %v232_v6 }
 0x1ef   :  { %v226_v8 = vpop.xlane.xlu0 %225 }
 0x1f0   :  { %3628 = vrsqrt.f32 %v237_v7  ;;  %v233_v9 = vmul.f32 0.03125, %v226_v8 }
 0x1f2   :  { %v238_v11 = vadd.f32 1e-06, %v233_v9 }
 0x1f3   :  { %v229_v12 = vpop.xlane.xlu1 %228 }
 0x1f4   :  { %3630 = vrsqrt.f32 %v238_v11  ;;  %v234_v13 = vmul.f32 0.03125, %v229_v12 }
 0x1f5   :  { %v3625_v14 = vpop.eup %3624 }
 0x1f6   :  { %v239_v17 = vadd.f32 1e-06, %v234_v13  ;;  %v245_v18 = vmul.f32 %v3625_v14, %v205_v35 }
 0x1f8   :  { %3632 = vrsqrt.f32 %v239_v17  ;;  %v254_v21 = vmul.f32 %v2951_v16, %v245_v18  ;;  %v133_v17 = vlaneseq }
 0x1f9   :  { %v3627_v22 = vpop.eup %3626 }
 0x1fa   :  { %v263_v23 = vadd.f32 %v2952_v19, %v254_v21  ;;  %v246_v24 = vmul.f32 %v3627_v22, %v3920_v39  ;;  %v140_v18 = vand.u32 127, %v133_v17  ;;  %v3814_v21 = vmov 0  }
 0x1fc   :  { %3247 = vmatmul.mubr.msk.f32.vlgmr.msra.gmra.mxu1 %vm182_vm2, %v263_v23  ;;  %v255_v26 = vmul.f32 %v2951_v16, %v246_v24  ;;  %vm165_vm5 = vcmp.ge.s32.totalorder %v140_v18, 16  ;;  %vm167_vm6 = vcmp.lt.s32.totalorder %v140_v18, 32  ;;  %v3815_v24 = vmov -1e+30  }
 0x1fd   :  { %v3629_v27 = vpop.eup %3628  ;;  %3249 = vmatprep.mubr.msk.f32.mxu1 %vm3809_vm0, %v3808_v1  ;;  %v166_v22 = vsel %vm165_vm5, 1, %v3814_v21 }
 0x1fe   :  { %v264_v28 = vadd.f32 %v2952_v19, %v255_v26  ;;  %v247_v29 = vmul.f32 %v3629_v27, %v3926_v44 }
 0x200   :  { %3250 = vmatmul.mubr.msk.f32.gmra.mxu1 %vm182_vm2, %v264_v28  ;;  %v256_v31 = vmul.f32 %v2951_v16, %v247_v29 }
 0x201   :  { %v3631_v32 = vpop.eup %3630  ;;  %3252 = vmatprep.mubr.msk.f32.mxu1 %vm3809_vm0, %v3808_v1 }
 0x202   :  { %v265_v33 = vadd.f32 %v2952_v19, %v256_v31  ;;  %v248_v34 = vmul.f32 %v3631_v32, %v3932_v49 }
 0x204   :  { %3253 = vmatmul.mubr.msk.f32.gmra.mxu1 %vm182_vm2, %v265_v33  ;;  %v257_v35 = vmul.f32 %v2951_v16, %v248_v34 }
 0x205   :  { %v3633_v36 = vpop.eup %3632  ;;  %3255 = vmatprep.mubr.msk.f32.mxu1 %vm3809_vm0, %v3808_v1 }
 0x206   :  { %v266_v37 = vadd.f32 %v2952_v19, %v257_v35  ;;  %v249_v38 = vmul.f32 %v3633_v36, %v3938_v54 }
 0x208   :  { %3256 = vmatmul.mubr.msk.f32.gmra.mxu1 %vm182_vm2, %v266_v37  ;;  %v258_v39 = vmul.f32 %v2951_v16, %v249_v38 }
 0x209   :  { %3258 = vmatprep.mubr.msk.f32.mxu1 %vm3809_vm0, %v3808_v1 }
 0x20a   :  { %v267_v40 = vadd.f32 %v2952_v19, %v258_v39  ;;  %v2946_v19 = vadd.s32 4294967264, %v140_v18 }
 0x20c   :  { %3259 = vmatmul.mubr.msk.f32.gmra.mxu1 %vm182_vm2, %v267_v40  ;;  %v169_v23 = vsel %vm167_vm6, %v166_v22, %v2946_v19 }
 0x20d   :  { %3296 = vmatprep.mubr.msk.f32.mxu1 %vm3809_vm0, %v3808_v1  ;;  %vm2947_vm7 = vcmp.eq.s32.totalorder %v169_v23, 0  ;;  %vm2949_vm9 = vcmp.eq.s32.totalorder %v169_v23, 1 }
 0x20e   :  { %v4082_v26 = vsel %vm2947_vm7, 0.0, %v3815_v24 }
 0x2bc   :  { %v358_v41 = vpop.f32.mrf.mxu1 }
 0x2bd   :  { %v4010_v56 = vadd.f32 %v2953_v47, %v358_v41  ;;  %v4095_v41 = vsel %vm2949_vm9, 0.0, %v3815_v24 }
 0x2be   :  { %v3248_v42 = vpop.f32.mrf.mxu1 }
 0x2bf   :  { %v382_v57 = vmul.f32 0.25, %v4010_v56 }
 0x2c0   :  { %v363_v43 = vpop.f32.mrf.mxu1 }
 0x2c1   :  { %v4004_v55 = vadd.f32 %v2953_v47, %v363_v43 }
 0x2c2   :  { %v3251_v44 = vpop.f32.mrf.mxu1 }
 0x2c3   :  { %v383_v58 = vmul.f32 0.25, %v4004_v55  ;;  %v134_v44 = vshrl.u32 %v133_v17, 7 }
 0x2c4   :  { %v368_v45 = vpop.f32.mrf.mxu1 }
 0x2c5   :  { %v3998_v54 = vadd.f32 %v2953_v47, %v368_v45  ;;  %vm174_vm10 = vcmp.eq.s32.totalorder %v134_v44, %v169_v23 }
 0x2c6   :  { %v3254_v46 = vpop.f32.mrf.mxu1 }
 0x2c7   :  { %v384_v59 = vmul.f32 0.25, %v3998_v54 }
 0x2c8   :  { %v373_v48 = vpop.f32.mrf.mxu1 }
 0x2c9   :  { %v3988_v49 = vadd.f32 %v2953_v47, %v373_v48 }
 0x2ca   :  { %v3257_v50 = vpop.f32.mrf.mxu1 }
 0x2cb   :  { %398 = vrot.lane.b32.xlu1 %v3988_v49, %s3810_s22  ;;  %v385_v60 = vmul.f32 0.25, %v3988_v49 }
 0x2cc   :  { %v378_v51 = vpop.f32.mrf.mxu1 }
 0x2cd   :  { %v3992_v52 = vadd.f32 %v2953_v47, %v378_v51 }
 0x2ce   :  { %v3260_v53 = vpop.f32.mrf.mxu1 }
 0x2cf   :  { %607 = vrot.lane.b32.xlu1 %v3992_v52, %s3811_s23  ;;  %400 = vrot.lane.b32.xlu0 %v3992_v52, %s3810_s22  ;;  %v386_v61 = vmul.f32 0.25, %v3992_v52 }
 0x2d3   :  { %605 = vrot.lane.b32.xlu1 %v3988_v49, %s3811_s23  ;;  %396 = vrot.lane.b32.xlu0 %v3998_v54, %s3810_s22 }
 0x2d7   :  { %603 = vrot.lane.b32.xlu1 %v3998_v54, %s3811_s23  ;;  %394 = vrot.lane.b32.xlu0 %v4004_v55, %s3810_s22 }
 0x2db   :  { %601 = vrot.lane.b32.xlu1 %v4004_v55, %s3811_s23  ;;  %392 = vrot.lane.b32.xlu0 %v4010_v56, %s3810_s22 }
 0x2df   :  { %599 = vrot.lane.b32.xlu1 %v4010_v56, %s3811_s23  ;;  %589 = vrot.lane.b32.xlu0 %v382_v57, %s3812_s24 }
 0x2e3   :  { %591 = vrot.lane.b32.xlu1 %v383_v58, %s3812_s24  ;;  %593 = vrot.lane.b32.xlu0 %v384_v59, %s3812_s24 }
 0x2e7   :  { %595 = vrot.lane.b32.xlu1 %v385_v60, %s3812_s24  ;;  %597 = vrot.lane.b32.xlu0 %v386_v61, %s3812_s24 }
 0x2eb   :  { %797 = vrot.lane.b32.xlu1 %v3992_v52, %s3813_s25 }
 0x33d   :  { %v399_v62 = vpop.permute.xlu1 %398 }
 0x341   :  { %v608_v63 = vpop.permute.xlu1 %607  ;;  %v401_v0 = vpop.permute.xlu0 %400 }
 0x342   :  { %3262 = vmatpush3.xpose.msk.msra.mxu0 %vm27_vm1, %v401_v0  ;;  %3287 = vmatpush3.xpose.msk.msra.mxu1 %vm27_vm1, %v608_v63  ;;  %v4107_v63 = vsel %vm174_vm10, 0.0, %v3815_v24 }
 0x343   :  { %3288 = vmatprep.subr.mxu1 %v3808_v1  ;;  %3263 = vmatprep.subr.mxu0 %v3808_v1 }
 0x345   :  { %v606_v2 = vpop.permute.xlu1 %605  ;;  %v397_v3 = vpop.permute.xlu0 %396 }
 0x346   :  { %3264 = vmatpush3.xpose.msk.msra.mxu0 %vm27_vm1, %v399_v62  ;;  %3289 = vmatpush3.xpose.msk.msra.mxu1 %vm27_vm1, %v606_v2 }
 0x347   :  { %3290 = vmatprep.subr.mxu1 %v3808_v1  ;;  %3265 = vmatprep.subr.mxu0 %v3808_v1 }
 0x349   :  { %v604_v4 = vpop.permute.xlu1 %603  ;;  %v395_v5 = vpop.permute.xlu0 %394 }
 0x34a   :  { %3266 = vmatpush3.xpose.msk.msra.mxu0 %vm27_vm1, %v397_v3  ;;  %3291 = vmatpush3.xpose.msk.msra.mxu1 %vm27_vm1, %v604_v4 }
 0x34b   :  { %3292 = vmatprep.subr.mxu1 %v3808_v1  ;;  %3267 = vmatprep.subr.mxu0 %v3808_v1 }
 0x34d   :  { %v602_v6 = vpop.permute.xlu1 %601  ;;  %v393_v7 = vpop.permute.xlu0 %392 }
 0x34e   :  { %3268 = vmatpush3.xpose.msk.msra.mxu0 %vm27_vm1, %v395_v5  ;;  %3293 = vmatpush3.xpose.msk.msra.mxu1 %vm27_vm1, %v602_v6 }
 0x34f   :  { %3294 = vmatprep.subr.mxu1 %v3808_v1  ;;  %3269 = vmatprep.subr.mxu0 %v3808_v1 }
 0x351   :  { %v600_v8 = vpop.permute.xlu1 %599  ;;  %v590_v9 = vpop.permute.xlu0 %589 }
 0x352   :  { %3270 = vmatpush3.xpose.msk.msra.mxu0 %vm27_vm1, %v393_v7  ;;  %3295 = vmatpush3.xpose.msk.msra.mxu1 %vm27_vm1, %v600_v8 }
 0x353   :  { %3311 = vmatprep.subr.mxu0 %v3808_v1  ;;  %3336 = vmatprep.subr.mxu1 %v3808_v1 }
 0x355   :  { %v592_v11 = vpop.permute.xlu1 %591  ;;  %3272 = vmatmul.mubr.msk.f32.vlgmr.msra.gmra.mxu0 %vm27_vm1, %v382_v57  ;;  %3297 = vmatmul.mubr.msk.f32.vlgmr.msra.gmra.mxu1 %vm27_vm1, %v590_v9  ;;  %v594_v13 = vpop.permute.xlu0 %593 }
 0x356   :  { %3274 = vmatprep.mubr.msk.f32.mxu0 %vm3809_vm0, %v3808_v1  ;;  %3299 = vmatprep.mubr.msk.f32.mxu1 %vm3809_vm0, %v3808_v1 }
 0x359   :  { %v596_v12 = vpop.permute.xlu1 %595  ;;  %3275 = vmatmul.mubr.msk.f32.gmra.mxu0 %vm27_vm1, %v383_v58  ;;  %3300 = vmatmul.mubr.msk.f32.gmra.mxu1 %vm27_vm1, %v592_v11  ;;  %v598_v16 = vpop.permute.xlu0 %597 }
 0x35a   :  { %3277 = vmatprep.mubr.msk.f32.mxu0 %vm3809_vm0, %v3808_v1  ;;  %3302 = vmatprep.mubr.msk.f32.mxu1 %vm3809_vm0, %v3808_v1 }
 0x35d   :  { %v798_v14 = vpop.permute.xlu1 %797  ;;  %3278 = vmatmul.mubr.msk.f32.gmra.mxu0 %vm27_vm1, %v384_v59  ;;  %3303 = vmatmul.mubr.msk.f32.gmra.mxu1 %vm27_vm1, %v594_v13 }
 0x35e   :  { %3312 = vmatpush3.msk.msra.mxu0 %vm818_vm4, %v798_v14  ;;  %3280 = vmatprep.mubr.msk.f32.mxu0 %vm3809_vm0, %v3808_v1 }
 0x35f   :  { %3305 = vmatprep.mubr.msk.f32.mxu1 %vm3809_vm0, %v3808_v1  ;;  %3313 = vmatprep.subr.mxu0 %v3808_v1 }
 0x361   :  { %3281 = vmatmul.mubr.msk.f32.gmra.mxu0 %vm27_vm1, %v385_v60  ;;  %3306 = vmatmul.mubr.msk.f32.gmra.mxu1 %vm27_vm1, %v596_v12 }
 0x362   :  { %3283 = vmatprep.mubr.msk.f32.mxu0 %vm3809_vm0, %v3808_v1  ;;  %3308 = vmatprep.mubr.msk.f32.mxu1 %vm3809_vm0, %v3808_v1 }
 0x365   :  { %3284 = vmatmul.mubr.msk.f32.gmra.mxu0 %vm27_vm1, %v386_v61  ;;  %3309 = vmatmul.mubr.msk.f32.gmra.mxu1 %vm27_vm1, %v598_v16 }
 0x366   :  { %3321 = vmatprep.mubr.msk.f32.mxu0 %vm3809_vm0, %v3808_v1  ;;  %3346 = vmatprep.mubr.msk.f32.mxu1 %vm3809_vm0, %v3808_v1 }
 0x415   :  { %v493_v27 = vpop.f32.mrf.mxu0  ;;  %v695_v28 = vpop.f32.mrf.mxu1 }
 0x416   :  { %v4085_v29 = vadd.f32 %v493_v27, %v4082_v26  ;;  %v4088_v31 = vadd.f32 %v695_v28, %v4082_v26 }
 0x417   :  { %v3273_v32 = vpop.f32.mrf.mxu0  ;;  %v3298_v33 = vpop.f32.mrf.mxu1 }
 0x418   :  { %v719_v34 = vsel %vm517_vm8, %v4088_v31, -inf  ;;  %v518_v35 = vsel %vm517_vm8, %v4085_v29, -inf }
 0x419   :  { %720 = vmax.xlane.f32.xlu0 %v719_v34  ;;  %v700_v36 = vpop.f32.mrf.mxu1  ;;  %519 = vmax.xlane.f32.xlu1 %v518_v35  ;;  %v498_v37 = vpop.f32.mrf.mxu0 }
 0x41a   :  { %v499_v38 = vadd.f32 %v498_v37, %v4082_v26  ;;  %v4098_v42 = vadd.f32 %v700_v36, %v4082_v26 }
 0x41b   :  { %v3276_v39 = vpop.f32.mrf.mxu0  ;;  %v3301_v40 = vpop.f32.mrf.mxu1 }
 0x41c   :  { %v521_v43 = vsel %vm517_vm8, %v499_v38, -inf  ;;  %v722_v53 = vsel %vm517_vm8, %v4098_v42, -inf }
 0x41d   :  { %v705_v45 = vpop.f32.mrf.mxu1  ;;  %522 = vmax.xlane.f32.xlu0 %v521_v43  ;;  %v503_v46 = vpop.f32.mrf.mxu0 }
 0x41e   :  { %v504_v47 = vadd.f32 %v503_v46, %v4095_v41  ;;  %v706_v51 = vadd.f32 %v705_v45, %v4095_v41 }
 0x41f   :  { %v3279_v48 = vpop.f32.mrf.mxu0  ;;  %v3304_v50 = vpop.f32.mrf.mxu1 }
 0x420   :  { %v524_v57 = vsel %vm517_vm8, %v504_v47, -inf  ;;  %v725_v2 = vsel %vm517_vm8, %v706_v51, -inf }
 0x421   :  { %v710_v58 = vpop.f32.mrf.mxu1  ;;  %723 = vmax.xlane.f32.xlu0 %v722_v53  ;;  %525 = vmax.xlane.f32.xlu1 %v524_v57  ;;  %v508_v59 = vpop.f32.mrf.mxu0 }
 0x422   :  { %v509_v60 = vadd.f32 %v508_v59, %v4095_v41  ;;  %v711_v0 = vadd.f32 %v710_v58, %v4095_v41 }
 0x423   :  { %v3282_v61 = vpop.f32.mrf.mxu0  ;;  %v3307_v62 = vpop.f32.mrf.mxu1 }
 0x424   :  { %v527_v3 = vsel %vm517_vm8, %v509_v60, -inf  ;;  %v728_v11 = vsel %vm517_vm8, %v711_v0, -inf }
 0x425   :  { %v715_v4 = vpop.f32.mrf.mxu1  ;;  %726 = vmax.xlane.f32.xlu0 %v725_v2  ;;  %528 = vmax.xlane.f32.xlu1 %v527_v3  ;;  %v513_v5 = vpop.f32.mrf.mxu0 }
 0x426   :  { %v514_v6 = vadd.f32 %v513_v5, %v4107_v63  ;;  %v4114_v9 = vadd.f32 %v715_v4, %v4107_v63 }
 0x427   :  { %v3285_v7 = vpop.f32.mrf.mxu0  ;;  %v3310_v8 = vpop.f32.mrf.mxu1 }
 0x428   :  { %v531_v12 = vsel %vm530_vm11, %v514_v6, -inf  ;;  %v731_v13 = vsel %vm530_vm11, %v4114_v9, -inf }
 0x429   :  { %729 = vmax.xlane.f32.xlu0 %v728_v11  ;;  %532 = vmax.xlane.f32.xlu1 %v531_v12 }
 0x42d   :  { %732 = vmax.xlane.f32.xlu0 %v731_v13 }
 0x43a   :  { %795 = vrot.lane.b32.xlu1 %v3988_v49, %s3813_s25 }
 0x43e   :  { %917 = vrot.lane.b32.xlu1 %v3988_v49, %s3816_s26 }
 0x442   :  { %793 = vrot.lane.b32.xlu1 %v3998_v54, %s3813_s25 }
 0x443   :  { %919 = vrot.lane.b32.xlu0 %v3992_v52, %s3816_s26 }
 0x446   :  { %791 = vrot.lane.b32.xlu1 %v4004_v55, %s3813_s25 }
 0x447   :  { %915 = vrot.lane.b32.xlu0 %v3998_v54, %s3816_s26 }
 0x44b   :  { %913 = vrot.lane.b32.xlu0 %v4004_v55, %s3816_s26 }
 0x4a2   :  { %v721_v14 = vpop.xlane.xlu0 %720  ;;  %v520_v16 = vpop.xlane.xlu1 %519 }
 0x4a3   :  { %v734_v17 = vsub.f32 %v4088_v31, %v721_v14  ;;  %v534_v49 = vsub.f32 %v4085_v29, %v520_v16 }
 0x4a5   :  { %v739_v18 = vmul.f32 1.442695, %v734_v17  ;;  %v539_v19 = vmul.f32 1.442695, %v534_v49 }
 0x4a6   :  { %v523_v21 = vpop.xlane.xlu0 %522 }
 0x4a7   :  { %3634 = vpow2.f32 %v739_v18  ;;  %v535_v52 = vsub.f32 %v499_v38, %v523_v21 }
 0x4a8   :  { %3636 = vpow2.f32 %v539_v19 }
 0x4a9   :  { %v541_v22 = vmul.f32 1.442695, %v535_v52 }
 0x4aa   :  { %v724_v23 = vpop.xlane.xlu0 %723  ;;  %v526_v24 = vpop.xlane.xlu1 %525 }
 0x4ab   :  { %3638 = vpow2.f32 %v541_v22  ;;  %v735_v54 = vsub.f32 %v4098_v42, %v724_v23  ;;  %v536_v27 = vsub.f32 %v504_v47, %v526_v24 }
 0x4ad   :  { %v741_v55 = vmul.f32 1.442695, %v735_v54  ;;  %v543_v28 = vmul.f32 1.442695, %v536_v27 }
 0x4ae   :  { %v727_v32 = vpop.xlane.xlu0 %726  ;;  %v529_v33 = vpop.xlane.xlu1 %528 }
 0x4af   :  { %3640 = vpow2.f32 %v741_v55  ;;  %v736_v31 = vsub.f32 %v706_v51, %v727_v32  ;;  %v537_v29 = vsub.f32 %v509_v60, %v529_v33 }
 0x4b0   :  { %3642 = vpow2.f32 %v543_v28 }
 0x4b1   :  { %v743_v34 = vmul.f32 1.442695, %v736_v31  ;;  %v545_v35 = vmul.f32 1.442695, %v537_v29 }
 0x4b2   :  { %v730_v36 = vpop.xlane.xlu0 %729  ;;  %v533_v37 = vpop.xlane.xlu1 %532 }
 0x4b3   :  { %3644 = vpow2.f32 %v743_v34  ;;  %v737_v38 = vsub.f32 %v711_v0, %v730_v36  ;;  %v538_v39 = vsub.f32 %v514_v6, %v533_v37 }
 0x4b4   :  { %v4137_v40 = vpop.eup %3634  ;;  %3646 = vpow2.f32 %v545_v35 }
 0x4b5   :  { %v4139_v42 = vpop.eup %3636  ;;  %v745_v43 = vmul.f32 1.442695, %v737_v38  ;;  %v547_v44 = vmul.f32 1.442695, %v538_v39  ;;  %v749_v45 = vsel %vm517_vm8, %v4137_v40, 0.0 }
 0x4b6   :  { %750 = vadd.xlane.f32.xlu0 %v749_v45  ;;  %v733_v46 = vpop.xlane.xlu0 %732  ;;  %v549_v47 = vsel %vm517_vm8, %v4139_v42, 0.0  ;;  %v796_v48 = vpop.permute.xlu1 %795 }
 0x4b7   :  { %3648 = vpow2.f32 %v745_v43  ;;  %v738_v50 = vsub.f32 %v4114_v9, %v733_v46  ;;  %550 = vadd.xlane.f32.xlu1 %v549_v47  ;;  %3314 = vmatpush3.msra.mxu0 %v796_v48 }
 0x4b8   :  { %v4146_v51 = vpop.eup %3638  ;;  %3650 = vpow2.f32 %v547_v44  ;;  %3315 = vmatprep.subr.mxu0 %v3808_v1 }
 0x4b9   :  { %v747_v53 = vmul.f32 1.442695, %v738_v50  ;;  %v552_v57 = vsel %vm517_vm8, %v4146_v51, 0.0 }
 0x4ba   :  { %v920_v58 = vpop.permute.xlu0 %919  ;;  %v918_v59 = vpop.permute.xlu1 %917 }
 0x4bb   :  { %3652 = vpow2.f32 %v747_v53  ;;  %553 = vadd.xlane.f32.xlu1 %v552_v57  ;;  %3337 = vmatpush3.msk.msra.mxu1 %vm818_vm4, %v920_v58 }
 0x4bc   :  { %v4152_v60 = vpop.eup %3640  ;;  %3338 = vmatprep.subr.mxu1 %v3808_v1 }
 0x4bd   :  { %v4155_v61 = vpop.eup %3642  ;;  %3339 = vmatpush3.msra.mxu1 %v918_v59  ;;  %v752_v62 = vsel %vm517_vm8, %v4152_v60, 0.0 }
 0x4be   :  { %753 = vadd.xlane.f32.xlu0 %v752_v62  ;;  %v916_v0 = vpop.permute.xlu0 %915  ;;  %v555_v2 = vsel %vm517_vm8, %v4155_v61, 0.0  ;;  %3340 = vmatprep.subr.mxu1 %v3808_v1  ;;  %v794_v3 = vpop.permute.xlu1 %793 }
 0x4bf   :  { %556 = vadd.xlane.f32.xlu1 %v555_v2  ;;  %3316 = vmatpush3.msra.mxu0 %v794_v3 }
 0x4c0   :  { %v4162_v4 = vpop.eup %3644  ;;  %3341 = vmatpush3.msra.mxu1 %v916_v0  ;;  %3317 = vmatprep.subr.mxu0 %v3808_v1 }
 0x4c1   :  { %v4165_v5 = vpop.eup %3646  ;;  %v755_v6 = vsel %vm517_vm8, %v4162_v4, 0.0  ;;  %3342 = vmatprep.subr.mxu1 %v3808_v1 }
 0x4c2   :  { %756 = vadd.xlane.f32.xlu0 %v755_v6  ;;  %v914_v7 = vpop.permute.xlu0 %913  ;;  %v558_v8 = vsel %vm517_vm8, %v4165_v5, 0.0  ;;  %v792_v9 = vpop.permute.xlu1 %791 }
 0x4c3   :  { %559 = vadd.xlane.f32.xlu1 %v558_v8  ;;  %3318 = vmatpush3.msra.mxu0 %v792_v9 }
 0x4c4   :  { %v4172_v11 = vpop.eup %3648  ;;  %3343 = vmatpush3.msra.mxu1 %v914_v7  ;;  %3319 = vmatprep.subr.mxu0 %v3808_v1 }
 0x4c5   :  { %v4175_v12 = vpop.eup %3650  ;;  %v758_v13 = vsel %vm517_vm8, %v4172_v11, 0.0  ;;  %3344 = vmatprep.subr.mxu1 %v3808_v1 }
 0x4c6   :  { %759 = vadd.xlane.f32.xlu0 %v758_v13  ;;  %v561_v14 = vsel %vm530_vm11, %v4175_v12, 0.0 }
 0x4c7   :  { %562 = vadd.xlane.f32.xlu1 %v561_v14 }
 0x4c8   :  { %v4182_v16 = vpop.eup %3652 }
 0x4c9   :  { %v761_v17 = vsel %vm530_vm11, %v4182_v16, 0.0 }
 0x4ca   :  { %762 = vadd.xlane.f32.xlu0 %v761_v17 }
 0x4d8   :  { %789 = vrot.lane.b32.xlu1 %v4010_v56, %s3813_s25 }
 0x4e0   :  { %911 = vrot.lane.b32.xlu0 %v4010_v56, %s3816_s26 }
 0x53f   :  { %v751_v49 = vpop.xlane.xlu0 %750 }
 0x540   :  { %3654 = vrcp.f32 %v751_v49  ;;  %v551_v18 = vpop.xlane.xlu1 %550 }
 0x541   :  { %3656 = vrcp.f32 %v551_v18 }
 0x544   :  { %v554_v19 = vpop.xlane.xlu1 %553 }
 0x545   :  { %3658 = vrcp.f32 %v554_v19 }
 0x547   :  { %v754_v21 = vpop.xlane.xlu0 %753 }
 0x548   :  { %3660 = vrcp.f32 %v754_v21  ;;  %v557_v52 = vpop.xlane.xlu1 %556 }
 0x549   :  { %3662 = vrcp.f32 %v557_v52 }
 0x54b   :  { %v757_v22 = vpop.xlane.xlu0 %756 }
 0x54c   :  { %3664 = vrcp.f32 %v757_v22  ;;  %v560_v23 = vpop.xlane.xlu1 %559 }
 0x54d   :  { %v3655_v24 = vpop.eup %3654  ;;  %3666 = vrcp.f32 %v560_v23 }
 0x54e   :  { %v3657_v54 = vpop.eup %3656  ;;  %v769_v27 = vmul.f32 %v3655_v24, %v751_v49 }
 0x54f   :  { %v569_v55 = vmul.f32 %v3657_v54, %v551_v18  ;;  %v760_v28 = vpop.xlane.xlu0 %759 }
 0x550   :  { %v774_v56 = vsub.f32 2.0, %v769_v27  ;;  %3668 = vrcp.f32 %v760_v28  ;;  %v563_v32 = vpop.xlane.xlu1 %562 }
 0x551   :  { %v574_v33 = vsub.f32 2.0, %v569_v55  ;;  %3670 = vrcp.f32 %v563_v32 }
 0x552   :  { %v3659_v31 = vpop.eup %3658  ;;  %v779_v29 = vmul.f32 %v3655_v24, %v774_v56 }
 0x553   :  { %v579_v34 = vmul.f32 %v3657_v54, %v574_v33  ;;  %v570_v35 = vmul.f32 %v3659_v31, %v554_v19  ;;  %v763_v36 = vpop.xlane.xlu0 %762 }
 0x554   :  { %v784_v37 = vmul.f32 %v4137_v40, %v779_v29  ;;  %3672 = vrcp.f32 %v763_v36  ;;  %v790_v38 = vpop.permute.xlu1 %789 }
 0x555   :  { %v3661_v39 = vpop.eup %3660  ;;  %v575_v43 = vsub.f32 2.0, %v570_v35  ;;  %3320 = vmatpush3.msra.mxu0 %v790_v38  ;;  %v584_v46 = vmul.f32 %v4139_v42, %v579_v34 }
 0x556   :  { %v3663_v44 = vpop.eup %3662  ;;  %v770_v45 = vmul.f32 %v3661_v39, %v754_v21  ;;  %3322 = vmatmul.mubr.msk.f32.vlgmr.msra.gmra.mxu0 %vm517_vm8, %v784_v37  ;;  %3361 = vmatprep.subr.mxu0 %v3808_v1 }
 0x557   :  { %v580_v47 = vmul.f32 %v3659_v31, %v575_v43  ;;  %v571_v48 = vmul.f32 %v3663_v44, %v557_v52  ;;  %v912_v50 = vpop.permute.xlu0 %911  ;;  %3324 = vmatprep.mubr.msk.f32.mxu0 %vm3809_vm0, %v3808_v1 }
 0x558   :  { %v775_v40 = vsub.f32 2.0, %v770_v45  ;;  %3345 = vmatpush3.msra.mxu1 %v912_v50 }
 0x559   :  { %v3665_v53 = vpop.eup %3664  ;;  %v576_v57 = vsub.f32 2.0, %v571_v48  ;;  %3347 = vmatmul.mubr.msk.f32.vlgmr.msra.gmra.mxu1 %vm517_vm8, %v584_v46  ;;  %3384 = vmatprep.subr.mxu1 %v3808_v1  ;;  %v585_v42 = vmul.f32 %v4146_v51, %v580_v47 }
 0x55a   :  { %v3667_v58 = vpop.eup %3666  ;;  %v780_v59 = vmul.f32 %v3661_v39, %v775_v40  ;;  %v771_v62 = vmul.f32 %v3665_v53, %v757_v22  ;;  %3349 = vmatprep.mubr.msk.f32.mxu1 %vm3809_vm0, %v3808_v1 }
 0x55b   :  { %v581_v0 = vmul.f32 %v3663_v44, %v576_v57  ;;  %v572_v2 = vmul.f32 %v3667_v58, %v560_v23 }
 0x55c   :  { %v785_v3 = vmul.f32 %v4152_v60, %v780_v59  ;;  %v776_v6 = vsub.f32 2.0, %v771_v62 }
 0x55d   :  { %v3669_v7 = vpop.eup %3668  ;;  %v577_v8 = vsub.f32 2.0, %v572_v2  ;;  %3350 = vmatmul.mubr.msk.f32.gmra.mxu1 %vm517_vm8, %v585_v42  ;;  %v586_v17 = vmul.f32 %v4155_v61, %v581_v0 }
 0x55e   :  { %v3671_v9 = vpop.eup %3670  ;;  %v781_v13 = vmul.f32 %v3665_v53, %v776_v6  ;;  %v772_v14 = vmul.f32 %v3669_v7, %v760_v28  ;;  %3325 = vmatmul.mubr.msk.f32.gmra.mxu0 %vm517_vm8, %v785_v3  ;;  %3352 = vmatprep.mubr.msk.f32.mxu1 %vm3809_vm0, %v3808_v1 }
 0x55f   :  { %v582_v51 = vmul.f32 %v3667_v58, %v577_v8  ;;  %v573_v49 = vmul.f32 %v3671_v9, %v563_v32  ;;  %3327 = vmatprep.mubr.msk.f32.mxu0 %vm3809_vm0, %v3808_v1 }
 0x560   :  { %v786_v60 = vmul.f32 %v4162_v4, %v781_v13  ;;  %v777_v18 = vsub.f32 2.0, %v772_v14 }
 0x561   :  { %v3673_v19 = vpop.eup %3672  ;;  %v578_v21 = vsub.f32 2.0, %v573_v49  ;;  %3353 = vmatmul.mubr.msk.f32.gmra.mxu1 %vm517_vm8, %v586_v17  ;;  %v587_v61 = vmul.f32 %v4165_v5, %v582_v51 }
 0x562   :  { %v782_v52 = vmul.f32 %v3669_v7, %v777_v18  ;;  %v773_v22 = vmul.f32 %v3673_v19, %v763_v36  ;;  %3328 = vmatmul.mubr.msk.f32.gmra.mxu0 %vm517_vm8, %v786_v60  ;;  %3355 = vmatprep.mubr.msk.f32.mxu1 %vm3809_vm0, %v3808_v1 }
 0x563   :  { %v583_v23 = vmul.f32 %v3671_v9, %v578_v21  ;;  %3330 = vmatprep.mubr.msk.f32.mxu0 %vm3809_vm0, %v3808_v1 }
 0x564   :  { %v787_v4 = vmul.f32 %v4172_v11, %v782_v52  ;;  %v778_v24 = vsub.f32 2.0, %v773_v22 }
 0x565   :  { %3356 = vmatmul.mubr.msk.f32.gmra.mxu1 %vm517_vm8, %v587_v61  ;;  %v588_v27 = vmul.f32 %v4175_v12, %v583_v23  ;;  %v2991_v12 = vld [vmem:[%s4950_s2 + $0x28] ss:$0 sm:$0xff] }
 0x566   :  { %v783_v54 = vmul.f32 %v3673_v19, %v778_v24  ;;  %3331 = vmatmul.mubr.msk.f32.gmra.mxu0 %vm517_vm8, %v787_v4  ;;  %3358 = vmatprep.mubr.msk.f32.mxu1 %vm3809_vm0, %v3808_v1 }
 0x567   :  { %3333 = vmatprep.mubr.msk.f32.mxu0 %vm3809_vm0, %v3808_v1 }
 0x568   :  { %v788_v5 = vmul.f32 %v4182_v16, %v783_v54 }
 0x569   :  { %3359 = vmatmul.mubr.msk.f32.gmra.mxu1 %vm517_vm8, %v588_v27 }
 0x56a   :  { %3334 = vmatmul.mubr.msk.f32.gmra.mxu0 %vm517_vm8, %v788_v5  ;;  %3400 = vmatprep.mubr.msk.f32.mxu1 %vm3809_vm0, %v3808_v1 }
 0x56b   :  { %3369 = vmatprep.mubr.msk.f32.mxu0 %vm3809_vm0, %v3808_v1 }
 0x616   :  { %v887_v11 = vpop.f32.mrf.mxu0 }
 0x618   :  { %v3323_v55 = vpop.f32.mrf.mxu0 }
 0x619   :  { %v1008_v28 = vpop.f32.mrf.mxu1 }
 0x61a   :  { %v1009_v56 = vadd.f32 %v1008_v28, %v887_v11 }
 0x61b   :  { %v3348_v32 = vpop.f32.mrf.mxu1 }
 0x61c   :  { %v1032_v16 = vadd.f32 %v1009_v56, %v3886_v10 }
 0x61d   :  { %v1013_v33 = vpop.f32.mrf.mxu1 }
 0x61e   :  { %v4236_v31 = vadd.f32 %v2991_v12, %v1032_v16  ;;  %v892_v29 = vpop.f32.mrf.mxu0  ;;  %v1135_v16 = vld [vmem:[%s4949_s1 + $0x68] sm:$0xff] }
 0x61f   :  { %v1014_v34 = vadd.f32 %v1013_v33, %v892_v29  ;;  %v3351_v35 = vpop.f32.mrf.mxu1  ;;  %3362 = vmatpush3.msra.mxu0 %v1135_v16  ;;  %v1134_v33 = vld [vmem:[%s4949_s1 + $0x60] sm:$0xff]  ;;  %v1133_v29 = vld [vmem:[%s4949_s1 + $0x58] sm:$0xff] }
 0x620   :  { %v3326_v36 = vpop.f32.mrf.mxu0  ;;  %v1049_v37 = vsel %vm182_vm2, %v4236_v31, 0.0  ;;  %3363 = vmatprep.subr.mxu0 %v3808_v1 }
 0x621   :  { %v1033_v38 = vadd.f32 %v1014_v34, %v3893_v15  ;;  %v1018_v39 = vpop.f32.mrf.mxu1  ;;  %1050 = vadd.xlane.f32.xlu1 %v1049_v37  ;;  %3364 = vmatpush3.msra.mxu0 %v1134_v33  ;;  %v1132_v34 = vld [vmem:[%s4949_s1 + $0x50] sm:$0xff] }
 0x622   :  { %v897_v43 = vpop.f32.mrf.mxu0  ;;  %3365 = vmatprep.subr.mxu0 %v3808_v1 }
 0x623   :  { %v4241_v44 = vadd.f32 %v2991_v12, %v1033_v38  ;;  %v1019_v45 = vadd.f32 %v1018_v39, %v897_v43  ;;  %v3354_v46 = vpop.f32.mrf.mxu1  ;;  %3366 = vmatpush3.msra.mxu0 %v1133_v29 }
 0x624   :  { %v3329_v10 = vpop.f32.mrf.mxu0  ;;  %3367 = vmatprep.subr.mxu0 %v3808_v1 }
 0x625   :  { %v1034_v47 = vadd.f32 %v1019_v45, %v3900_v20  ;;  %v1023_v48 = vpop.f32.mrf.mxu1  ;;  %v1052_v50 = vsel %vm182_vm2, %v4241_v44, 0.0  ;;  %3368 = vmatpush3.msra.mxu0 %v1132_v34 }
 0x626   :  { %1053 = vadd.xlane.f32.xlu0 %v1052_v50  ;;  %v902_v40 = vpop.f32.mrf.mxu0  ;;  %3415 = vmatprep.subr.mxu0 %v3808_v1 }
 0x627   :  { %v4246_v53 = vadd.f32 %v2991_v12, %v1034_v47  ;;  %v1024_v57 = vadd.f32 %v1023_v48, %v902_v40  ;;  %v3357_v15 = vpop.f32.mrf.mxu1 }
 0x628   :  { %v3332_v58 = vpop.f32.mrf.mxu0  ;;  %v2992_v15 = vld [vmem:[%s4950_s2 + $0x29] ss:$0 sm:$0xff] }
 0x629   :  { %v1035_v59 = vadd.f32 %v1024_v57, %v3907_v25  ;;  %v1028_v62 = vpop.f32.mrf.mxu1  ;;  %v1055_v42 = vsel %vm182_vm2, %v4246_v53, 0.0 }
 0x62a   :  { %1056 = vadd.xlane.f32.xlu0 %v1055_v42  ;;  %v907_v0 = vpop.f32.mrf.mxu0  ;;  %v2993_v42 = vld [vmem:[%s4950_s2 + $0x2a] ss:$0 sm:$0xff] }
 0x62b   :  { %v4251_v20 = vadd.f32 %v2991_v12, %v1035_v59  ;;  %v1029_v2 = vadd.f32 %v1028_v62, %v907_v0  ;;  %v3360_v3 = vpop.f32.mrf.mxu1 }
 0x62c   :  { %v3335_v6 = vpop.f32.mrf.mxu0 }
 0x62d   :  { %v1036_v7 = vadd.f32 %v1029_v2, %v3914_v30  ;;  %v1058_v8 = vsel %vm182_vm2, %v4251_v20, 0.0 }
 0x62e   :  { %1059 = vadd.xlane.f32.xlu0 %v1058_v8 }
 0x62f   :  { %v4256_v9 = vadd.f32 %v2991_v12, %v1036_v7 }
 0x631   :  { %v1061_v25 = vsel %vm195_vm3, %v4256_v9, 0.0 }
 0x632   :  { %1062 = vadd.xlane.f32.xlu1 %v1061_v25 }
 0x6aa   :  { %v1051_v13 = vpop.xlane.xlu1 %1050 }
 0x6ab   :  { %v1064_v14 = vmul.f32 0.03125, %v1051_v13 }
 0x6ad   :  { %v1069_v17 = vsub.f32 %v4236_v31, %v1064_v14 }
 0x6af   :  { %v1054_v51 = vpop.xlane.xlu0 %1053  ;;  %v1074_v49 = vmul.f32 %v1069_v17, %v1069_v17 }
 0x6b0   :  { %v1065_v60 = vmul.f32 0.03125, %v1054_v51 }
 0x6b1   :  { %v1079_v18 = vsel %vm182_vm2, %v1074_v49, 0.0 }
 0x6b2   :  { %v1070_v30 = vsub.f32 %v4241_v44, %v1065_v60  ;;  %1080 = vadd.xlane.f32.xlu0 %v1079_v18 }
 0x6b3   :  { %v1057_v19 = vpop.xlane.xlu0 %1056 }
 0x6b4   :  { %v1066_v21 = vmul.f32 0.03125, %v1057_v19  ;;  %v1075_v52 = vmul.f32 %v1070_v30, %v1070_v30 }
 0x6b6   :  { %v4264_v22 = vsub.f32 %v4246_v53, %v1066_v21  ;;  %v1082_v61 = vsel %vm182_vm2, %v1075_v52, 0.0 }
 0x6b7   :  { %v1060_v23 = vpop.xlane.xlu0 %1059  ;;  %1083 = vadd.xlane.f32.xlu1 %v1082_v61  ;;  %v1387_v61 = vld [vmem:[%s4949_s1 + $0xa0] sm:$0xff] }
 0x6b8   :  { %v1067_v4 = vmul.f32 0.03125, %v1060_v23  ;;  %v1076_v24 = vmul.f32 %v4264_v22, %v4264_v22  ;;  %v1386_v23 = vld [vmem:[%s4949_s1 + $0x98] sm:$0xff] }
 0x6ba   :  { %v4270_v54 = vsub.f32 %v4251_v20, %v1067_v4  ;;  %v1085_v27 = vsel %vm182_vm2, %v1076_v24, 0.0  ;;  %v1385_v4 = vld [vmem:[%s4949_s1 + $0x90] sm:$0xff]  ;;  %v1384_v24 = vld [vmem:[%s4949_s1 + $0x88] sm:$0xff] }
 0x6bb   :  { %1086 = vadd.xlane.f32.xlu0 %v1085_v27  ;;  %v1063_v5 = vpop.xlane.xlu1 %1062  ;;  %v1382_v27 = vld [vmem:[%s4949_s1 + $0x78] sm:$0xff] }
 0x6bc   :  { %v1068_v11 = vmul.f32 0.03125, %v1063_v5  ;;  %v1077_v55 = vmul.f32 %v4270_v54, %v4270_v54  ;;  %v1381_v5 = vld [vmem:[%s4949_s1 + $0x70] sm:$0xff] }
 0x6be   :  { %v4276_v28 = vsub.f32 %v4256_v9, %v1068_v11  ;;  %v1088_v56 = vsel %vm182_vm2, %v1077_v55, 0.0  ;;  %v2994_v11 = vld [vmem:[%s4950_s2 + $0x2b] ss:$0 sm:$0xff] }
 0x6bf   :  { %1089 = vadd.xlane.f32.xlu1 %v1088_v56 }
 0x6c0   :  { %v1078_v12 = vmul.f32 %v4276_v28, %v4276_v28 }
 0x6c2   :  { %v1091_v32 = vsel %vm195_vm3, %v1078_v12, 0.0 }
 0x6c3   :  { %1092 = vadd.xlane.f32.xlu0 %v1091_v32 }
 0x73b   :  { %v1081_v35 = vpop.xlane.xlu0 %1080 }
 0x73c   :  { %v1094_v36 = vmul.f32 0.03125, %v1081_v35 }
 0x73e   :  { %v1099_v37 = vadd.f32 1e-06, %v1094_v36 }
 0x740   :  { %3674 = vrsqrt.f32 %v1099_v37  ;;  %v1084_v38 = vpop.xlane.xlu1 %1083 }
 0x741   :  { %v1095_v39 = vmul.f32 0.03125, %v1084_v38 }
 0x743   :  { %v1100_v43 = vadd.f32 1e-06, %v1095_v39 }
 0x744   :  { %v1087_v45 = vpop.xlane.xlu0 %1086 }
 0x745   :  { %3676 = vrsqrt.f32 %v1100_v43  ;;  %v1096_v46 = vmul.f32 0.03125, %v1087_v45 }
 0x747   :  { %v1101_v10 = vadd.f32 1e-06, %v1096_v46 }
 0x748   :  { %v1090_v47 = vpop.xlane.xlu1 %1089 }
 0x749   :  { %3678 = vrsqrt.f32 %v1101_v10  ;;  %v1097_v48 = vmul.f32 0.03125, %v1090_v47 }
 0x74b   :  { %v1102_v50 = vadd.f32 1e-06, %v1097_v48 }
 0x74c   :  { %v1093_v40 = vpop.xlane.xlu0 %1092 }
 0x74d   :  { %v3675_v57 = vpop.eup %3674  ;;  %3680 = vrsqrt.f32 %v1102_v50  ;;  %v1098_v58 = vmul.f32 0.03125, %v1093_v40 }
 0x74e   :  { %v1109_v59 = vmul.f32 %v3675_v57, %v1069_v17 }
 0x74f   :  { %v1103_v62 = vadd.f32 1e-06, %v1098_v58 }
 0x750   :  { %v1118_v0 = vmul.f32 %v2992_v15, %v1109_v59 }
 0x751   :  { %3682 = vrsqrt.f32 %v1103_v62 }
 0x752   :  { %v3677_v2 = vpop.eup %3676  ;;  %v1127_v3 = vadd.f32 %v2993_v42, %v1118_v0 }
 0x753   :  { %v1110_v6 = vmul.f32 %v3677_v2, %v1070_v30 }
 0x754   :  { %3370 = vmatmul.mubr.msk.f32.vlgmr.msra.gmra.mxu0 %vm182_vm2, %v1127_v3 }
 0x755   :  { %3372 = vmatprep.mubr.msk.f32.mxu0 %vm3809_vm0, %v3808_v1  ;;  %v1119_v7 = vmul.f32 %v2992_v15, %v1110_v6 }
 0x756   :  { %v3679_v8 = vpop.eup %3678 }
 0x757   :  { %v1128_v25 = vadd.f32 %v2993_v42, %v1119_v7  ;;  %v1111_v13 = vmul.f32 %v3679_v8, %v4264_v22  ;;  %v1388_v22 = vld [vmem:[%s4949_s1 + $0xa8] sm:$0xff] }
 0x758   :  { %3385 = vmatpush3.msra.mxu1 %v1388_v22 }
 0x759   :  { %3373 = vmatmul.mubr.msk.f32.gmra.mxu0 %vm182_vm2, %v1128_v25  ;;  %v1120_v14 = vmul.f32 %v2992_v15, %v1111_v13  ;;  %3386 = vmatprep.subr.mxu1 %v3808_v1 }
 0x75a   :  { %v3681_v17 = vpop.eup %3680  ;;  %3375 = vmatprep.mubr.msk.f32.mxu0 %vm3809_vm0, %v3808_v1  ;;  %3387 = vmatpush3.msra.mxu1 %v1387_v61 }
 0x75b   :  { %v1129_v51 = vadd.f32 %v2993_v42, %v1120_v14  ;;  %v1112_v49 = vmul.f32 %v3681_v17, %v4270_v54  ;;  %3388 = vmatprep.subr.mxu1 %v3808_v1  ;;  %v1383_v54 = vld [vmem:[%s4949_s1 + $0x80] sm:$0xff] }
 0x75c   :  { %3389 = vmatpush3.msra.mxu1 %v1386_v23 }
 0x75d   :  { %3376 = vmatmul.mubr.msk.f32.gmra.mxu0 %vm182_vm2, %v1129_v51  ;;  %v1121_v60 = vmul.f32 %v2992_v15, %v1112_v49  ;;  %3390 = vmatprep.subr.mxu1 %v3808_v1 }
 0x75e   :  { %v3683_v18 = vpop.eup %3682  ;;  %3378 = vmatprep.mubr.msk.f32.mxu0 %vm3809_vm0, %v3808_v1  ;;  %3391 = vmatpush3.msra.mxu1 %v1385_v4 }
 0x75f   :  { %v1130_v30 = vadd.f32 %v2993_v42, %v1121_v60  ;;  %v1113_v19 = vmul.f32 %v3683_v18, %v4276_v28  ;;  %3392 = vmatprep.subr.mxu1 %v3808_v1 }
 0x760   :  { %3393 = vmatpush3.msra.mxu1 %v1384_v24 }
 0x761   :  { %3379 = vmatmul.mubr.msk.f32.gmra.mxu0 %vm182_vm2, %v1130_v30  ;;  %v1122_v21 = vmul.f32 %v2992_v15, %v1113_v19  ;;  %3394 = vmatprep.subr.mxu1 %v3808_v1 }
 0x762   :  { %3381 = vmatprep.mubr.msk.f32.mxu0 %vm3809_vm0, %v3808_v1  ;;  %3395 = vmatpush3.msra.mxu1 %v1383_v54 }
 0x763   :  { %v1131_v52 = vadd.f32 %v2993_v42, %v1122_v21  ;;  %3396 = vmatprep.subr.mxu1 %v3808_v1 }
 0x764   :  { %3397 = vmatpush3.msra.mxu1 %v1382_v27 }
 0x765   :  { %3382 = vmatmul.mubr.msk.f32.gmra.mxu0 %vm182_vm2, %v1131_v52  ;;  %3398 = vmatprep.subr.mxu1 %v3808_v1 }
 0x766   :  { %3423 = vmatprep.mubr.msk.f32.mxu0 %vm3809_vm0, %v3808_v1  ;;  %3399 = vmatpush3.msra.mxu1 %v1381_v5 }
 0x767   :  { %3438 = vmatprep.subr.mxu1 %v3808_v1 }
 0x814   :  { %v1222_v55 = vpop.f32.mrf.mxu0 }
 0x815   :  { %v4357_v28 = vadd.f32 %v2994_v11, %v1222_v55 }
 0x816   :  { %v3371_v56 = vpop.f32.mrf.mxu0 }
 0x817   :  { %v4360_v12 = vmul.f32 0.70710677, %v4357_v28 }
 0x819   :  { %v1266_v32 = vand.u32 2147483647, %v4360_v12  ;;  %v1227_v16 = vpop.f32.mrf.mxu0  ;;  %vm1256_vm12 = vcmp.ge.f32.partialorder %v4360_v12, 0.0 }
 0x81a   :  { %v4363_v33 = vadd.f32 %v2994_v11, %v1227_v16 }
 0x81b   :  { %v1271_v29 = vmul.f32 0.3275911, %v1266_v32  ;;  %v3374_v34 = vpop.f32.mrf.mxu0  ;;  %v1336_v57 = vsub.f32 0.0, %v1266_v32 }
 0x81c   :  { %v4366_v35 = vmul.f32 0.70710677, %v4363_v33 }
 0x81d   :  { %v1276_v36 = vadd.f32 1.0, %v1271_v29  ;;  %v1232_v37 = vpop.f32.mrf.mxu0  ;;  %v1341_v3 = vmul.f32 %v1336_v57, %v1266_v32 }
 0x81e   :  { %v1267_v38 = vand.u32 2147483647, %v4366_v35  ;;  %v4369_v39 = vadd.f32 %v2994_v11, %v1232_v37  ;;  %vm1257_vm13 = vcmp.ge.f32.partialorder %v4366_v35, 0.0 }
 0x81f   :  { %3684 = vrcp.f32 %v1276_v36  ;;  %v3377_v43 = vpop.f32.mrf.mxu0  ;;  %v1346_v17 = vmul.f32 1.442695, %v1341_v3 }
 0x820   :  { %v1272_v45 = vmul.f32 0.3275911, %v1267_v38  ;;  %v4372_v46 = vmul.f32 0.70710677, %v4369_v39  ;;  %v1337_v6 = vsub.f32 0.0, %v1267_v38 }
 0x821   :  { %v1237_v10 = vpop.f32.mrf.mxu0 }
 0x822   :  { %v1277_v47 = vadd.f32 1.0, %v1272_v45  ;;  %v1268_v48 = vand.u32 2147483647, %v4372_v46  ;;  %v4375_v50 = vadd.f32 %v2994_v11, %v1237_v10  ;;  %v1342_v49 = vmul.f32 %v1337_v6, %v1267_v38 }
 0x823   :  { %v3380_v40 = vpop.f32.mrf.mxu0  ;;  %vm1258_vm15 = vcmp.ge.f32.partialorder %v4372_v46, 0.0 }
 0x824   :  { %3686 = vrcp.f32 %v1277_v47  ;;  %v1273_v15 = vmul.f32 0.3275911, %v1268_v48  ;;  %v4378_v58 = vmul.f32 0.70710677, %v4375_v50  ;;  %v1338_v18 = vsub.f32 0.0, %v1268_v48 }
 0x825   :  { %v1242_v59 = vpop.f32.mrf.mxu0  ;;  %v1348_v22 = vmul.f32 1.442695, %v1342_v49 }
 0x826   :  { %v1278_v62 = vadd.f32 1.0, %v1273_v15  ;;  %v4380_v42 = vadd.f32 %v2994_v11, %v1242_v59  ;;  %v1269_v0 = vand.u32 2147483647, %v4378_v58  ;;  %v1343_v23 = vmul.f32 %v1338_v18, %v1268_v48 }
 0x827   :  { %v3383_v2 = vpop.f32.mrf.mxu0  ;;  %vm1259_vm5 = vcmp.ge.f32.partialorder %v4378_v58, 0.0 }
 0x828   :  { %3688 = vrcp.f32 %v1278_v62  ;;  %v1274_v7 = vmul.f32 0.3275911, %v1269_v0  ;;  %v4384_v8 = vmul.f32 0.70710677, %v4380_v42  ;;  %v1339_v4 = vsub.f32 0.0, %v1269_v0 }
 0x829   :  { %v1350_v56 = vmul.f32 1.442695, %v1343_v23 }
 0x82a   :  { %v1279_v25 = vadd.f32 1.0, %v1274_v7  ;;  %v1270_v13 = vand.u32 2147483647, %v4384_v8  ;;  %v1344_v32 = vmul.f32 %v1339_v4, %v1269_v0  ;;  %vm1260_vm6 = vcmp.ge.f32.partialorder %v4384_v8, 0.0 }
 0x82c   :  { %v3685_v14 = vpop.eup %3684  ;;  %3690 = vrcp.f32 %v1279_v25  ;;  %v1275_v60 = vmul.f32 0.3275911, %v1270_v13  ;;  %v1340_v29 = vsub.f32 0.0, %v1270_v13  ;;  %v1352_v10 = vmul.f32 1.442695, %v1344_v32 }
 0x82d   :  { %v1291_v51 = vmul.f32 1.0614054, %v3685_v14  ;;  %3692 = vpow2.f32 %v1346_v17 }
 0x82e   :  { %v1280_v19 = vadd.f32 1.0, %v1275_v60  ;;  %v1345_v40 = vmul.f32 %v1340_v29, %v1270_v13 }
 0x82f   :  { %v1296_v30 = vadd.f32 -1.4531521, %v1291_v51 }
 0x830   :  { %3694 = vrcp.f32 %v1280_v19  ;;  %v1354_v51 = vmul.f32 1.442695, %v1345_v40 }
 0x831   :  { %v3687_v21 = vpop.eup %3686  ;;  %v1301_v52 = vmul.f32 %v3685_v14, %v1296_v30  ;;  %3696 = vpow2.f32 %v1348_v22 }
 0x832   :  { %v1292_v61 = vmul.f32 1.0614054, %v3687_v21  ;;  %3698 = vpow2.f32 %v1350_v56 }
 0x833   :  { %v1306_v24 = vadd.f32 1.4214138, %v1301_v52  ;;  %3700 = vpow2.f32 %v1352_v10  ;;  %v3817_v52 = vmov -1.0  }
 0x834   :  { %v1297_v54 = vadd.f32 -1.4531521, %v1292_v61  ;;  %3702 = vpow2.f32 %v1354_v51  ;;  %v1263_v40 = vsel %vm1258_vm15, 1.0, %v3817_v52 }
 0x835   :  { %v3689_v27 = vpop.eup %3688  ;;  %v1311_v5 = vmul.f32 %v3685_v14, %v1306_v24 }
 0x836   :  { %v1302_v11 = vmul.f32 %v3687_v21, %v1297_v54  ;;  %v1293_v55 = vmul.f32 1.0614054, %v3689_v27 }
 0x837   :  { %v1316_v16 = vadd.f32 -0.28449672, %v1311_v5  ;;  %v1246_v5 = vmul.f32 0.5, %v4357_v28  ;;  %v1247_v28 = vmul.f32 0.5, %v4363_v33 }
 0x838   :  { %v1307_v34 = vadd.f32 1.4214138, %v1302_v11  ;;  %v1298_v36 = vadd.f32 -1.4531521, %v1293_v55 }
 0x839   :  { %v1321_v37 = vmul.f32 %v3685_v14, %v1316_v16  ;;  %v4387_v38 = vpop.eup %3690 }
 0x83a   :  { %v1312_v43 = vmul.f32 %v3687_v21, %v1307_v34  ;;  %v1303_v45 = vmul.f32 %v3689_v27, %v1298_v36  ;;  %v1294_v48 = vmul.f32 1.0614054, %v4387_v38  ;;  %v3693_v59 = vpop.eup %3692  ;;  %v1262_v34 = vsel %vm1257_vm13, 1.0, %v3817_v52 }
 0x83b   :  { %v1326_v47 = vadd.f32 0.2548296, %v1321_v37 }
 0x83c   :  { %v1317_v57 = vadd.f32 -0.28449672, %v1312_v43  ;;  %v1308_v15 = vadd.f32 1.4214138, %v1303_v45  ;;  %v1299_v0 = vadd.f32 -1.4531521, %v1294_v48 }
 0x83d   :  { %v1331_v62 = vmul.f32 %v3685_v14, %v1326_v47  ;;  %v3695_v2 = vpop.eup %3694  ;;  %v1261_v14 = vsel %vm1256_vm12, 1.0, %v3817_v52 }
 0x83e   :  { %v1322_v3 = vmul.f32 %v3687_v21, %v1317_v57  ;;  %v1313_v6 = vmul.f32 %v3689_v27, %v1308_v15  ;;  %v1304_v25 = vmul.f32 %v4387_v38, %v1299_v0  ;;  %v1295_v17 = vmul.f32 1.0614054, %v3695_v2  ;;  %v3697_v19 = vpop.eup %3696 }
 0x83f   :  { %v1356_v7 = vmul.f32 %v3693_v59, %v1331_v62  ;;  %v3699_v29 = vpop.eup %3698 }
 0x840   :  { %v1327_v49 = vadd.f32 0.2548296, %v1322_v3  ;;  %v1318_v60 = vadd.f32 -0.28449672, %v1313_v6  ;;  %v1309_v13 = vadd.f32 1.4214138, %v1304_v25  ;;  %v3701_v48 = vpop.eup %3700 }
 0x841   :  { %v1361_v18 = vsub.f32 1.0, %v1356_v7  ;;  %v1300_v30 = vadd.f32 -1.4531521, %v1295_v17  ;;  %v1248_v3 = vmul.f32 0.5, %v4369_v39  ;;  %v3703_v25 = vpop.eup %3702  ;;  %v1249_v39 = vmul.f32 0.5, %v4375_v50 }
 0x842   :  { %v1332_v22 = vmul.f32 %v3687_v21, %v1327_v49  ;;  %v1323_v61 = vmul.f32 %v3689_v27, %v1318_v60  ;;  %v1314_v23 = vmul.f32 %v4387_v38, %v1309_v13  ;;  %v3000_v50 = vld [vmem:[%s4950_s2 + $0x2c] ss:$0 sm:$0xff] }
 0x843   :  { %v1366_v12 = vmul.f32 %v1361_v18, %v1261_v14  ;;  %v1305_v4 = vmul.f32 %v3695_v2, %v1300_v30  ;;  %v1250_v30 = vmul.f32 0.5, %v4380_v42 }
 0x844   :  { %v1357_v24 = vmul.f32 %v3697_v19, %v1332_v22  ;;  %v1328_v54 = vadd.f32 0.2548296, %v1323_v61  ;;  %v1319_v55 = vadd.f32 -0.28449672, %v1314_v23 }
 0x845   :  { %v1371_v11 = vadd.f32 1.0, %v1366_v12  ;;  %v1310_v56 = vadd.f32 1.4214138, %v1305_v4 }
 0x846   :  { %v1362_v32 = vsub.f32 1.0, %v1357_v24  ;;  %v1333_v16 = vmul.f32 %v3689_v27, %v1328_v54  ;;  %v1324_v36 = vmul.f32 %v4387_v38, %v1319_v55 }
 0x847   :  { %v1376_v21 = vmul.f32 %v1371_v11, %v1246_v5  ;;  %v1315_v37 = vmul.f32 %v3695_v2, %v1310_v56 }
 0x848   :  { %v1367_v43 = vmul.f32 %v1362_v32, %v1262_v34  ;;  %v1358_v35 = vmul.f32 %v3699_v29, %v1333_v16  ;;  %v1329_v45 = vadd.f32 0.2548296, %v1324_v36 }
 0x849   :  { %v1320_v10 = vadd.f32 -0.28449672, %v1315_v37  ;;  %3401 = vmatmul.mubr.msk.f32.vlgmr.msra.gmra.mxu1 %vm1394_vm14, %v1376_v21 }
 0x84a   :  { %v1372_v47 = vadd.f32 1.0, %v1367_v43  ;;  %v1363_v27 = vsub.f32 1.0, %v1358_v35  ;;  %3403 = vmatprep.mubr.msk.f32.mxu1 %vm3809_vm0, %v3808_v1  ;;  %v1334_v57 = vmul.f32 %v4387_v38, %v1329_v45  ;;  %v1264_v38 = vsel %vm1259_vm5, 1.0, %v3817_v52 }
 0x84b   :  { %v1325_v15 = vmul.f32 %v3695_v2, %v1320_v10 }
 0x84c   :  { %v1377_v59 = vmul.f32 %v1372_v47, %v1247_v28  ;;  %v1368_v46 = vmul.f32 %v1363_v27, %v1263_v40  ;;  %v1359_v62 = vmul.f32 %v3701_v48, %v1334_v57 }
 0x84d   :  { %v1330_v0 = vadd.f32 0.2548296, %v1325_v15 }
 0x84e   :  { %v1373_v33 = vadd.f32 1.0, %v1368_v46  ;;  %3404 = vmatmul.mubr.msk.f32.gmra.mxu1 %vm1394_vm14, %v1377_v59  ;;  %v1364_v6 = vsub.f32 1.0, %v1359_v62 }
 0x84f   :  { %v1335_v7 = vmul.f32 %v3695_v2, %v1330_v0  ;;  %3406 = vmatprep.mubr.msk.f32.mxu1 %vm3809_vm0, %v3808_v1  ;;  %v1265_v2 = vsel %vm1260_vm6, 1.0, %v3817_v52 }
 0x850   :  { %v1378_v17 = vmul.f32 %v1373_v33, %v1248_v3  ;;  %v1369_v51 = vmul.f32 %v1364_v6, %v1264_v38 }
 0x851   :  { %v1360_v58 = vmul.f32 %v3703_v25, %v1335_v7 }
 0x852   :  { %3407 = vmatmul.mubr.msk.f32.gmra.mxu1 %vm1394_vm14, %v1378_v17  ;;  %v1374_v49 = vadd.f32 1.0, %v1369_v51 }
 0x853   :  { %v1365_v60 = vsub.f32 1.0, %v1360_v58  ;;  %3409 = vmatprep.mubr.msk.f32.mxu1 %vm3809_vm0, %v3808_v1 }
 0x854   :  { %v1379_v18 = vmul.f32 %v1374_v49, %v1249_v39  ;;  %v1593_v49 = vld [vmem:[%s4949_s1 + $0xc8] sm:$0xff] }
 0x855   :  { %v1370_v13 = vmul.f32 %v1365_v60, %v1265_v2  ;;  %3416 = vmatpush3.msra.mxu0 %v1593_v49  ;;  %v1592_v60 = vld [vmem:[%s4949_s1 + $0xc0] sm:$0xff]  ;;  %v1591_v2 = vld [vmem:[%s4949_s1 + $0xb8] sm:$0xff] }
 0x856   :  { %3410 = vmatmul.mubr.msk.f32.gmra.mxu1 %vm1394_vm14, %v1379_v18  ;;  %3417 = vmatprep.subr.mxu0 %v3808_v1  ;;  %v1590_v18 = vld [vmem:[%s4949_s1 + $0xb0] sm:$0xff] }
 0x857   :  { %v1375_v19 = vadd.f32 1.0, %v1370_v13  ;;  %3412 = vmatprep.mubr.msk.f32.mxu1 %vm3809_vm0, %v3808_v1  ;;  %3418 = vmatpush3.msra.mxu0 %v1592_v60 }
 0x858   :  { %3419 = vmatprep.subr.mxu0 %v3808_v1 }
 0x859   :  { %v1380_v8 = vmul.f32 %v1375_v19, %v1250_v30  ;;  %3420 = vmatpush3.msra.mxu0 %v1591_v2 }
 0x85a   :  { %3421 = vmatprep.subr.mxu0 %v3808_v1 }
 0x85b   :  { %3413 = vmatmul.mubr.msk.f32.gmra.mxu1 %vm1394_vm14, %v1380_v8  ;;  %3422 = vmatpush3.msra.mxu0 %v1590_v18 }
 0x85c   :  { %3448 = vmatprep.mubr.msk.f32.mxu1 %vm3809_vm0, %v3808_v1  ;;  %3463 = vmatprep.subr.mxu0 %v3808_v1 }
 0x909   :  { %v1476_v14 = vpop.f32.mrf.mxu1 }
 0x90a   :  { %v1477_v22 = vadd.f32 %v3000_v50, %v1476_v14 }
 0x90b   :  { %v3402_v61 = vpop.f32.mrf.mxu1 }
 0x90c   :  { %v4428_v42 = vadd.f32 %v1477_v22, %v4236_v31 }
 0x90e   :  { %v1481_v12 = vpop.f32.mrf.mxu1  ;;  %v1507_v23 = vsel %vm182_vm2, %v4428_v42, 0.0 }
 0x90f   :  { %v1482_v4 = vadd.f32 %v3000_v50, %v1481_v12  ;;  %1508 = vadd.xlane.f32.xlu1 %v1507_v23 }
 0x910   :  { %v3405_v24 = vpop.f32.mrf.mxu1 }
 0x911   :  { %v4433_v54 = vadd.f32 %v1482_v4, %v4241_v44 }
 0x912   :  { %v1486_v5 = vpop.f32.mrf.mxu1 }
 0x913   :  { %v1487_v11 = vadd.f32 %v3000_v50, %v1486_v5  ;;  %v1510_v55 = vsel %vm182_vm2, %v4433_v54, 0.0 }
 0x914   :  { %1511 = vadd.xlane.f32.xlu0 %v1510_v55  ;;  %v3408_v56 = vpop.f32.mrf.mxu1 }
 0x915   :  { %v4438_v31 = vadd.f32 %v1487_v11, %v4246_v53  ;;  %v3006_v11 = vld [vmem:[%s4950_s2 + $0x2d] ss:$0 sm:$0xff] }
 0x916   :  { %v1491_v32 = vpop.f32.mrf.mxu1 }
 0x917   :  { %v1513_v16 = vsel %vm182_vm2, %v4438_v31, 0.0  ;;  %v1492_v29 = vadd.f32 %v3000_v50, %v1491_v32 }
 0x918   :  { %1514 = vadd.xlane.f32.xlu1 %v1513_v16  ;;  %v3411_v21 = vpop.f32.mrf.mxu1  ;;  %v3007_v16 = vld [vmem:[%s4950_s2 + $0x2e] ss:$0 sm:$0xff] }
 0x919   :  { %v4443_v44 = vadd.f32 %v1492_v29, %v4251_v20 }
 0x91b   :  { %v1496_v34 = vpop.f32.mrf.mxu1  ;;  %v1516_v37 = vsel %vm182_vm2, %v4443_v44, 0.0 }
 0x91c   :  { %v1497_v36 = vadd.f32 %v3000_v50, %v1496_v34  ;;  %1517 = vadd.xlane.f32.xlu0 %v1516_v37 }
 0x91d   :  { %v3414_v43 = vpop.f32.mrf.mxu1 }
 0x91e   :  { %v4448_v53 = vadd.f32 %v1497_v36, %v4256_v9 }
 0x920   :  { %v1519_v35 = vsel %vm195_vm3, %v4448_v53, 0.0 }
 0x921   :  { %1520 = vadd.xlane.f32.xlu1 %v1519_v35 }
 0x998   :  { %v1509_v45 = vpop.xlane.xlu1 %1508 }
 0x999   :  { %v1522_v10 = vmul.f32 0.03125, %v1509_v45 }
 0x99b   :  { %v1527_v28 = vsub.f32 %v4428_v42, %v1522_v10 }
 0x99d   :  { %v1512_v20 = vpop.xlane.xlu0 %1511  ;;  %v1532_v47 = vmul.f32 %v1527_v28, %v1527_v28 }
 0x99e   :  { %v1523_v27 = vmul.f32 0.03125, %v1512_v20 }
 0x99f   :  { %v1537_v48 = vsel %vm182_vm2, %v1532_v47, 0.0 }
 0x9a0   :  { %v1528_v40 = vsub.f32 %v4433_v54, %v1523_v27  ;;  %1538 = vadd.xlane.f32.xlu0 %v1537_v48 }
 0x9a1   :  { %v1515_v57 = vpop.xlane.xlu1 %1514 }
 0x9a2   :  { %v1524_v15 = vmul.f32 0.03125, %v1515_v57  ;;  %v1533_v9 = vmul.f32 %v1528_v40, %v1528_v40 }
 0x9a4   :  { %v4456_v59 = vsub.f32 %v4438_v31, %v1524_v15  ;;  %v1540_v46 = vsel %vm182_vm2, %v1533_v9, 0.0 }
 0x9a5   :  { %1541 = vadd.xlane.f32.xlu1 %v1540_v46  ;;  %v1518_v62 = vpop.xlane.xlu0 %1517 }
 0x9a6   :  { %v1534_v0 = vmul.f32 %v4456_v59, %v4456_v59  ;;  %v1525_v3 = vmul.f32 0.03125, %v1518_v62 }
 0x9a8   :  { %v1543_v33 = vsel %vm182_vm2, %v1534_v0, 0.0  ;;  %v1530_v6 = vsub.f32 %v4443_v44, %v1525_v3 }
 0x9a9   :  { %1544 = vadd.xlane.f32.xlu0 %v1543_v33 }
 0x9aa   :  { %v1521_v7 = vpop.xlane.xlu1 %1520  ;;  %v1535_v17 = vmul.f32 %v1530_v6, %v1530_v6 }
 0x9ab   :  { %v1526_v25 = vmul.f32 0.03125, %v1521_v7 }
 0x9ac   :  { %v1546_v51 = vsel %vm182_vm2, %v1535_v17, 0.0  ;;  %v3008_v17 = vld [vmem:[%s4950_s2 + $0x2f] ss:$0 sm:$0xff] }
 0x9ad   :  { %v4464_v38 = vsub.f32 %v4448_v53, %v1526_v25  ;;  %1547 = vadd.xlane.f32.xlu1 %v1546_v51 }
 0x9af   :  { %v1536_v58 = vmul.f32 %v4464_v38, %v4464_v38 }
 0x9b1   :  { %v1549_v39 = vsel %vm195_vm3, %v1536_v58, 0.0 }
 0x9b2   :  { %1550 = vadd.xlane.f32.xlu0 %v1549_v39 }
 0xa29   :  { %v1539_v13 = vpop.xlane.xlu0 %1538 }
 0xa2a   :  { %v1552_v30 = vmul.f32 0.03125, %v1539_v13 }
 0xa2c   :  { %v1557_v19 = vadd.f32 1e-06, %v1552_v30 }
 0xa2e   :  { %3704 = vrsqrt.f32 %v1557_v19  ;;  %v1542_v8 = vpop.xlane.xlu1 %1541 }
 0xa2f   :  { %v1553_v50 = vmul.f32 0.03125, %v1542_v8 }
 0xa31   :  { %v1558_v14 = vadd.f32 1e-06, %v1553_v50 }
 0xa32   :  { %v1545_v22 = vpop.xlane.xlu0 %1544 }
 0xa33   :  { %3706 = vrsqrt.f32 %v1558_v14  ;;  %v1554_v61 = vmul.f32 0.03125, %v1545_v22 }
 0xa35   :  { %v1559_v12 = vadd.f32 1e-06, %v1554_v61 }
 0xa36   :  { %v1548_v23 = vpop.xlane.xlu1 %1547 }
 0xa37   :  { %3708 = vrsqrt.f32 %v1559_v12  ;;  %v1555_v4 = vmul.f32 0.03125, %v1548_v23 }
 0xa39   :  { %v1560_v24 = vadd.f32 1e-06, %v1555_v4 }
 0xa3b   :  { %v3705_v5 = vpop.eup %3704  ;;  %v1551_v55 = vpop.xlane.xlu0 %1550  ;;  %3710 = vrsqrt.f32 %v1560_v24 }
 0xa3c   :  { %v1567_v56 = vmul.f32 %v3705_v5, %v1527_v28  ;;  %v1556_v32 = vmul.f32 0.03125, %v1551_v55 }
 0xa3e   :  { %v1576_v29 = vmul.f32 %v3006_v11, %v1567_v56  ;;  %v1561_v21 = vadd.f32 1e-06, %v1556_v32 }
 0xa40   :  { %v3707_v34 = vpop.eup %3706  ;;  %3712 = vrsqrt.f32 %v1561_v21  ;;  %v1585_v36 = vadd.f32 %v3007_v16, %v1576_v29 }
 0xa41   :  { %v1568_v37 = vmul.f32 %v3707_v34, %v1528_v40 }
 0xa42   :  { %3424 = vmatmul.mubr.msk.f32.vlgmr.msra.gmra.mxu0 %vm182_vm2, %v1585_v36 }
 0xa43   :  { %3426 = vmatprep.mubr.msk.f32.mxu0 %vm3809_vm0, %v3808_v1  ;;  %v1577_v43 = vmul.f32 %v3006_v11, %v1568_v37 }
 0xa44   :  { %v3709_v35 = vpop.eup %3708 }
 0xa45   :  { %v1586_v45 = vadd.f32 %v3007_v16, %v1577_v43  ;;  %v1569_v10 = vmul.f32 %v3709_v35, %v4456_v59 }
 0xa47   :  { %3427 = vmatmul.mubr.msk.f32.gmra.mxu0 %vm182_vm2, %v1586_v45  ;;  %v1578_v28 = vmul.f32 %v3006_v11, %v1569_v10 }
 0xa48   :  { %3429 = vmatprep.mubr.msk.f32.mxu0 %vm3809_vm0, %v3808_v1  ;;  %v3711_v20 = vpop.eup %3710 }
 0xa49   :  { %v1587_v47 = vadd.f32 %v3007_v16, %v1578_v28  ;;  %v1570_v27 = vmul.f32 %v3711_v20, %v1530_v6 }
 0xa4b   :  { %3430 = vmatmul.mubr.msk.f32.gmra.mxu0 %vm182_vm2, %v1587_v47  ;;  %v1579_v48 = vmul.f32 %v3006_v11, %v1570_v27 }
 0xa4c   :  { %3432 = vmatprep.mubr.msk.f32.mxu0 %vm3809_vm0, %v3808_v1 }
 0xa4d   :  { %v3713_v40 = vpop.eup %3712  ;;  %v1588_v57 = vadd.f32 %v3007_v16, %v1579_v48 }
 0xa4e   :  { %v1571_v15 = vmul.f32 %v3713_v40, %v4464_v38 }
 0xa4f   :  { %3433 = vmatmul.mubr.msk.f32.gmra.mxu0 %vm182_vm2, %v1588_v57 }
 0xa50   :  { %v1580_v9 = vmul.f32 %v3006_v11, %v1571_v15  ;;  %3435 = vmatprep.mubr.msk.f32.mxu0 %vm3809_vm0, %v3808_v1 }
 0xa52   :  { %v1589_v59 = vadd.f32 %v3007_v16, %v1580_v9 }
 0xa54   :  { %3436 = vmatmul.mubr.msk.f32.gmra.mxu0 %vm182_vm2, %v1589_v59 }
 0xa55   :  { %3473 = vmatprep.mubr.msk.f32.mxu0 %vm3809_vm0, %v3808_v1 }
 0xb02   :  { %v1680_v46 = vpop.f32.mrf.mxu0 }
 0xb03   :  { %v4526_v60 = vadd.f32 %v3008_v17, %v1680_v46 }
 0xb04   :  { %v3425_v62 = vpop.f32.mrf.mxu0 }
 0xb05   :  { %v1704_v18 = vmul.f32 0.25, %v4526_v60 }
 0xb07   :  { %v1685_v0 = vpop.f32.mrf.mxu0 }
 0xb08   :  { %v4528_v2 = vadd.f32 %v3008_v17, %v1685_v0 }
 0xb09   :  { %v3428_v3 = vpop.f32.mrf.mxu0 }
 0xb0a   :  { %v1705_v13 = vmul.f32 0.25, %v4528_v2 }
 0xb0b   :  { %v1690_v33 = vpop.f32.mrf.mxu0 }
 0xb0c   :  { %v4518_v39 = vadd.f32 %v3008_v17, %v1690_v33 }
 0xb0d   :  { %v3431_v6 = vpop.f32.mrf.mxu0 }
 0xb0e   :  { %v1706_v19 = vmul.f32 0.25, %v4518_v39 }
 0xb0f   :  { %v1695_v7 = vpop.f32.mrf.mxu0 }
 0xb10   :  { %v4520_v49 = vadd.f32 %v3008_v17, %v1695_v7 }
 0xb11   :  { %v3434_v25 = vpop.f32.mrf.mxu0 }
 0xb12   :  { %v1707_v30 = vmul.f32 0.25, %v4520_v49 }
 0xb14   :  { %v1700_v38 = vpop.f32.mrf.mxu0 }
 0xb15   :  { %v4512_v51 = vadd.f32 %v3008_v17, %v1700_v38 }
 0xb16   :  { %v3437_v58 = vpop.f32.mrf.mxu0 }
 0xb17   :  { %1722 = vrot.lane.b32.xlu0 %v4512_v51, %s3810_s22  ;;  %1927 = vrot.lane.b32.xlu1 %v4512_v51, %s3811_s23  ;;  %v1708_v8 = vmul.f32 0.25, %v4512_v51 }
 0xb1b   :  { %1718 = vrot.lane.b32.xlu0 %v4518_v39, %s3810_s22  ;;  %1925 = vrot.lane.b32.xlu1 %v4520_v49, %s3811_s23 }
 0xb1f   :  { %1716 = vrot.lane.b32.xlu0 %v4528_v2, %s3810_s22  ;;  %1720 = vrot.lane.b32.xlu1 %v4520_v49, %s3810_s22 }
 0xb23   :  { %1909 = vrot.lane.b32.xlu0 %v1704_v18, %s3812_s24  ;;  %1923 = vrot.lane.b32.xlu1 %v4518_v39, %s3811_s23 }
 0xb27   :  { %1911 = vrot.lane.b32.xlu0 %v1705_v13, %s3812_s24  ;;  %1921 = vrot.lane.b32.xlu1 %v4528_v2, %s3811_s23 }
 0xb2b   :  { %1915 = vrot.lane.b32.xlu0 %v1707_v30, %s3812_s24  ;;  %1919 = vrot.lane.b32.xlu1 %v4526_v60, %s3811_s23 }
 0xb2f   :  { %1714 = vrot.lane.b32.xlu1 %v4526_v60, %s3810_s22 }
 0xb33   :  { %1913 = vrot.lane.b32.xlu1 %v1706_v19, %s3812_s24 }
 0xb37   :  { %1917 = vrot.lane.b32.xlu1 %v1708_v8, %s3812_s24 }
 0xb89   :  { %v1723_v50 = vpop.permute.xlu0 %1722  ;;  %v1928_v14 = vpop.permute.xlu1 %1927 }
 0xb8a   :  { %3439 = vmatpush3.xpose.msk.msra.mxu1 %vm27_vm1, %v1723_v50  ;;  %3464 = vmatpush3.xpose.msk.msra.mxu0 %vm27_vm1, %v1928_v14 }
 0xb8b   :  { %3465 = vmatprep.subr.mxu0 %v3808_v1  ;;  %3440 = vmatprep.subr.mxu1 %v3808_v1 }
 0xb8d   :  { %v1926_v22 = vpop.permute.xlu1 %1925  ;;  %v1719_v12 = vpop.permute.xlu0 %1718 }
 0xb8e   :  { %3466 = vmatpush3.xpose.msk.msra.mxu0 %vm27_vm1, %v1926_v22 }
 0xb8f   :  { %3467 = vmatprep.subr.mxu0 %v3808_v1 }
 0xb91   :  { %v1721_v61 = vpop.permute.xlu1 %1720  ;;  %v1717_v4 = vpop.permute.xlu0 %1716 }
 0xb92   :  { %3441 = vmatpush3.xpose.msk.msra.mxu1 %vm27_vm1, %v1721_v61 }
 0xb93   :  { %3442 = vmatprep.subr.mxu1 %v3808_v1 }
 0xb95   :  { %v1924_v23 = vpop.permute.xlu1 %1923  ;;  %v1910_v11 = vpop.permute.xlu0 %1909 }
 0xb96   :  { %3443 = vmatpush3.xpose.msk.msra.mxu1 %vm27_vm1, %v1719_v12  ;;  %3468 = vmatpush3.xpose.msk.msra.mxu0 %vm27_vm1, %v1924_v23 }
 0xb97   :  { %3444 = vmatprep.subr.mxu1 %v3808_v1  ;;  %3469 = vmatprep.subr.mxu0 %v3808_v1 }
 0xb99   :  { %v1922_v24 = vpop.permute.xlu1 %1921  ;;  %v1912_v56 = vpop.permute.xlu0 %1911 }
 0xb9a   :  { %3445 = vmatpush3.xpose.msk.msra.mxu1 %vm27_vm1, %v1717_v4  ;;  %3470 = vmatpush3.xpose.msk.msra.mxu0 %vm27_vm1, %v1922_v24 }
 0xb9b   :  { %3471 = vmatprep.subr.mxu0 %v3808_v1  ;;  %3446 = vmatprep.subr.mxu1 %v3808_v1 }
 0xb9d   :  { %v1920_v5 = vpop.permute.xlu1 %1919  ;;  %v1916_v16 = vpop.permute.xlu0 %1915 }
 0xb9e   :  { %3472 = vmatpush3.xpose.msk.msra.mxu0 %vm27_vm1, %v1920_v5 }
 0xb9f   :  { %3513 = vmatprep.subr.mxu0 %v3808_v1 }
 0xba1   :  { %3474 = vmatmul.mubr.msk.f32.vlgmr.msra.gmra.mxu0 %vm27_vm1, %v1910_v11  ;;  %v1715_v55 = vpop.permute.xlu1 %1714 }
 0xba2   :  { %3447 = vmatpush3.xpose.msk.msra.mxu1 %vm27_vm1, %v1715_v55  ;;  %3476 = vmatprep.mubr.msk.f32.mxu0 %vm3809_vm0, %v3808_v1 }
 0xba3   :  { %3488 = vmatprep.subr.mxu1 %v3808_v1 }
 0xba5   :  { %3449 = vmatmul.mubr.msk.f32.vlgmr.msra.gmra.mxu1 %vm27_vm1, %v1704_v18  ;;  %3477 = vmatmul.mubr.msk.f32.gmra.mxu0 %vm27_vm1, %v1912_v56  ;;  %v1914_v32 = vpop.permute.xlu1 %1913 }
 0xba6   :  { %3451 = vmatprep.mubr.msk.f32.mxu1 %vm3809_vm0, %v3808_v1  ;;  %3479 = vmatprep.mubr.msk.f32.mxu0 %vm3809_vm0, %v3808_v1 }
 0xba9   :  { %3452 = vmatmul.mubr.msk.f32.gmra.mxu1 %vm27_vm1, %v1705_v13  ;;  %3480 = vmatmul.mubr.msk.f32.gmra.mxu0 %vm27_vm1, %v1914_v32  ;;  %v1918_v29 = vpop.permute.xlu1 %1917 }
 0xbaa   :  { %3454 = vmatprep.mubr.msk.f32.mxu1 %vm3809_vm0, %v3808_v1  ;;  %3482 = vmatprep.mubr.msk.f32.mxu0 %vm3809_vm0, %v3808_v1 }
 0xbad   :  { %3455 = vmatmul.mubr.msk.f32.gmra.mxu1 %vm27_vm1, %v1706_v19  ;;  %3483 = vmatmul.mubr.msk.f32.gmra.mxu0 %vm27_vm1, %v1916_v16 }
 0xbae   :  { %3457 = vmatprep.mubr.msk.f32.mxu1 %vm3809_vm0, %v3808_v1  ;;  %3485 = vmatprep.mubr.msk.f32.mxu0 %vm3809_vm0, %v3808_v1 }
 0xbb1   :  { %3458 = vmatmul.mubr.msk.f32.gmra.mxu1 %vm27_vm1, %v1707_v30  ;;  %3486 = vmatmul.mubr.msk.f32.gmra.mxu0 %vm27_vm1, %v1918_v29 }
 0xbb2   :  { %3460 = vmatprep.mubr.msk.f32.mxu1 %vm3809_vm0, %v3808_v1  ;;  %3523 = vmatprep.mubr.msk.f32.mxu0 %vm3809_vm0, %v3808_v1 }
 0xbb5   :  { %3461 = vmatmul.mubr.msk.f32.gmra.mxu1 %vm27_vm1, %v1708_v8 }
 0xbb6   :  { %3498 = vmatprep.mubr.msk.f32.mxu1 %vm3809_vm0, %v3808_v1 }
 0xc61   :  { %v2015_v21 = vpop.f32.mrf.mxu0 }
 0xc62   :  { %v2016_v34 = vadd.f32 %v2015_v21, %v4082_v26 }
 0xc63   :  { %v3475_v36 = vpop.f32.mrf.mxu0 }
 0xc64   :  { %v2039_v37 = vsel %vm517_vm8, %v2016_v34, -inf }
 0xc65   :  { %v1815_v43 = vpop.f32.mrf.mxu1  ;;  %2040 = vmax.xlane.f32.xlu0 %v2039_v37  ;;  %v2020_v35 = vpop.f32.mrf.mxu0 }
 0xc66   :  { %v1816_v45 = vadd.f32 %v1815_v43, %v4082_v26  ;;  %v2021_v10 = vadd.f32 %v2020_v35, %v4082_v26 }
 0xc67   :  { %v3450_v28 = vpop.f32.mrf.mxu1  ;;  %v3478_v20 = vpop.f32.mrf.mxu0 }
 0xc68   :  { %v1839_v47 = vsel %vm517_vm8, %v1816_v45, -inf  ;;  %v2042_v27 = vsel %vm517_vm8, %v2021_v10, -inf }
 0xc69   :  { %v1820_v48 = vpop.f32.mrf.mxu1  ;;  %1840 = vmax.xlane.f32.xlu1 %v1839_v47  ;;  %2043 = vmax.xlane.f32.xlu0 %v2042_v27  ;;  %v2025_v40 = vpop.f32.mrf.mxu0 }
 0xc6a   :  { %v1821_v57 = vadd.f32 %v1820_v48, %v4082_v26  ;;  %v2026_v59 = vadd.f32 %v2025_v40, %v4095_v41 }
 0xc6b   :  { %v3453_v15 = vpop.f32.mrf.mxu1  ;;  %v3481_v9 = vpop.f32.mrf.mxu0 }
 0xc6c   :  { %v1842_v46 = vsel %vm517_vm8, %v1821_v57, -inf  ;;  %v2045_v17 = vsel %vm517_vm8, %v2026_v59, -inf }
 0xc6d   :  { %v1825_v62 = vpop.f32.mrf.mxu1  ;;  %1843 = vmax.xlane.f32.xlu0 %v1842_v46  ;;  %v2030_v0 = vpop.f32.mrf.mxu0 }
 0xc6e   :  { %v1826_v3 = vadd.f32 %v1825_v62, %v4095_v41  ;;  %v2031_v7 = vadd.f32 %v2030_v0, %v4095_v41 }
 0xc6f   :  { %v3456_v33 = vpop.f32.mrf.mxu1  ;;  %v3484_v6 = vpop.f32.mrf.mxu0 }
 0xc70   :  { %v1845_v25 = vsel %vm517_vm8, %v1826_v3, -inf  ;;  %v2048_v8 = vsel %vm517_vm8, %v2031_v7, -inf }
 0xc71   :  { %v1830_v26 = vpop.f32.mrf.mxu1  ;;  %1846 = vmax.xlane.f32.xlu1 %v1845_v25  ;;  %2046 = vmax.xlane.f32.xlu0 %v2045_v17  ;;  %v2035_v38 = vpop.f32.mrf.mxu0 }
 0xc72   :  { %v1831_v58 = vadd.f32 %v1830_v26, %v4095_v41  ;;  %v2036_v30 = vadd.f32 %v2035_v38, %v4107_v63 }
 0xc73   :  { %v3459_v18 = vpop.f32.mrf.mxu1  ;;  %v3487_v13 = vpop.f32.mrf.mxu0 }
 0xc74   :  { %v1848_v19 = vsel %vm517_vm8, %v1831_v58, -inf  ;;  %v2051_v22 = vsel %vm530_vm11, %v2036_v30, -inf }
 0xc75   :  { %1849 = vmax.xlane.f32.xlu1 %v1848_v19  ;;  %v1835_v50 = vpop.f32.mrf.mxu1  ;;  %2049 = vmax.xlane.f32.xlu0 %v2048_v8 }
 0xc76   :  { %v4633_v41 = vadd.f32 %v1835_v50, %v4107_v63 }
 0xc77   :  { %v3462_v14 = vpop.f32.mrf.mxu1 }
 0xc78   :  { %v1851_v61 = vsel %vm530_vm11, %v4633_v41, -inf }
 0xc79   :  { %2052 = vmax.xlane.f32.xlu0 %v2051_v22 }
 0xc86   :  { %2115 = vrot.lane.b32.xlu1 %v4520_v49, %s3813_s25 }
 0xc8a   :  { %2113 = vrot.lane.b32.xlu1 %v4518_v39, %s3813_s25 }
 0xc8e   :  { %2238 = vrot.lane.b32.xlu1 %v4512_v51, %s3816_s26 }
 0xc8f   :  { %2117 = vrot.lane.b32.xlu0 %v4512_v51, %s3813_s25 }
 0xc93   :  { %2111 = vrot.lane.b32.xlu0 %v4528_v2, %s3813_s25 }
 0xc97   :  { %2109 = vrot.lane.b32.xlu0 %v4526_v60, %s3813_s25 }
 0xcb2   :  { %1852 = vmax.xlane.f32.xlu1 %v1851_v61 }
 0xcc3   :  { %2236 = vrot.lane.b32.xlu1 %v4520_v49, %s3816_s26 }
 0xcc7   :  { %2234 = vrot.lane.b32.xlu1 %v4518_v39, %s3816_s26 }
 0xcee   :  { %v2041_v51 = vpop.xlane.xlu0 %2040 }
 0xcef   :  { %v2054_v12 = vsub.f32 %v2016_v34, %v2041_v51 }
 0xcf1   :  { %v2059_v23 = vmul.f32 1.442695, %v2054_v12 }
 0xcf2   :  { %v1841_v4 = vpop.xlane.xlu1 %1840  ;;  %v2044_v24 = vpop.xlane.xlu0 %2043 }
 0xcf3   :  { %3714 = vpow2.f32 %v2059_v23  ;;  %v1854_v5 = vsub.f32 %v1816_v45, %v1841_v4  ;;  %v2055_v11 = vsub.f32 %v2021_v10, %v2044_v24 }
 0xcf5   :  { %v1859_v63 = vmul.f32 1.442695, %v1854_v5  ;;  %v2061_v55 = vmul.f32 1.442695, %v2055_v11 }
 0xcf6   :  { %v1844_v56 = vpop.xlane.xlu0 %1843 }
 0xcf7   :  { %3716 = vpow2.f32 %v1859_v63  ;;  %v1855_v32 = vsub.f32 %v1821_v57, %v1844_v56 }
 0xcf8   :  { %3718 = vpow2.f32 %v2061_v55 }
 0xcf9   :  { %v1861_v16 = vmul.f32 1.442695, %v1855_v32 }
 0xcfa   :  { %v1847_v29 = vpop.xlane.xlu1 %1846  ;;  %v2047_v49 = vpop.xlane.xlu0 %2046 }
 0xcfb   :  { %3720 = vpow2.f32 %v1861_v16  ;;  %v1856_v21 = vsub.f32 %v1826_v3, %v1847_v29  ;;  %v2056_v39 = vsub.f32 %v2026_v59, %v2047_v49 }
 0xcfd   :  { %v1863_v36 = vmul.f32 1.442695, %v1856_v21  ;;  %v2063_v34 = vmul.f32 1.442695, %v2056_v39 }
 0xcfe   :  { %v1850_v37 = vpop.xlane.xlu1 %1849  ;;  %v2050_v43 = vpop.xlane.xlu0 %2049 }
 0xcff   :  { %3722 = vpow2.f32 %v1863_v36  ;;  %v1857_v35 = vsub.f32 %v1831_v58, %v1850_v37  ;;  %v2057_v45 = vsub.f32 %v2031_v7, %v2050_v43 }
 0xd00   :  { %v4641_v10 = vpop.eup %3714  ;;  %3724 = vpow2.f32 %v2063_v34 }
 0xd01   :  { %v1865_v28 = vmul.f32 1.442695, %v1857_v35  ;;  %v2065_v20 = vmul.f32 1.442695, %v2057_v45  ;;  %v2069_v47 = vsel %vm517_vm8, %v4641_v10, 0.0 }
 0xd02   :  { %v2116_v27 = vpop.permute.xlu1 %2115  ;;  %2070 = vadd.xlane.f32.xlu0 %v2069_v47  ;;  %v2053_v48 = vpop.xlane.xlu0 %2052 }
 0xd03   :  { %3726 = vpow2.f32 %v1865_v28  ;;  %v2058_v40 = vsub.f32 %v2036_v30, %v2053_v48 }
 0xd04   :  { %v4645_v57 = vpop.eup %3716  ;;  %3728 = vpow2.f32 %v2065_v20 }
 0xd05   :  { %v4647_v15 = vpop.eup %3718  ;;  %v2067_v9 = vmul.f32 1.442695, %v2058_v40  ;;  %v1869_v59 = vsel %vm517_vm8, %v4645_v57, 0.0 }
 0xd06   :  { %v2114_v46 = vpop.permute.xlu1 %2113  ;;  %1870 = vadd.xlane.f32.xlu1 %v1869_v59  ;;  %v2072_v62 = vsel %vm517_vm8, %v4647_v15, 0.0  ;;  %v2118_v0 = vpop.permute.xlu0 %2117 }
 0xd07   :  { %3730 = vpow2.f32 %v2067_v9  ;;  %2073 = vadd.xlane.f32.xlu0 %v2072_v62  ;;  %3489 = vmatpush3.msk.msra.mxu1 %vm818_vm4, %v2118_v0 }
 0xd08   :  { %v4654_v3 = vpop.eup %3720  ;;  %3490 = vmatprep.subr.mxu1 %v3808_v1 }
 0xd09   :  { %3491 = vmatpush3.msra.mxu1 %v2116_v27  ;;  %v1872_v33 = vsel %vm517_vm8, %v4654_v3, 0.0 }
 0xd0a   :  { %v4659_v6 = vpop.permute.xlu1 %2238  ;;  %1873 = vadd.xlane.f32.xlu1 %v1872_v33  ;;  %3492 = vmatprep.subr.mxu1 %v3808_v1  ;;  %v2112_v7 = vpop.permute.xlu0 %2111 }
 0xd0b   :  { %3493 = vmatpush3.msra.mxu1 %v2114_v46  ;;  %3514 = vmatpush3.msk.msra.mxu0 %vm818_vm4, %v4659_v6 }
 0xd0c   :  { %v4664_v25 = vpop.eup %3722  ;;  %3494 = vmatprep.subr.mxu1 %v3808_v1  ;;  %3515 = vmatprep.subr.mxu0 %v3808_v1 }
 0xd0d   :  { %v4668_v17 = vpop.eup %3724  ;;  %3495 = vmatpush3.msra.mxu1 %v2112_v7  ;;  %v1875_v26 = vsel %vm517_vm8, %v4664_v25, 0.0 }
 0xd0e   :  { %1876 = vadd.xlane.f32.xlu1 %v1875_v26  ;;  %v2075_v38 = vsel %vm517_vm8, %v4668_v17, 0.0  ;;  %3496 = vmatprep.subr.mxu1 %v3808_v1  ;;  %v2110_v58 = vpop.permute.xlu0 %2109 }
 0xd0f   :  { %2076 = vadd.xlane.f32.xlu0 %v2075_v38  ;;  %3497 = vmatpush3.msra.mxu1 %v2110_v58 }
 0xd10   :  { %v4675_v18 = vpop.eup %3726  ;;  %3603 = vmatprep.subr.mxu1 %v3808_v1 }
 0xd11   :  { %v4678_v13 = vpop.eup %3728  ;;  %v1878_v30 = vsel %vm517_vm8, %v4675_v18, 0.0 }
 0xd12   :  { %1879 = vadd.xlane.f32.xlu1 %v1878_v30  ;;  %v2078_v19 = vsel %vm517_vm8, %v4678_v13, 0.0 }
 0xd13   :  { %2079 = vadd.xlane.f32.xlu0 %v2078_v19 }
 0xd14   :  { %v4684_v8 = vpop.eup %3730 }
 0xd15   :  { %v2081_v50 = vsel %vm530_vm11, %v4684_v8, 0.0 }
 0xd17   :  { %2082 = vadd.xlane.f32.xlu0 %v2081_v50 }
 0xd2d   :  { %2232 = vrot.lane.b32.xlu0 %v4528_v2, %s3816_s26 }
 0xd3b   :  { %v1853_v14 = vpop.xlane.xlu1 %1852 }
 0xd3c   :  { %v1858_v22 = vsub.f32 %v4633_v41, %v1853_v14 }
 0xd3e   :  { %v1867_v61 = vmul.f32 1.442695, %v1858_v22 }
 0xd3f   :  { %v2237_v51 = vpop.permute.xlu1 %2236 }
 0xd40   :  { %3732 = vpow2.f32 %v1867_v61  ;;  %3516 = vmatpush3.msra.mxu0 %v2237_v51 }
 0xd41   :  { %3517 = vmatprep.subr.mxu0 %v3808_v1 }
 0xd43   :  { %v2235_v12 = vpop.permute.xlu1 %2234 }
 0xd44   :  { %3518 = vmatpush3.msra.mxu0 %v2235_v12 }
 0xd45   :  { %3519 = vmatprep.subr.mxu0 %v3808_v1 }
 0xd4d   :  { %v4693_v23 = vpop.eup %3732 }
 0xd4e   :  { %v1881_v4 = vsel %vm530_vm11, %v4693_v23, 0.0 }
 0xd4f   :  { %1882 = vadd.xlane.f32.xlu1 %v1881_v4 }
 0xd60   :  { %2230 = vrot.lane.b32.xlu1 %v4526_v60, %s3816_s26 }
 0xd8b   :  { %v2071_v2 = vpop.xlane.xlu0 %2070 }
 0xd8c   :  { %3734 = vrcp.f32 %v2071_v2 }
 0xd8f   :  { %v1871_v46 = vpop.xlane.xlu1 %1870 }
 0xd90   :  { %v2074_v41 = vpop.xlane.xlu0 %2073 }
 0xd91   :  { %3736 = vrcp.f32 %v2074_v41 }
 0xd93   :  { %v1874_v62 = vpop.xlane.xlu1 %1873 }
 0xd97   :  { %v1877_v0 = vpop.xlane.xlu1 %1876 }
 0xd98   :  { %v2077_v24 = vpop.xlane.xlu0 %2076 }
 0xd99   :  { %v3735_v5 = vpop.eup %3734  ;;  %3738 = vrcp.f32 %v2077_v24 }
 0xd9a   :  { %v2089_v11 = vmul.f32 %v3735_v5, %v2071_v2 }
 0xd9b   :  { %v1880_v33 = vpop.xlane.xlu1 %1879 }
 0xd9c   :  { %v2094_v63 = vsub.f32 2.0, %v2089_v11  ;;  %v2080_v55 = vpop.xlane.xlu0 %2079 }
 0xd9d   :  { %3740 = vrcp.f32 %v2080_v55 }
 0xd9e   :  { %v3737_v56 = vpop.eup %3736  ;;  %v2099_v32 = vmul.f32 %v3735_v5, %v2094_v63 }
 0xd9f   :  { %v2090_v16 = vmul.f32 %v3737_v56, %v2074_v41 }
 0xda0   :  { %v2104_v29 = vmul.f32 %v4641_v10, %v2099_v32  ;;  %v2083_v49 = vpop.xlane.xlu0 %2082 }
 0xda1   :  { %v2095_v21 = vsub.f32 2.0, %v2090_v16  ;;  %3742 = vrcp.f32 %v2083_v49 }
 0xda2   :  { %3499 = vmatmul.mubr.msk.f32.vlgmr.msra.gmra.mxu1 %vm517_vm8, %v2104_v29  ;;  %3744 = vrcp.f32 %v1871_v46 }
 0xda3   :  { %v2100_v60 = vmul.f32 %v3737_v56, %v2095_v21  ;;  %3608 = vmatpush3.msk.msra.mxu1 %vm818_vm4, %v4659_v6  ;;  %3501 = vmatprep.mubr.msk.f32.mxu1 %vm3809_vm0, %v3808_v1  ;;  %3746 = vrcp.f32 %v1874_v62 }
 0xda4   :  { %3604 = vmatprep.subr.mxu1 %v3808_v1  ;;  %v2233_v39 = vpop.permute.xlu0 %2232  ;;  %3748 = vrcp.f32 %v1877_v0 }
 0xda5   :  { %v2105_v36 = vmul.f32 %v4647_v15, %v2100_v60  ;;  %3609 = vmatpush3.msra.mxu1 %v2237_v51  ;;  %3520 = vmatpush3.msra.mxu0 %v2233_v39  ;;  %3750 = vrcp.f32 %v1880_v33 }
 0xda6   :  { %v3739_v34 = vpop.eup %3738  ;;  %3605 = vmatprep.subr.mxu1 %v3808_v1  ;;  %3521 = vmatprep.subr.mxu0 %v3808_v1 }
 0xda7   :  { %v2091_v37 = vmul.f32 %v3739_v34, %v2077_v24  ;;  %3502 = vmatmul.mubr.msk.f32.gmra.mxu1 %vm517_vm8, %v2105_v36 }
 0xda8   :  { %3610 = vmatpush3.msra.mxu1 %v2235_v12  ;;  %3504 = vmatprep.mubr.msk.f32.mxu1 %vm3809_vm0, %v3808_v1 }
 0xda9   :  { %v2096_v43 = vsub.f32 2.0, %v2091_v37  ;;  %3606 = vmatprep.subr.mxu1 %v3808_v1 }
 0xdaa   :  { %v3741_v35 = vpop.eup %3740  ;;  %3611 = vmatpush3.msra.mxu1 %v2233_v39 }
 0xdab   :  { %v2101_v45 = vmul.f32 %v3739_v34, %v2096_v43  ;;  %v2092_v10 = vmul.f32 %v3741_v35, %v2080_v55  ;;  %3607 = vmatprep.subr.mxu1 %v3808_v1 }
 0xdad   :  { %v2106_v28 = vmul.f32 %v4668_v17, %v2101_v45  ;;  %v2097_v20 = vsub.f32 2.0, %v2092_v10 }
 0xdae   :  { %v3743_v47 = vpop.eup %3742 }
 0xdaf   :  { %v2102_v27 = vmul.f32 %v3741_v35, %v2097_v20  ;;  %v2093_v48 = vmul.f32 %v3743_v47, %v2083_v49  ;;  %3505 = vmatmul.mubr.msk.f32.gmra.mxu1 %vm517_vm8, %v2106_v28  ;;  %v3745_v6 = vpop.eup %3744 }
 0xdb0   :  { %3507 = vmatprep.mubr.msk.f32.mxu1 %vm3809_vm0, %v3808_v1  ;;  %v1889_v7 = vmul.f32 %v3745_v6, %v1871_v46  ;;  %v3747_v17 = vpop.eup %3746 }
 0xdb1   :  { %v2107_v40 = vmul.f32 %v4678_v13, %v2102_v27  ;;  %v2098_v15 = vsub.f32 2.0, %v2093_v48  ;;  %v1890_v38 = vmul.f32 %v3747_v17, %v1874_v62  ;;  %v3749_v58 = vpop.eup %3748 }
 0xdb2   :  { %v1894_v26 = vsub.f32 2.0, %v1889_v7  ;;  %v1891_v19 = vmul.f32 %v3749_v58, %v1877_v0  ;;  %v3751_v50 = vpop.eup %3750 }
 0xdb3   :  { %v2103_v9 = vmul.f32 %v3743_v47, %v2098_v15  ;;  %3508 = vmatmul.mubr.msk.f32.gmra.mxu1 %vm517_vm8, %v2107_v40  ;;  %v1895_v30 = vsub.f32 2.0, %v1890_v38  ;;  %v1892_v51 = vmul.f32 %v3751_v50, %v1880_v33 }
 0xdb4   :  { %3510 = vmatprep.mubr.msk.f32.mxu1 %vm3809_vm0, %v3808_v1  ;;  %v1899_v13 = vmul.f32 %v3745_v6, %v1894_v26  ;;  %v1896_v61 = vsub.f32 2.0, %v1891_v19 }
 0xdb5   :  { %v2108_v59 = vmul.f32 %v4684_v8, %v2103_v9  ;;  %v1900_v22 = vmul.f32 %v3747_v17, %v1895_v30  ;;  %v1897_v41 = vsub.f32 2.0, %v1892_v51 }
 0xdb6   :  { %v1904_v14 = vmul.f32 %v4645_v57, %v1899_v13  ;;  %v1901_v2 = vmul.f32 %v3749_v58, %v1896_v61 }
 0xdb7   :  { %3511 = vmatmul.mubr.msk.f32.gmra.mxu1 %vm517_vm8, %v2108_v59  ;;  %v1905_v4 = vmul.f32 %v4654_v3, %v1900_v22  ;;  %v1902_v24 = vmul.f32 %v3751_v50, %v1897_v41 }
 0xdb8   :  { %3535 = vmatprep.mubr.msk.f32.mxu1 %vm3809_vm0, %v3808_v1  ;;  %v1906_v57 = vmul.f32 %v4664_v25, %v1901_v2 }
 0xdb9   :  { %v1907_v63 = vmul.f32 %v4675_v18, %v1902_v24 }
 0xdd8   :  { %v1883_v8 = vpop.xlane.xlu1 %1882 }
 0xdd9   :  { %3752 = vrcp.f32 %v1883_v8 }
 0xddc   :  { %v2231_v12 = vpop.permute.xlu1 %2230 }
 0xddd   :  { %3522 = vmatpush3.msra.mxu0 %v2231_v12  ;;  %3612 = vmatpush3.msra.mxu1 %v2231_v12 }
 0xdde   :  { %3524 = vmatmul.mubr.msk.f32.vlgmr.msra.gmra.mxu0 %vm517_vm8, %v1904_v14  ;;  %3538 = vmatprep.subr.mxu1 %v3808_v1 }
 0xddf   :  { %3526 = vmatprep.mubr.msk.f32.mxu0 %vm3809_vm0, %v3808_v1  ;;  %3561 = vmatprep.subr.mxu0 %v3808_v1 }
 0xde2   :  { %3527 = vmatmul.mubr.msk.f32.gmra.mxu0 %vm517_vm8, %v1905_v4 }
 0xde3   :  { %3529 = vmatprep.mubr.msk.f32.mxu0 %vm3809_vm0, %v3808_v1 }
 0xde6   :  { %v3753_v5 = vpop.eup %3752  ;;  %3530 = vmatmul.mubr.msk.f32.gmra.mxu0 %vm517_vm8, %v1906_v57 }
 0xde7   :  { %v1893_v11 = vmul.f32 %v3753_v5, %v1883_v8  ;;  %3532 = vmatprep.mubr.msk.f32.mxu0 %vm3809_vm0, %v3808_v1 }
 0xde9   :  { %v1898_v3 = vsub.f32 2.0, %v1893_v11 }
 0xdea   :  { %3533 = vmatmul.mubr.msk.f32.gmra.mxu0 %vm517_vm8, %v1907_v63 }
 0xdeb   :  { %v1903_v55 = vmul.f32 %v3753_v5, %v1898_v3  ;;  %3577 = vmatprep.mubr.msk.f32.mxu0 %vm3809_vm0, %v3808_v1 }
 0xded   :  { %v1908_v56 = vmul.f32 %v4693_v23, %v1903_v55  ;;  %v3046_v23 = vld [vmem:[%s4950_s2 + $0x30] ss:$0 sm:$0xff] }
 0xdef   :  { %3536 = vmatmul.mubr.msk.f32.vlgmr.msra.gmra.mxu1 %vm517_vm8, %v1908_v56 }
 0xdf0   :  { %3546 = vmatprep.mubr.msk.f32.mxu1 %vm3809_vm0, %v3808_v1 }
 0xe62   :  { %v2206_v25 = vpop.f32.mrf.mxu1 }
 0xe64   :  { %v3500_v32 = vpop.f32.mrf.mxu1 }
 0xe67   :  { %v2211_v16 = vpop.f32.mrf.mxu1 }
 0xe69   :  { %v3503_v29 = vpop.f32.mrf.mxu1 }
 0xe6f   :  { %v2216_v49 = vpop.f32.mrf.mxu1 }
 0xe71   :  { %v3506_v18 = vpop.f32.mrf.mxu1 }
 0xe72   :  { %v2453_v18 = vld [vmem:[%s4949_s1 + $0xe0] sm:$0xff] }
 0xe73   :  { %v2221_v21 = vpop.f32.mrf.mxu1 }
 0xe75   :  { %v3509_v60 = vpop.f32.mrf.mxu1 }
 0xe76   :  { %v2451_v60 = vld [vmem:[%s4949_s1 + $0xd0] sm:$0xff] }
 0xe77   :  { %v2226_v39 = vpop.f32.mrf.mxu1 }
 0xe79   :  { %v3512_v36 = vpop.f32.mrf.mxu1 }
 0xe9e   :  { %v2327_v34 = vpop.f32.mrf.mxu0 }
 0xe9f   :  { %v2328_v37 = vadd.f32 %v2327_v34, %v2206_v25 }
 0xea0   :  { %v3525_v43 = vpop.f32.mrf.mxu0 }
 0xea1   :  { %v2351_v35 = vadd.f32 %v2328_v37, %v4428_v42 }
 0xea2   :  { %v2332_v45 = vpop.f32.mrf.mxu0 }
 0xea3   :  { %v2333_v10 = vadd.f32 %v2332_v45, %v2211_v16  ;;  %v2361_v28 = vadd.f32 %v3046_v23, %v2351_v35 }
 0xea4   :  { %v3528_v20 = vpop.f32.mrf.mxu0 }
 0xea5   :  { %v2352_v47 = vadd.f32 %v2333_v10, %v4433_v54  ;;  %v2368_v27 = vsel %vm182_vm2, %v2361_v28, 0.0 }
 0xea6   :  { %2369 = vadd.xlane.f32.xlu0 %v2368_v27  ;;  %v2337_v48 = vpop.f32.mrf.mxu0 }
 0xea7   :  { %v2338_v40 = vadd.f32 %v2337_v48, %v2216_v49  ;;  %v2362_v15 = vadd.f32 %v3046_v23, %v2352_v47  ;;  %v2454_v49 = vld [vmem:[%s4949_s1 + $0xe8] sm:$0xff] }
 0xea8   :  { %v3531_v9 = vpop.f32.mrf.mxu0  ;;  %3539 = vmatpush3.msra.mxu1 %v2454_v49 }
 0xea9   :  { %v2353_v59 = vadd.f32 %v2338_v40, %v4438_v31  ;;  %v2371_v46 = vsel %vm182_vm2, %v2362_v15, 0.0  ;;  %3540 = vmatprep.subr.mxu1 %v3808_v1 }
 0xeaa   :  { %2372 = vadd.xlane.f32.xlu1 %v2371_v46  ;;  %v2342_v62 = vpop.f32.mrf.mxu0  ;;  %3541 = vmatpush3.msra.mxu1 %v2453_v18  ;;  %v3048_v46 = vld [vmem:[%s4950_s2 + $0x32] ss:$0 sm:$0xff] }
 0xeab   :  { %v2343_v42 = vadd.f32 %v2342_v62, %v2221_v21  ;;  %v2363_v0 = vadd.f32 %v3046_v23, %v2353_v59  ;;  %v2452_v21 = vld [vmem:[%s4949_s1 + $0xd8] sm:$0xff]  ;;  %3542 = vmatprep.subr.mxu1 %v3808_v1 }
 0xeac   :  { %v3534_v33 = vpop.f32.mrf.mxu0  ;;  %3543 = vmatpush3.msra.mxu1 %v2452_v21 }
 0xead   :  { %v2354_v6 = vadd.f32 %v2343_v42, %v4443_v44  ;;  %v2374_v54 = vsel %vm182_vm2, %v2363_v0, 0.0  ;;  %3544 = vmatprep.subr.mxu1 %v3808_v1 }
 0xeae   :  { %2375 = vadd.xlane.f32.xlu0 %v2374_v54  ;;  %3545 = vmatpush3.msra.mxu1 %v2451_v60 }
 0xeaf   :  { %v2347_v7 = vpop.f32.mrf.mxu1  ;;  %v2364_v17 = vadd.f32 %v3046_v23, %v2354_v6  ;;  %3592 = vmatprep.subr.mxu1 %v3808_v1 }
 0xeb0   :  { %v2348_v26 = vadd.f32 %v2347_v7, %v2226_v39 }
 0xeb1   :  { %v3537_v38 = vpop.f32.mrf.mxu1  ;;  %v2377_v58 = vsel %vm182_vm2, %v2364_v17, 0.0 }
 0xeb2   :  { %v2355_v31 = vadd.f32 %v2348_v26, %v4448_v53  ;;  %2378 = vadd.xlane.f32.xlu0 %v2377_v58 }
 0xeb4   :  { %v4760_v13 = vadd.f32 %v3046_v23, %v2355_v31 }
 0xeb6   :  { %v2380_v30 = vsel %vm195_vm3, %v4760_v13, 0.0 }
 0xeb7   :  { %2381 = vadd.xlane.f32.xlu0 %v2380_v30 }
 0xf2f   :  { %v2370_v19 = vpop.xlane.xlu0 %2369 }
 0xf30   :  { %v2383_v44 = vmul.f32 0.03125, %v2370_v19 }
 0xf32   :  { %v2388_v8 = vsub.f32 %v2361_v28, %v2383_v44 }
 0xf33   :  { %v2373_v50 = vpop.xlane.xlu1 %2372 }
 0xf34   :  { %v2384_v14 = vmul.f32 0.03125, %v2373_v50  ;;  %v2393_v22 = vmul.f32 %v2388_v8, %v2388_v8 }
 0xf36   :  { %v4764_v61 = vsub.f32 %v2362_v15, %v2384_v14  ;;  %v2398_v51 = vsel %vm182_vm2, %v2393_v22, 0.0  ;;  %v3047_v15 = vld [vmem:[%s4950_s2 + $0x31] ss:$0 sm:$0xff]  ;;  %v2707_v22 = vld [vmem:[%s4949_s1 + $0x128] sm:$0xff] }
 0xf37   :  { %2399 = vadd.xlane.f32.xlu1 %v2398_v51  ;;  %v2376_v12 = vpop.xlane.xlu0 %2375  ;;  %3562 = vmatpush3.msra.mxu0 %v2707_v22  ;;  %v2705_v51 = vld [vmem:[%s4949_s1 + $0x118] sm:$0xff] }
 0xf38   :  { %v2385_v53 = vmul.f32 0.03125, %v2376_v12  ;;  %v2394_v4 = vmul.f32 %v4764_v61, %v4764_v61  ;;  %3563 = vmatprep.subr.mxu0 %v3808_v1  ;;  %v2704_v12 = vld [vmem:[%s4949_s1 + $0x110] sm:$0xff] }
 0xf3a   :  { %v4769_v2 = vsub.f32 %v2363_v0, %v2385_v53  ;;  %v2401_v41 = vsel %vm182_vm2, %v2394_v4, 0.0  ;;  %v2703_v53 = vld [vmem:[%s4949_s1 + $0x108] sm:$0xff]  ;;  %v2702_v4 = vld [vmem:[%s4949_s1 + $0x100] sm:$0xff] }
 0xf3b   :  { %2402 = vadd.xlane.f32.xlu0 %v2401_v41  ;;  %v2379_v57 = vpop.xlane.xlu0 %2378  ;;  %v2700_v41 = vld [vmem:[%s4949_s1 + $0xf0] sm:$0xff] }
 0xf3c   :  { %v2386_v24 = vmul.f32 0.03125, %v2379_v57  ;;  %v2395_v5 = vmul.f32 %v4769_v2, %v4769_v2  ;;  %v3049_v57 = vld [vmem:[%s4950_s2 + $0x33] ss:$0 sm:$0xff] }
 0xf3e   :  { %v4774_v11 = vsub.f32 %v2364_v17, %v2386_v24  ;;  %v2404_v63 = vsel %vm182_vm2, %v2395_v5, 0.0 }
 0xf3f   :  { %2405 = vadd.xlane.f32.xlu1 %v2404_v63 }
 0xf40   :  { %v2382_v3 = vpop.xlane.xlu0 %2381  ;;  %v2396_v55 = vmul.f32 %v4774_v11, %v4774_v11 }
 0xf41   :  { %v2387_v56 = vmul.f32 0.03125, %v2382_v3 }
 0xf42   :  { %v2407_v25 = vsel %vm182_vm2, %v2396_v55, 0.0 }
 0xf43   :  { %v2392_v32 = vsub.f32 %v4760_v13, %v2387_v56  ;;  %2408 = vadd.xlane.f32.xlu0 %v2407_v25 }
 0xf45   :  { %v2397_v16 = vmul.f32 %v2392_v32, %v2392_v32 }
 0xf47   :  { %v2410_v29 = vsel %vm195_vm3, %v2397_v16, 0.0 }
 0xf48   :  { %2411 = vadd.xlane.f32.xlu1 %v2410_v29 }
 0xfc0   :  { %v2400_v39 = vpop.xlane.xlu1 %2399 }
 0xfc1   :  { %v2413_v36 = vmul.f32 0.03125, %v2400_v39 }
 0xfc3   :  { %v2418_v34 = vadd.f32 1e-06, %v2413_v36 }
 0xfc4   :  { %v2403_v37 = vpop.xlane.xlu0 %2402 }
 0xfc5   :  { %3754 = vrsqrt.f32 %v2418_v34  ;;  %v2414_v43 = vmul.f32 0.03125, %v2403_v37 }
 0xfc7   :  { %v2419_v23 = vadd.f32 1e-06, %v2414_v43 }
 0xfc8   :  { %v2406_v35 = vpop.xlane.xlu1 %2405 }
 0xfc9   :  { %3756 = vrsqrt.f32 %v2419_v23  ;;  %v2415_v45 = vmul.f32 0.03125, %v2406_v35 }
 0xfcb   :  { %v2420_v10 = vadd.f32 1e-06, %v2415_v45 }
 0xfcc   :  { %v2409_v28 = vpop.xlane.xlu0 %2408 }
 0xfcd   :  { %3758 = vrsqrt.f32 %v2420_v10  ;;  %v2416_v20 = vmul.f32 0.03125, %v2409_v28 }
 0xfcf   :  { %v2421_v47 = vadd.f32 1e-06, %v2416_v20 }
 0xfd1   :  { %3760 = vrsqrt.f32 %v2421_v47  ;;  %v2412_v27 = vpop.xlane.xlu1 %2411 }
 0xfd2   :  { %v3755_v48 = vpop.eup %3754  ;;  %v2417_v40 = vmul.f32 0.03125, %v2412_v27 }
 0xfd3   :  { %v2428_v9 = vmul.f32 %v3755_v48, %v2388_v8 }
 0xfd4   :  { %v2422_v59 = vadd.f32 1e-06, %v2417_v40 }
 0xfd5   :  { %v2437_v62 = vmul.f32 %v3047_v15, %v2428_v9 }
 0xfd6   :  { %v3757_v42 = vpop.eup %3756  ;;  %3762 = vrsqrt.f32 %v2422_v59 }
 0xfd7   :  { %v2446_v0 = vadd.f32 %v3048_v46, %v2437_v62  ;;  %v2429_v33 = vmul.f32 %v3757_v42, %v4764_v61  ;;  %v2706_v61 = vld [vmem:[%s4949_s1 + $0x120] sm:$0xff] }
 0xfd8   :  { %3564 = vmatpush3.msra.mxu0 %v2706_v61 }
 0xfd9   :  { %3547 = vmatmul.mubr.msk.f32.vlgmr.msra.gmra.mxu1 %vm182_vm2, %v2446_v0  ;;  %v2438_v6 = vmul.f32 %v3047_v15, %v2429_v33  ;;  %3565 = vmatprep.subr.mxu0 %v3808_v1 }
 0xfda   :  { %v3759_v54 = vpop.eup %3758  ;;  %3549 = vmatprep.mubr.msk.f32.mxu1 %vm3809_vm0, %v3808_v1  ;;  %3566 = vmatpush3.msra.mxu0 %v2705_v51 }
 0xfdb   :  { %v2447_v7 = vadd.f32 %v3048_v46, %v2438_v6  ;;  %v2430_v17 = vmul.f32 %v3759_v54, %v4769_v2  ;;  %3567 = vmatprep.subr.mxu0 %v3808_v1  ;;  %v2701_v2 = vld [vmem:[%s4949_s1 + $0xf8] sm:$0xff] }
 0xfdc   :  { %3568 = vmatpush3.msra.mxu0 %v2704_v12 }
 0xfdd   :  { %3550 = vmatmul.mubr.msk.f32.gmra.mxu1 %vm182_vm2, %v2447_v7  ;;  %v2439_v26 = vmul.f32 %v3047_v15, %v2430_v17  ;;  %3569 = vmatprep.subr.mxu0 %v3808_v1 }
 0xfde   :  { %v3761_v38 = vpop.eup %3760  ;;  %3552 = vmatprep.mubr.msk.f32.mxu1 %vm3809_vm0, %v3808_v1  ;;  %3570 = vmatpush3.msra.mxu0 %v2703_v53 }
 0xfdf   :  { %v2448_v58 = vadd.f32 %v3048_v46, %v2439_v26  ;;  %v2431_v31 = vmul.f32 %v3761_v38, %v4774_v11  ;;  %3571 = vmatprep.subr.mxu0 %v3808_v1 }
 0xfe0   :  { %3572 = vmatpush3.msra.mxu0 %v2702_v4 }
 0xfe1   :  { %3553 = vmatmul.mubr.msk.f32.gmra.mxu1 %vm182_vm2, %v2448_v58  ;;  %v2440_v30 = vmul.f32 %v3047_v15, %v2431_v31  ;;  %3573 = vmatprep.subr.mxu0 %v3808_v1 }
 0xfe2   :  { %3555 = vmatprep.mubr.msk.f32.mxu1 %vm3809_vm0, %v3808_v1  ;;  %3574 = vmatpush3.msra.mxu0 %v2701_v2 }
 0xfe3   :  { %v3763_v19 = vpop.eup %3762  ;;  %v2449_v44 = vadd.f32 %v3048_v46, %v2440_v30  ;;  %3575 = vmatprep.subr.mxu0 %v3808_v1 }
 0xfe4   :  { %v2432_v8 = vmul.f32 %v3763_v19, %v2392_v32  ;;  %3576 = vmatpush3.msra.mxu0 %v2700_v41 }
 0xfe5   :  { %3556 = vmatmul.mubr.msk.f32.gmra.mxu1 %vm182_vm2, %v2449_v44 }
 0xfe6   :  { %3558 = vmatprep.mubr.msk.f32.mxu1 %vm3809_vm0, %v3808_v1  ;;  %v2441_v50 = vmul.f32 %v3047_v15, %v2432_v8 }
 0xfe8   :  { %v2450_v14 = vadd.f32 %v3048_v46, %v2441_v50 }
 0xfea   :  { %3559 = vmatmul.mubr.msk.f32.gmra.mxu1 %vm182_vm2, %v2450_v14 }
 0xfeb   :  { %3600 = vmatprep.mubr.msk.f32.mxu1 %vm3809_vm0, %v3808_v1 }
0x1099   :  { %v2541_v24 = vpop.f32.mrf.mxu1 }
0x109a   :  { %v4856_v5 = vadd.f32 %v3049_v57, %v2541_v24 }
0x109b   :  { %v3548_v11 = vpop.f32.mrf.mxu1 }
0x109c   :  { %v4859_v63 = vmul.f32 0.70710677, %v4856_v5 }
0x109d   :  { %v2546_v3 = vpop.f32.mrf.mxu1 }
0x109e   :  { %v2585_v55 = vand.u32 2147483647, %v4859_v63  ;;  %v4862_v56 = vadd.f32 %v3049_v57, %v2546_v3  ;;  %vm2575_vm1 = vcmp.ge.f32.partialorder %v4859_v63, 0.0 }
0x109f   :  { %v3551_v25 = vpop.f32.mrf.mxu1 }
0x10a0   :  { %v2590_v32 = vmul.f32 0.3275911, %v2585_v55  ;;  %v4865_v16 = vmul.f32 0.70710677, %v4862_v56  ;;  %v2655_v45 = vsub.f32 0.0, %v2585_v55 }
0x10a1   :  { %v2551_v29 = vpop.f32.mrf.mxu1 }
0x10a2   :  { %v2595_v49 = vadd.f32 1.0, %v2590_v32  ;;  %v2586_v18 = vand.u32 2147483647, %v4865_v16  ;;  %v4868_v21 = vadd.f32 %v3049_v57, %v2551_v29  ;;  %v2660_v15 = vmul.f32 %v2655_v45, %v2585_v55 }
0x10a3   :  { %v3554_v60 = vpop.f32.mrf.mxu1  ;;  %vm2576_vm4 = vcmp.ge.f32.partialorder %v4865_v16, 0.0 }
0x10a4   :  { %3764 = vrcp.f32 %v2595_v49  ;;  %v2591_v39 = vmul.f32 0.3275911, %v2586_v18  ;;  %v4871_v36 = vmul.f32 0.70710677, %v4868_v21  ;;  %v2656_v59 = vsub.f32 0.0, %v2586_v18 }
0x10a5   :  { %v2556_v34 = vpop.f32.mrf.mxu1  ;;  %v2665_v33 = vmul.f32 1.442695, %v2660_v15 }
0x10a6   :  { %v2596_v37 = vadd.f32 1.0, %v2591_v39  ;;  %v4873_v43 = vadd.f32 %v3049_v57, %v2556_v34  ;;  %v2587_v23 = vand.u32 2147483647, %v4871_v36  ;;  %v2661_v54 = vmul.f32 %v2656_v59, %v2586_v18 }
0x10a7   :  { %v3557_v35 = vpop.f32.mrf.mxu1  ;;  %vm2577_vm7 = vcmp.ge.f32.partialorder %v4871_v36, 0.0 }
0x10a8   :  { %3766 = vrcp.f32 %v2596_v37  ;;  %v2592_v10 = vmul.f32 0.3275911, %v2587_v23  ;;  %v4877_v28 = vmul.f32 0.70710677, %v4873_v43  ;;  %v2657_v17 = vsub.f32 0.0, %v2587_v23 }
0x10a9   :  { %v2667_v19 = vmul.f32 1.442695, %v2661_v54  ;;  %v2580_v54 = vsel %vm2575_vm1, 1.0, %v3817_v52 }
0x10aa   :  { %v2561_v20 = vpop.f32.mrf.mxu1  ;;  %v2597_v47 = vadd.f32 1.0, %v2592_v10  ;;  %v2588_v27 = vand.u32 2147483647, %v4877_v28  ;;  %v2662_v44 = vmul.f32 %v2657_v17, %v2587_v23  ;;  %vm2578_vm8 = vcmp.ge.f32.partialorder %v4877_v28, 0.0 }
0x10ab   :  { %v4880_v48 = vadd.f32 %v3049_v57, %v2561_v20 }
0x10ac   :  { %v3560_v40 = vpop.f32.mrf.mxu1  ;;  %3768 = vrcp.f32 %v2597_v47  ;;  %v2593_v9 = vmul.f32 0.3275911, %v2588_v27  ;;  %v2658_v8 = vsub.f32 0.0, %v2588_v27  ;;  %v2669_v53 = vmul.f32 1.442695, %v2662_v44 }
0x10ad   :  { %v4883_v46 = vmul.f32 0.70710677, %v4880_v48 }
0x10ae   :  { %v2598_v62 = vadd.f32 1.0, %v2593_v9  ;;  %v2663_v4 = vmul.f32 %v2658_v8, %v2588_v27 }
0x10af   :  { %v2589_v42 = vand.u32 2147483647, %v4883_v46  ;;  %vm2579_vm9 = vcmp.ge.f32.partialorder %v4883_v46, 0.0 }
0x10b0   :  { %3770 = vrcp.f32 %v2598_v62  ;;  %v2671_v29 = vmul.f32 1.442695, %v2663_v4 }
0x10b1   :  { %v3765_v0 = vpop.eup %3764  ;;  %v2594_v7 = vmul.f32 0.3275911, %v2589_v42  ;;  %3772 = vpow2.f32 %v2665_v33  ;;  %v2659_v57 = vsub.f32 0.0, %v2589_v42 }
0x10b2   :  { %v2610_v6 = vmul.f32 1.0614054, %v3765_v0 }
0x10b3   :  { %v2599_v38 = vadd.f32 1.0, %v2594_v7  ;;  %v2664_v60 = vmul.f32 %v2659_v57, %v2589_v42 }
0x10b4   :  { %v2615_v26 = vadd.f32 -1.4531521, %v2610_v6 }
0x10b5   :  { %v3767_v58 = vpop.eup %3766  ;;  %3774 = vrcp.f32 %v2599_v38  ;;  %v2673_v15 = vmul.f32 1.442695, %v2664_v60 }
0x10b6   :  { %v2620_v31 = vmul.f32 %v3765_v0, %v2615_v26  ;;  %v2611_v30 = vmul.f32 1.0614054, %v3767_v58  ;;  %3776 = vpow2.f32 %v2667_v19 }
0x10b7   :  { %3778 = vpow2.f32 %v2669_v53 }
0x10b8   :  { %v2625_v50 = vadd.f32 1.4214138, %v2620_v31  ;;  %v2616_v14 = vadd.f32 -1.4531521, %v2611_v30  ;;  %3780 = vpow2.f32 %v2671_v29  ;;  %v2565_v30 = vmul.f32 0.5, %v4856_v5 }
0x10b9   :  { %v3769_v22 = vpop.eup %3768  ;;  %3782 = vpow2.f32 %v2673_v15 }
0x10ba   :  { %v2630_v61 = vmul.f32 %v3765_v0, %v2625_v50  ;;  %v2621_v51 = vmul.f32 %v3767_v58, %v2616_v14  ;;  %v2612_v12 = vmul.f32 1.0614054, %v3769_v22 }
0x10bc   :  { %v2635_v2 = vadd.f32 -0.28449672, %v2630_v61  ;;  %v2626_v41 = vadd.f32 1.4214138, %v2621_v51  ;;  %v2617_v24 = vadd.f32 -1.4531521, %v2612_v12 }
0x10bd   :  { %v3771_v11 = vpop.eup %3770 }
0x10be   :  { %v2640_v3 = vmul.f32 %v3765_v0, %v2635_v2  ;;  %v2631_v55 = vmul.f32 %v3767_v58, %v2626_v41  ;;  %v2622_v25 = vmul.f32 %v3769_v22, %v2617_v24  ;;  %v2613_v32 = vmul.f32 1.0614054, %v3771_v11  ;;  %v3773_v37 = vpop.eup %3772 }
0x10bf   :  { %v2566_v2 = vmul.f32 0.5, %v4862_v56  ;;  %v2567_v56 = vmul.f32 0.5, %v4868_v21 }
0x10c0   :  { %v2645_v49 = vadd.f32 0.2548296, %v2640_v3  ;;  %v2636_v18 = vadd.f32 -0.28449672, %v2631_v55  ;;  %v2627_v39 = vadd.f32 1.4214138, %v2622_v25 }
0x10c1   :  { %v2618_v34 = vadd.f32 -1.4531521, %v2613_v32  ;;  %v2582_v55 = vsel %vm2577_vm7, 1.0, %v3817_v52 }
0x10c2   :  { %v2650_v23 = vmul.f32 %v3765_v0, %v2645_v49  ;;  %v2641_v35 = vmul.f32 %v3767_v58, %v2636_v18  ;;  %v3775_v45 = vpop.eup %3774  ;;  %v2632_v10 = vmul.f32 %v3769_v22, %v2627_v39 }
0x10c3   :  { %v2623_v20 = vmul.f32 %v3771_v11, %v2618_v34  ;;  %v2614_v40 = vmul.f32 1.0614054, %v3775_v45  ;;  %v3777_v6 = vpop.eup %3776 }
0x10c4   :  { %v2675_v47 = vmul.f32 %v3773_v37, %v2650_v23  ;;  %v2646_v27 = vadd.f32 0.2548296, %v2641_v35  ;;  %v2637_v9 = vadd.f32 -0.28449672, %v2632_v10  ;;  %v3779_v61 = vpop.eup %3778  ;;  %v2568_v23 = vmul.f32 0.5, %v4873_v43 }
0x10c5   :  { %v2628_v59 = vadd.f32 1.4214138, %v2623_v20  ;;  %v2619_v42 = vadd.f32 -1.4531521, %v2614_v40  ;;  %v2584_v20 = vsel %vm2579_vm9, 1.0, %v3817_v52 }
0x10c6   :  { %v2680_v62 = vsub.f32 1.0, %v2675_v47  ;;  %v2651_v33 = vmul.f32 %v3767_v58, %v2646_v27  ;;  %v2642_v0 = vmul.f32 %v3769_v22, %v2637_v9  ;;  %v2581_v58 = vsel %vm2576_vm4, 1.0, %v3817_v52 }
0x10c7   :  { %v2633_v7 = vmul.f32 %v3771_v11, %v2628_v59  ;;  %v2624_v26 = vmul.f32 %v3775_v45, %v2619_v42  ;;  %v3055_v42 = vld [vmem:[%s4950_s2 + $0x34] ss:$0 sm:$0xff] }
0x10c8   :  { %v2685_v63 = vmul.f32 %v2680_v62, %v2580_v54  ;;  %v2676_v17 = vmul.f32 %v3777_v6, %v2651_v33  ;;  %v2647_v38 = vadd.f32 0.2548296, %v2642_v0 }
0x10c9   :  { %v2638_v31 = vadd.f32 -0.28449672, %v2633_v7  ;;  %v2629_v8 = vadd.f32 1.4214138, %v2624_v26 }
0x10ca   :  { %v2690_v19 = vadd.f32 1.0, %v2685_v63  ;;  %v2681_v44 = vsub.f32 1.0, %v2676_v17  ;;  %v2652_v50 = vmul.f32 %v3769_v22, %v2647_v38  ;;  %v3781_v22 = vpop.eup %3780 }
0x10cb   :  { %v2643_v14 = vmul.f32 %v3771_v11, %v2638_v31  ;;  %v2634_v12 = vmul.f32 %v3775_v45, %v2629_v8  ;;  %v3783_v39 = vpop.eup %3782 }
0x10cc   :  { %v2695_v51 = vmul.f32 %v2690_v19, %v2565_v30  ;;  %v2686_v16 = vmul.f32 %v2681_v44, %v2581_v58  ;;  %v2677_v53 = vmul.f32 %v3779_v61, %v2652_v50  ;;  %v2843_v30 = vld [vmem:[%s4949_s1 + $0x28] sm:$0xff]  ;;  %v2841_v19 = vld [vmem:[%s4949_s1 + $0x18] sm:$0xff]  ;;  %v2840_v44 = vld [vmem:[%s4949_s1 + $0x10] sm:$0xff] }
0x10cd   :  { %v2648_v4 = vadd.f32 0.2548296, %v2643_v14  ;;  %v2639_v57 = vadd.f32 -0.28449672, %v2634_v12  ;;  %3593 = vmatpush3.msra.mxu1 %v2843_v30  ;;  %v3061_v61 = vld [vmem:[%s4950_s2 + $0x22] ss:$0 sm:$0xff] }
0x10ce   :  { %v2691_v41 = vadd.f32 1.0, %v2686_v16  ;;  %3578 = vmatmul.mubr.msk.f32.vlgmr.msra.gmra.mxu0 %vm1394_vm14, %v2695_v51  ;;  %v2682_v5 = vsub.f32 1.0, %v2677_v53  ;;  %3594 = vmatprep.subr.mxu1 %v3808_v1  ;;  %v3062_v16 = vld [vmem:[%s4950_s2 + $0x23] ss:$0 sm:$0xff] }
0x10cf   :  { %v2653_v24 = vmul.f32 %v3771_v11, %v2648_v4  ;;  %3580 = vmatprep.mubr.msk.f32.mxu0 %vm3809_vm0, %v3808_v1  ;;  %v2644_v25 = vmul.f32 %v3775_v45, %v2639_v57  ;;  %v2583_v11 = vsel %vm2578_vm8, 1.0, %v3817_v52 }
0x10d0   :  { %v2696_v3 = vmul.f32 %v2691_v41, %v2566_v2  ;;  %v2687_v32 = vmul.f32 %v2682_v5, %v2582_v55 }
0x10d1   :  { %v2678_v36 = vmul.f32 %v3781_v22, %v2653_v24  ;;  %v2649_v29 = vadd.f32 0.2548296, %v2644_v25 }
0x10d2   :  { %3581 = vmatmul.mubr.msk.f32.gmra.mxu0 %vm1394_vm14, %v2696_v3  ;;  %v2692_v49 = vadd.f32 1.0, %v2687_v32 }
0x10d3   :  { %v2683_v18 = vsub.f32 1.0, %v2678_v36  ;;  %3583 = vmatprep.mubr.msk.f32.mxu0 %vm3809_vm0, %v3808_v1  ;;  %v2654_v60 = vmul.f32 %v3775_v45, %v2649_v29  ;;  %v2569_v45 = vmul.f32 0.5, %v4880_v48 }
0x10d4   :  { %v2697_v34 = vmul.f32 %v2692_v49, %v2567_v56 }
0x10d5   :  { %v2688_v37 = vmul.f32 %v2683_v18, %v2583_v11  ;;  %v2679_v28 = vmul.f32 %v3783_v39, %v2654_v60 }
0x10d6   :  { %3584 = vmatmul.mubr.msk.f32.gmra.mxu0 %vm1394_vm14, %v2697_v34 }
0x10d7   :  { %v2693_v35 = vadd.f32 1.0, %v2688_v37  ;;  %v2684_v21 = vsub.f32 1.0, %v2679_v28  ;;  %3586 = vmatprep.mubr.msk.f32.mxu0 %vm3809_vm0, %v3808_v1 }
0x10d9   :  { %v2698_v10 = vmul.f32 %v2693_v35, %v2568_v23  ;;  %v2689_v47 = vmul.f32 %v2684_v21, %v2584_v20 }
0x10db   :  { %3587 = vmatmul.mubr.msk.f32.gmra.mxu0 %vm1394_vm14, %v2698_v10  ;;  %v2694_v27 = vadd.f32 1.0, %v2689_v47 }
0x10dc   :  { %3589 = vmatprep.mubr.msk.f32.mxu0 %vm3809_vm0, %v3808_v1 }
0x10dd   :  { %v2699_v43 = vmul.f32 %v2694_v27, %v2569_v45 }
0x10df   :  { %3590 = vmatmul.mubr.msk.f32.gmra.mxu0 %vm1394_vm14, %v2699_v43 }
0x118e   :  { %v2794_v46 = vpop.f32.mrf.mxu0 }
0x1190   :  { %v3579_v40 = vpop.f32.mrf.mxu0 }
0x1192   :  { %v2798_v15 = vpop.f32.mrf.mxu0 }
0x1194   :  { %v3582_v9 = vpop.f32.mrf.mxu0 }
0x1196   :  { %v2802_v59 = vpop.f32.mrf.mxu0 }
0x1198   :  { %v3585_v62 = vpop.f32.mrf.mxu0 }
0x119b   :  { %v2806_v33 = vpop.f32.mrf.mxu0 }
0x119d   :  { %v3588_v52 = vpop.f32.mrf.mxu0 }
0x119f   :  { %v2810_v48 = vpop.f32.mrf.mxu0 }
0x11a0   :  { %v2811_v6 = vadd.f32 %v3055_v42, %v2810_v48 }
0x11a1   :  { %v3591_v54 = vpop.f32.mrf.mxu0 }
0x11a2   :  { %v2814_v0 = vadd.f32 %v2811_v6, %v4760_v13  ;;  %v2842_v13 = vld [vmem:[%s4949_s1 + $0x20] sm:$0xff] }
0x11a3   :  { %3595 = vmatpush3.msra.mxu1 %v2842_v13 }
0x11a4   :  { %v2817_v7 = vsel %vm195_vm3, %v2814_v0, 0.0  ;;  %3596 = vmatprep.subr.mxu1 %v3808_v1 }
0x11a5   :  { %2818 = vadd.xlane.f32.xlu0 %v2817_v7  ;;  %3597 = vmatpush3.msra.mxu1 %v2841_v19 }
0x11a6   :  { %3598 = vmatprep.subr.mxu1 %v3808_v1  ;;  %v3063_v1 = vld [vmem:[%s4950_s2 + $0x24] ss:$0 sm:$0xff] }
0x11a7   :  { %3599 = vmatpush3.msra.mxu1 %v2840_v44 }
0x122e   :  { %v2819_v63 = vpop.xlane.xlu0 %2818 }
0x122f   :  { %v2820_v17 = vmul.f32 0.03125, %v2819_v63 }
0x1231   :  { %v2821_v26 = vsub.f32 %v2814_v0, %v2820_v17 }
0x1233   :  { %v2822_v38 = vmul.f32 %v2821_v26, %v2821_v26 }
0x1235   :  { %v2823_v31 = vsel %vm195_vm3, %v2822_v38, 0.0 }
0x1236   :  { %2824 = vadd.xlane.f32.xlu1 %v2823_v31 }
0x12bf   :  { %v2825_v8 = vpop.xlane.xlu1 %2824 }
0x12c0   :  { %v2826_v58 = vmul.f32 0.03125, %v2825_v8 }
0x12c2   :  { %v2827_v50 = vadd.f32 1e-06, %v2826_v58 }
0x12c4   :  { %3784 = vrsqrt.f32 %v2827_v50 }
0x12d1   :  { %v3785_v14 = vpop.eup %3784 }
0x12d2   :  { %v2829_v51 = vmul.f32 %v3785_v14, %v2821_v26 }
0x12d4   :  { %v2834_v12 = vmul.f32 %v3061_v61, %v2829_v51 }
0x12d6   :  { %v2839_v53 = vadd.f32 %v3062_v16, %v2834_v12 }
0x12d8   :  { %3601 = vmatmul.mubr.msk.f32.vlgmr.msra.gmra.mxu1 %vm182_vm2, %v2839_v53 }
0x1398   :  { %v2918_v4 = vpop.f32.mrf.mxu1 }
0x1399   :  { %v2919_v2 = vadd.f32 %v3063_v1, %v2918_v4 }
0x139a   :  { %v3602_v41 = vpop.f32.mrf.mxu1 }
0x139b   :  { %2922 = vst [vmem:[#allocation2] sm:$0x3] %v2919_v2 }
0x139c   :  { %3797 = shalt.err (!%p3794_p4)
}
0x139d   :  { %2932 = dma.vmem_to_hbm [thread:$0]  %s2930_s16, 32, %s4951_s3, [#allocation3]  }
0x139e   :  { %3806 = dma.done.wait [#allocation3], 32  }
0x139f   :  { %3807 = vsyncadd [#allocation3], 4294967264 }
0x13a0   :  { %2936 = vsyncpa [#allocation3], 1 }

</bundles_post_ra>
